<compile_context>
chip_gen: v6e
topology: v6e:2x2x1
jax: 0.10.0
libtpu: 0.0.40
codegen_flags: <defaults>
</compile_context>

<pallas_src>
import jax
import jax.numpy as jnp
from jax.experimental import pallas as pl
from jax.experimental.pallas import tpu as pltpu


# --------------------------------------------------------------------------
# Pallas kernels
# --------------------------------------------------------------------------
def _conv_mm_kernel(x_ref, w_ref, b_ref, o_ref):
    # relu(x @ w + b); x/w in bf16, accumulate + bias + relu in f32.
    acc = jnp.dot(x_ref[...], w_ref[...], preferred_element_type=jnp.float32)
    o_ref[...] = jnp.maximum(acc + b_ref[...], 0.0).astype(o_ref.dtype)


def _row_tile(m, max_rows=512):
    """Largest divisor of m that is <= max_rows and a multiple of 8, else m."""
    if m <= max_rows:
        return m
    for t in range(max_rows, 0, -1):
        if m % t == 0 and t % 8 == 0:
            return t
    return m


def conv_matmul_relu(patches, w, b, *, max_rows=512, out_dtype=jnp.bfloat16):
    """relu(patches @ w + b).  patches:(M,K) bf16, w:(K,N) bf16, b:(1,N) f32."""
    M, K = patches.shape
    _, N = w.shape
    tm = _row_tile(M, max_rows)
    grid = (M // tm,)
    return pl.pallas_call(
        _conv_mm_kernel,
        out_shape=jax.ShapeDtypeStruct((M, N), out_dtype),
        grid=grid,
        in_specs=[
            pl.BlockSpec((tm, K), lambda i: (i, 0)),
            pl.BlockSpec((K, N), lambda i: (0, 0)),
            pl.BlockSpec((1, N), lambda i: (0, 0)),
        ],
        out_specs=pl.BlockSpec((tm, N), lambda i: (i, 0)),
        compiler_params=pltpu.CompilerParams(
            dimension_semantics=("parallel",)),
    )(patches, w, b)


def _tail_kernel(flat_ref, wfc_ref, bfc_ref, h_ref,
                 wih_ref, whh_ref, bih_ref, bhh_ref,
                 wpol_ref, bpol_ref,
                 logits_ref, hnew_ref):
    # FC(5184 -> 256) + ReLU  (bf16 inputs, f32 accumulate)
    feat = jnp.dot(flat_ref[...], wfc_ref[...],
                   preferred_element_type=jnp.float32)
    feat = jnp.maximum(feat + bfc_ref[...], 0.0)              # (B, 256) f32

    # GRU cell (single step) with concatenated gate weights [r|z|n]:
    #   r = sigmoid(x W_ir + b_ir + h W_hr + b_hr)
    #   z = sigmoid(x W_iz + b_iz + h W_hz + b_hz)
    #   n = tanh  (x W_in + b_in + r * (h W_hn + b_hn))
    #   h' = (1 - z) * n + z * h
    h = h_ref[...]                                            # (B, H) f32
    H = h.shape[-1]
    gi = jnp.dot(feat, wih_ref[...],
                 preferred_element_type=jnp.float32) + bih_ref[...]   # (B, 3H)
    gh = jnp.dot(h, whh_ref[...],
                 preferred_element_type=jnp.float32) + bhh_ref[...]   # (B, 3H)
    r = jax.nn.sigmoid(gi[:, :H] + gh[:, :H])
    z = jax.nn.sigmoid(gi[:, H:2 * H] + gh[:, H:2 * H])
    n = jnp.tanh(gi[:, 2 * H:] + r * gh[:, 2 * H:])
    hnew = (1.0 - z) * n + z * h                              # (B, H)

    # Policy head
    logits = jnp.dot(hnew, wpol_ref[...],
                     preferred_element_type=jnp.float32) + bpol_ref[...]
    hnew_ref[...] = hnew.astype(hnew_ref.dtype)
    logits_ref[...] = logits.astype(logits_ref.dtype)


def fc_gru_policy(flat, h0, prep):
    """Fused Linear+ReLU -> GRU cell -> policy head, all resident in VMEM."""
    B = flat.shape[0]
    H = h0.shape[-1]
    A = prep["policy_w"].shape[-1]
    vmem = pl.BlockSpec(memory_space=pltpu.MemorySpace.VMEM)
    return pl.pallas_call(
        _tail_kernel,
        out_shape=(jax.ShapeDtypeStruct((B, A), jnp.float32),
                   jax.ShapeDtypeStruct((B, H), jnp.float32)),
        in_specs=[vmem] * 10,
        out_specs=(vmem, vmem),
    )(flat, prep["fc_w"], prep["fc_b"], h0,
      prep["gru_w_ih"], prep["gru_w_hh"], prep["gru_b_ih"], prep["gru_b_hh"],
      prep["policy_w"], prep["policy_b"])


# --------------------------------------------------------------------------
# Plain-JAX glue: im2col on NHWC activations (no 6-D transpose)
# --------------------------------------------------------------------------
def im2col_nhwc(x, k, s):
    """x:(B,H,W,C) -> (B*OH*OW, k*k*C) patches, column order (ki, kj, C)."""
    B, Hh, Ww, C = x.shape
    OH = (Hh - k) // s + 1
    OW = (Ww - k) // s + 1
    cols = []
    for i in range(k):
        for j in range(k):
            cols.append(x[:, i:i + s * OH:s, j:j + s * OW:s, :])  # (B,OH,OW,C)
    p = jnp.concatenate(cols, axis=-1)                            # (B,OH,OW,k*k*C)
    return p.reshape(B * OH * OW, k * k * C), OH, OW


# --------------------------------------------------------------------------
# Parameter layout transform (one-time, outside jit)
# --------------------------------------------------------------------------
def prepare_params(p):
    """Re-lay-out PyTorch-convention parameters into kernel-friendly layouts."""
    f32, bf16 = jnp.float32, jnp.bfloat16

    def conv_w(w):  # (Cout, Cin, kh, kw) -> (kh*kw*Cin, Cout), matches im2col order
        co = w.shape[0]
        return jnp.transpose(w, (2, 3, 1, 0)).reshape(-1, co).astype(bf16)

    # Fold PyTorch's NCHW flatten order into the FC weight columns.
    cout2 = p["conv2_w"].shape[0]                     # 64
    kfc = p["fc_w"].shape[1]                          # 5184
    side = int(round((kfc // cout2) ** 0.5))          # 9 (conv2 output spatial)
    oh, ow, c = jnp.meshgrid(jnp.arange(side), jnp.arange(side),
                             jnp.arange(cout2), indexing="ij")
    perm = (c * side * side + oh * side + ow).reshape(-1)   # NHWC pos -> NCHW col

    return {
        "conv1_w": conv_w(p["conv1_w"]),
        "conv1_b": p["conv1_b"].reshape(1, -1).astype(f32),
        "conv2_w": conv_w(p["conv2_w"]),
        "conv2_b": p["conv2_b"].reshape(1, -1).astype(f32),
        "fc_w":    p["fc_w"][:, perm].T.astype(bf16),        # (5184, 256)
        "fc_b":    p["fc_b"].reshape(1, -1).astype(f32),
        "gru_w_ih": p["gru_w_ih"].T.astype(f32),             # (256, 3H) [r|z|n]
        "gru_w_hh": p["gru_w_hh"].T.astype(f32),             # (H, 3H)   [r|z|n]
        "gru_b_ih": p["gru_b_ih"].reshape(1, -1).astype(f32),
        "gru_b_hh": p["gru_b_hh"].reshape(1, -1).astype(f32),
        "policy_w": p["policy_w"].T.astype(f32),             # (H, A)
        "policy_b": p["policy_b"].reshape(1, -1).astype(f32),
    }


# --------------------------------------------------------------------------
# CRNN forward (matches the PyTorch module semantics)
# --------------------------------------------------------------------------
def crnn_forward(prep, x, hidden):
    B = x.shape[0]
    # torch: x.view(batch_size, *x.shape[2:])  (drops the size-1 dim 1)
    x = x.reshape(B, *x.shape[2:])                                  # (B, C, 84, 84)
    x = jnp.transpose(x, (0, 2, 3, 1)).astype(jnp.bfloat16)         # NHWC, bf16

    # Conv2d(C, 32, k=8, s=4) + ReLU
    p1, oh1, ow1 = im2col_nhwc(x, 8, 4)                             # (B*20*20, 64C)
    y1 = conv_matmul_relu(p1, prep["conv1_w"], prep["conv1_b"])     # (B*400, 32) bf16
    y1 = y1.reshape(B, oh1, ow1, -1)                                # NHWC

    # Conv2d(32, 64, k=4, s=2) + ReLU
    p2, _, _ = im2col_nhwc(y1, 4, 2)                                # (B*9*9, 512)
    y2 = conv_matmul_relu(p2, prep["conv2_w"], prep["conv2_b"])     # (B*81, 64) bf16

    # Flatten (NHWC order; fc_w columns were pre-permuted to reproduce
    # PyTorch's NCHW nn.Flatten) + fused FC/ReLU + GRU step + policy head.
    flat = y2.reshape(B, -1)                                        # (B, 5184) bf16
    h0 = hidden[0].astype(jnp.float32)                              # (B, H)
    logits, h1 = fc_gru_policy(flat, h0, prep)
    return logits, h1[None]                                         # (B,A), (1,B,H)


# --------------------------------------------------------------------------
# Deterministic parameter init (PyTorch-like uniform(-1/sqrt(fan_in), +))
# --------------------------------------------------------------------------
def init_params(key, input_channels, gru_hidden_size, num_actions):
    def u(k, shape, fan_in):
        bound = 1.0 / jnp.sqrt(jnp.float32(fan_in))
        return jax.random.uniform(k, shape, jnp.float32, -bound, bound)

    ks = jax.random.split(key, 12)
    H = gru_hidden_size
    return {
        "conv1_w": u(ks[0], (32, input_channels, 8, 8), input_channels * 64),
        "conv1_b": u(ks[1], (32,), input_channels * 64),
        "conv2_w": u(ks[2], (64, 32, 4, 4), 32 * 16),
        "conv2_b": u(ks[3], (64,), 32 * 16),
        "fc_w":    u(ks[4], (256, 5184), 5184),
        "fc_b":    u(ks[5], (256,), 5184),
        "gru_w_ih": u(ks[6], (3 * H, 256), H),
        "gru_w_hh": u(ks[7], (3 * H, H), H),
        "gru_b_ih": u(ks[8], (3 * H,), H),
        "gru_b_hh": u(ks[9], (3 * H,), H),
        "policy_w": u(ks[10], (num_actions, H), H),
        "policy_b": u(ks[11], (num_actions,), H),
    }


if __name__ == "__main__":
    # Linear(5184, 256) forces an 84x84 input (classic Atari); other dims small.
    B, C = 2, 4
    GRU_H, N_ACT = 32, 6

    key = jax.random.PRNGKey(0)
    kx, kh, kp = jax.random.split(key, 3)
    x = jax.random.normal(kx, (B, 1, C, 84, 84), jnp.float32)   # (B, 1, C, H, W)
    hidden = jax.random.normal(kh, (1, B, GRU_H), jnp.float32)  # (num_layers=1, B, H)
    params = init_params(kp, C, GRU_H, N_ACT)
    prep = prepare_params(params)                               # one-time relayout

    fwd = jax.jit(crnn_forward)
    logits, new_hidden = fwd(prep, x, hidden)
    jax.block_until_ready((logits, new_hidden))

    assert logits.shape == (B, N_ACT), logits.shape
    assert new_hidden.shape == (1, B, GRU_H), new_hidden.shape
    assert bool(jnp.all(jnp.isfinite(logits))) and bool(jnp.all(jnp.isfinite(new_hidden)))
    print("KERNEL_OK")
</pallas_src>

<mosaic_0001>
module attributes {stable_mosaic.version = 11 : i64} {
  func.func @_conv_mm_kernel(%arg0: i32, %arg1: memref<400x256xbf16, #tpu.memory_space<vmem>>, %arg2: memref<256x32xbf16, #tpu.memory_space<vmem>>, %arg3: memref<1x32xf32, #tpu.memory_space<vmem>>, %arg4: memref<400x32xbf16, #tpu.memory_space<vmem>>) attributes {dimension_semantics = [#tpu.dimension_semantics<parallel>], iteration_bounds = array<i64: 2>, scalar_prefetch = 0 : i64, scratch_operands = 0 : i64, tpu.core_type = #tpu.core_type<tc>, window_params = [{transform_indices = @transform_0, window_bounds = array<i64: 400, 256>}, {pipeline_mode = #tpu.pipeline_mode<synchronous>, transform_indices = @transform_1, window_bounds = array<i64: 256, 32>}, {pipeline_mode = #tpu.pipeline_mode<synchronous>, transform_indices = @transform_2, window_bounds = array<i64: 1, 32>}, {transform_indices = @transform_3, window_bounds = array<i64: 400, 32>}]} {
    %c0 = arith.constant 0 : index
    %c0_0 = arith.constant 0 : index
    %0 = vector.load %arg1[%c0, %c0_0] : memref<400x256xbf16, #tpu.memory_space<vmem>>, vector<400x256xbf16>
    %c0_1 = arith.constant 0 : index
    %c0_2 = arith.constant 0 : index
    %1 = vector.load %arg2[%c0_1, %c0_2] : memref<256x32xbf16, #tpu.memory_space<vmem>>, vector<256x32xbf16>
    %cst = arith.constant dense<0.000000e+00> : vector<400x32xf32>
    %2 = tpu.matmul %0, %1, %cst {dimension_numbers = #tpu.dot_dimension_numbers<[1], [0], [0], [1], [0, 0, 1, 1], [], []>} : vector<400x256xbf16>, vector<256x32xbf16>, vector<400x32xf32> -> vector<400x32xf32>
    %c0_3 = arith.constant 0 : index
    %c0_4 = arith.constant 0 : index
    %3 = vector.load %arg3[%c0_3, %c0_4] : memref<1x32xf32, #tpu.memory_space<vmem>>, vector<1x32xf32>
    %4 = vector.broadcast %3 : vector<1x32xf32> to vector<400x32xf32>
    %5 = arith.addf %2, %4 : vector<400x32xf32>
    %cst_5 = arith.constant 0.000000e+00 : f32
    %6 = vector.broadcast %cst_5 : f32 to vector<400x32xf32>
    %7 = arith.maximumf %5, %6 : vector<400x32xf32>
    %8 = arith.truncf %7 : vector<400x32xf32> to vector<400x32xbf16>
    %c0_6 = arith.constant 0 : index
    %c0_7 = arith.constant 0 : index
    %9 = vector.load %arg4[%c0_6, %c0_7] : memref<400x32xbf16, #tpu.memory_space<vmem>>, vector<400x32xbf16>
    tpu.vector_store %arg4[%c0_6, %c0_7], %8 {strides = array<i32>} : memref<400x32xbf16, #tpu.memory_space<vmem>>, vector<400x32xbf16>,
    return
  }
  func.func @transform_0(%arg0: i32) -> (i32, i32) {
    %c0_i32 = arith.constant 0 : i32
    %c0_i32_0 = arith.constant 0 : i32
    return %arg0, %c0_i32 : i32, i32
  }
  func.func @transform_1(%arg0: i32) -> (i32, i32) {
    %c0_i32 = arith.constant 0 : i32
    %c0_i32_0 = arith.constant 0 : i32
    %c0_i32_1 = arith.constant 0 : i32
    return %c0_i32, %c0_i32_0 : i32, i32
  }
  func.func @transform_2(%arg0: i32) -> (i32, i32) {
    %c0_i32 = arith.constant 0 : i32
    %c0_i32_0 = arith.constant 0 : i32
    %c0_i32_1 = arith.constant 0 : i32
    return %c0_i32, %c0_i32_0 : i32, i32
  }
  func.func @transform_3(%arg0: i32) -> (i32, i32) {
    %c0_i32 = arith.constant 0 : i32
    %c0_i32_0 = arith.constant 0 : i32
    return %arg0, %c0_i32 : i32, i32
  }
}

module attributes {stable_mosaic.version = 11 : i64} {
  func.func @_conv_mm_kernel(%arg0: i32, %arg1: memref<162x512xbf16, #tpu.memory_space<vmem>>, %arg2: memref<512x64xbf16, #tpu.memory_space<vmem>>, %arg3: memref<1x64xf32, #tpu.memory_space<vmem>>, %arg4: memref<162x64xbf16, #tpu.memory_space<vmem>>) attributes {dimension_semantics = [#tpu.dimension_semantics<parallel>], iteration_bounds = array<i64: 1>, scalar_prefetch = 0 : i64, scratch_operands = 0 : i64, tpu.core_type = #tpu.core_type<tc>, window_params = [{transform_indices = @transform_0, window_bounds = array<i64: 162, 512>}, {pipeline_mode = #tpu.pipeline_mode<synchronous>, transform_indices = @transform_1, window_bounds = array<i64: 512, 64>}, {pipeline_mode = #tpu.pipeline_mode<synchronous>, transform_indices = @transform_2, window_bounds = array<i64: 1, 64>}, {transform_indices = @transform_3, window_bounds = array<i64: 162, 64>}]} {
    %c0 = arith.constant 0 : index
    %c0_0 = arith.constant 0 : index
    %0 = vector.load %arg1[%c0, %c0_0] : memref<162x512xbf16, #tpu.memory_space<vmem>>, vector<162x512xbf16>
    %c0_1 = arith.constant 0 : index
    %c0_2 = arith.constant 0 : index
    %1 = vector.load %arg2[%c0_1, %c0_2] : memref<512x64xbf16, #tpu.memory_space<vmem>>, vector<512x64xbf16>
    %cst = arith.constant dense<0.000000e+00> : vector<162x64xf32>
    %2 = tpu.matmul %0, %1, %cst {dimension_numbers = #tpu.dot_dimension_numbers<[1], [0], [0], [1], [0, 0, 1, 1], [], []>} : vector<162x512xbf16>, vector<512x64xbf16>, vector<162x64xf32> -> vector<162x64xf32>
    %c0_3 = arith.constant 0 : index
    %c0_4 = arith.constant 0 : index
    %3 = vector.load %arg3[%c0_3, %c0_4] : memref<1x64xf32, #tpu.memory_space<vmem>>, vector<1x64xf32>
    %4 = vector.broadcast %3 : vector<1x64xf32> to vector<162x64xf32>
    %5 = arith.addf %2, %4 : vector<162x64xf32>
    %cst_5 = arith.constant 0.000000e+00 : f32
    %6 = vector.broadcast %cst_5 : f32 to vector<162x64xf32>
    %7 = arith.maximumf %5, %6 : vector<162x64xf32>
    %8 = arith.truncf %7 : vector<162x64xf32> to vector<162x64xbf16>
    %c0_6 = arith.constant 0 : index
    %c0_7 = arith.constant 0 : index
    %9 = vector.load %arg4[%c0_6, %c0_7] : memref<162x64xbf16, #tpu.memory_space<vmem>>, vector<162x64xbf16>
    tpu.vector_store %arg4[%c0_6, %c0_7], %8 {strides = array<i32>} : memref<162x64xbf16, #tpu.memory_space<vmem>>, vector<162x64xbf16>,
    return
  }
  func.func @transform_0(%arg0: i32) -> (i32, i32) {
    %c0_i32 = arith.constant 0 : i32
    %c0_i32_0 = arith.constant 0 : i32
    return %arg0, %c0_i32 : i32, i32
  }
  func.func @transform_1(%arg0: i32) -> (i32, i32) {
    %c0_i32 = arith.constant 0 : i32
    %c0_i32_0 = arith.constant 0 : i32
    %c0_i32_1 = arith.constant 0 : i32
    return %c0_i32, %c0_i32_0 : i32, i32
  }
  func.func @transform_2(%arg0: i32) -> (i32, i32) {
    %c0_i32 = arith.constant 0 : i32
    %c0_i32_0 = arith.constant 0 : i32
    %c0_i32_1 = arith.constant 0 : i32
    return %c0_i32, %c0_i32_0 : i32, i32
  }
  func.func @transform_3(%arg0: i32) -> (i32, i32) {
    %c0_i32 = arith.constant 0 : i32
    %c0_i32_0 = arith.constant 0 : i32
    return %arg0, %c0_i32 : i32, i32
  }
}

module attributes {stable_mosaic.version = 11 : i64} {
  func.func @_tail_kernel(%arg0: memref<2x5184xbf16, #tpu.memory_space<vmem>>, %arg1: memref<5184x256xbf16, #tpu.memory_space<vmem>>, %arg2: memref<1x256xf32, #tpu.memory_space<vmem>>, %arg3: memref<2x32xf32, #tpu.memory_space<vmem>>, %arg4: memref<256x96xf32, #tpu.memory_space<vmem>>, %arg5: memref<32x96xf32, #tpu.memory_space<vmem>>, %arg6: memref<1x96xf32, #tpu.memory_space<vmem>>, %arg7: memref<1x96xf32, #tpu.memory_space<vmem>>, %arg8: memref<32x6xf32, #tpu.memory_space<vmem>>, %arg9: memref<1x6xf32, #tpu.memory_space<vmem>>, %arg10: memref<2x6xf32, #tpu.memory_space<vmem>>, %arg11: memref<2x32xf32, #tpu.memory_space<vmem>>) attributes {dimension_semantics = [], scalar_prefetch = 0 : i64, scratch_operands = 0 : i64, tpu.core_type = #tpu.core_type<tc>} {
    %c0 = arith.constant 0 : index
    %c0_0 = arith.constant 0 : index
    %0 = vector.load %arg0[%c0, %c0_0] : memref<2x5184xbf16, #tpu.memory_space<vmem>>, vector<2x5184xbf16>
    %c0_1 = arith.constant 0 : index
    %c0_2 = arith.constant 0 : index
    %1 = vector.load %arg1[%c0_1, %c0_2] : memref<5184x256xbf16, #tpu.memory_space<vmem>>, vector<5184x256xbf16>
    %cst = arith.constant dense<0.000000e+00> : vector<2x256xf32>
    %2 = tpu.matmul %0, %1, %cst {dimension_numbers = #tpu.dot_dimension_numbers<[1], [0], [0], [1], [0, 0, 1, 1], [], []>} : vector<2x5184xbf16>, vector<5184x256xbf16>, vector<2x256xf32> -> vector<2x256xf32>
    %c0_3 = arith.constant 0 : index
    %c0_4 = arith.constant 0 : index
    %3 = vector.load %arg2[%c0_3, %c0_4] : memref<1x256xf32, #tpu.memory_space<vmem>>, vector<1x256xf32>
    %4 = vector.broadcast %3 : vector<1x256xf32> to vector<2x256xf32>
    %5 = arith.addf %2, %4 : vector<2x256xf32>
    %cst_5 = arith.constant 0.000000e+00 : f32
    %6 = vector.broadcast %cst_5 : f32 to vector<2x256xf32>
    %7 = arith.maximumf %5, %6 : vector<2x256xf32>
    %c0_6 = arith.constant 0 : index
    %c0_7 = arith.constant 0 : index
    %8 = vector.load %arg3[%c0_6, %c0_7] : memref<2x32xf32, #tpu.memory_space<vmem>>, vector<2x32xf32>
    %c0_8 = arith.constant 0 : index
    %c0_9 = arith.constant 0 : index
    %9 = vector.load %arg4[%c0_8, %c0_9] : memref<256x96xf32, #tpu.memory_space<vmem>>, vector<256x96xf32>
    %cst_10 = arith.constant dense<0.000000e+00> : vector<2x96xf32>
    %10 = tpu.matmul %7, %9, %cst_10 {dimension_numbers = #tpu.dot_dimension_numbers<[1], [0], [0], [1], [0, 0, 1, 1], [], []>} : vector<2x256xf32>, vector<256x96xf32>, vector<2x96xf32> -> vector<2x96xf32>
    %c0_11 = arith.constant 0 : index
    %c0_12 = arith.constant 0 : index
    %11 = vector.load %arg6[%c0_11, %c0_12] : memref<1x96xf32, #tpu.memory_space<vmem>>, vector<1x96xf32>
    %12 = vector.broadcast %11 : vector<1x96xf32> to vector<2x96xf32>
    %13 = arith.addf %10, %12 : vector<2x96xf32>
    %c0_13 = arith.constant 0 : index
    %c0_14 = arith.constant 0 : index
    %14 = vector.load %arg5[%c0_13, %c0_14] : memref<32x96xf32, #tpu.memory_space<vmem>>, vector<32x96xf32>
    %cst_15 = arith.constant dense<0.000000e+00> : vector<2x96xf32>
    %15 = tpu.matmul %8, %14, %cst_15 {dimension_numbers = #tpu.dot_dimension_numbers<[1], [0], [0], [1], [0, 0, 1, 1], [], []>} : vector<2x32xf32>, vector<32x96xf32>, vector<2x96xf32> -> vector<2x96xf32>
    %c0_16 = arith.constant 0 : index
    %c0_17 = arith.constant 0 : index
    %16 = vector.load %arg7[%c0_16, %c0_17] : memref<1x96xf32, #tpu.memory_space<vmem>>, vector<1x96xf32>
    %17 = vector.broadcast %16 : vector<1x96xf32> to vector<2x96xf32>
    %18 = arith.addf %15, %17 : vector<2x96xf32>
    %19 = vector.extract_strided_slice %13 {offsets = [0, 0], sizes = [2, 32], strides = [1, 1]} : vector<2x96xf32> to vector<2x32xf32>
    %20 = vector.extract_strided_slice %18 {offsets = [0, 0], sizes = [2, 32], strides = [1, 1]} : vector<2x96xf32> to vector<2x32xf32>
    %21 = arith.addf %19, %20 : vector<2x32xf32>
    %22 = arith.negf %21 : vector<2x32xf32>
    %23 = math.exp %22 : vector<2x32xf32>
    %cst_18 = arith.constant 1.000000e+00 : f32
    %24 = vector.broadcast %cst_18 : f32 to vector<2x32xf32>
    %25 = arith.addf %24, %23 : vector<2x32xf32>
    %26 = arith.divf %24, %25 : vector<2x32xf32>
    %27 = vector.extract_strided_slice %13 {offsets = [0, 32], sizes = [2, 32], strides = [1, 1]} : vector<2x96xf32> to vector<2x32xf32>
    %28 = vector.extract_strided_slice %18 {offsets = [0, 32], sizes = [2, 32], strides = [1, 1]} : vector<2x96xf32> to vector<2x32xf32>
    %29 = arith.addf %27, %28 : vector<2x32xf32>
    %30 = arith.negf %29 : vector<2x32xf32>
    %31 = math.exp %30 : vector<2x32xf32>
    %cst_19 = arith.constant 1.000000e+00 : f32
    %32 = vector.broadcast %cst_19 : f32 to vector<2x32xf32>
    %33 = arith.addf %32, %31 : vector<2x32xf32>
    %34 = arith.divf %32, %33 : vector<2x32xf32>
    %35 = vector.extract_strided_slice %13 {offsets = [0, 64], sizes = [2, 32], strides = [1, 1]} : vector<2x96xf32> to vector<2x32xf32>
    %36 = vector.extract_strided_slice %18 {offsets = [0, 64], sizes = [2, 32], strides = [1, 1]} : vector<2x96xf32> to vector<2x32xf32>
    %37 = arith.mulf %26, %36 : vector<2x32xf32>
    %38 = arith.addf %35, %37 : vector<2x32xf32>
    %39 = math.tanh %38 : vector<2x32xf32>
    %cst_20 = arith.constant 1.000000e+00 : f32
    %40 = vector.broadcast %cst_20 : f32 to vector<2x32xf32>
    %41 = arith.subf %40, %34 : vector<2x32xf32>
    %42 = arith.mulf %41, %39 : vector<2x32xf32>
    %43 = arith.mulf %34, %8 : vector<2x32xf32>
    %44 = arith.addf %42, %43 : vector<2x32xf32>
    %c0_21 = arith.constant 0 : index
    %c0_22 = arith.constant 0 : index
    %45 = vector.load %arg8[%c0_21, %c0_22] : memref<32x6xf32, #tpu.memory_space<vmem>>, vector<32x6xf32>
    %cst_23 = arith.constant dense<0.000000e+00> : vector<2x6xf32>
    %46 = tpu.matmul %44, %45, %cst_23 {dimension_numbers = #tpu.dot_dimension_numbers<[1], [0], [0], [1], [0, 0, 1, 1], [], []>} : vector<2x32xf32>, vector<32x6xf32>, vector<2x6xf32> -> vector<2x6xf32>
    %c0_24 = arith.constant 0 : index
    %c0_25 = arith.constant 0 : index
    %47 = vector.load %arg9[%c0_24, %c0_25] : memref<1x6xf32, #tpu.memory_space<vmem>>, vector<1x6xf32>
    %48 = vector.broadcast %47 : vector<1x6xf32> to vector<2x6xf32>
    %49 = arith.addf %46, %48 : vector<2x6xf32>
    %c0_26 = arith.constant 0 : index
    %c0_27 = arith.constant 0 : index
    %50 = vector.load %arg11[%c0_26, %c0_27] : memref<2x32xf32, #tpu.memory_space<vmem>>, vector<2x32xf32>
    tpu.vector_store %arg11[%c0_26, %c0_27], %44 {strides = array<i32>} : memref<2x32xf32, #tpu.memory_space<vmem>>, vector<2x32xf32>,
    %c0_28 = arith.constant 0 : index
    %c0_29 = arith.constant 0 : index
    %51 = vector.load %arg10[%c0_28, %c0_29] : memref<2x6xf32, #tpu.memory_space<vmem>>, vector<2x6xf32>
    tpu.vector_store %arg10[%c0_28, %c0_29], %49 {strides = array<i32>} : memref<2x6xf32, #tpu.memory_space<vmem>>, vector<2x6xf32>,
    return
  }
}

</mosaic_0001>

<bundles_post_ra>
// kernel: crnn_forward.3
= control target key start
LH: loop header
LB: loop body
LE: loop exit
PB: predicated region body
PF: predicated region fallthrough
CT: control target
= control target key end

     0   :  { %s1542_s12 = smov 0   ;;  %s1852_s0 = inlined_call_operand.vmem [shape: bf16[800,256], index: 0, kind: input, shape index: {}]   ;;  %s1853_s1 = inlined_call_operand.vmem [shape: bf16[256,32], index: 1, kind: input, shape index: {}]   ;;  %s1854_s2 = inlined_call_operand.vmem [shape: f32[1,32], index: 2, kind: input, shape index: {}]   ;;  %s1855_s3 = inlined_call_operand.vmem [shape: bf16[800,32], index: 3, kind: output, shape index: {}]  }
   0x1 LB: > { %s1203_s13 = sadd.s32 4294967295, %s1519_s12   ;;  %p1207_p0 = scmp.ge.s32.totalorder %s1519_s12, 1  ;;  %s1519_s12 = sphi %s1542_s12, %s13_s12  }
   0x2   : > { %p139_p1 = scmp.lt.s32.totalorder %s1519_s12, 3 }
   0x4   : > { %p140_p2 = pnand %p1207_p0, %p139_p1 }
   0x5   : > { %s164_s16 = smul.u32 (!%p140_p2), 50, %s1203_s13 }
   0x6   : > { %143 = sbr.rel (%p140_p2) target bundleno = 376 (0x178), region = 32 }
   0x7   : > { %p165_p3 = scmp.lt.s32.totalorder (!%p140_p2), %s164_s16, 99 }
   0xb   : > { %v1422_v0 = vld [vmem:[%s1853_s1 + $0x38] sm:$0xff]   ;;  %v1521_v1 = vmov 0   ;;  %v1423_v2 = vld [vmem:[%s1853_s1 + $0x30] sm:$0xff]   ;;  %v1424_v3 = vld [vmem:[%s1853_s1 + $0x28] sm:$0xff]   ;;  %s1857_s16 = smov (!%p165_p3, %s164_s16), 99  ;;  %vm1096_vm0 = vcmask 257024  }
   0xc   : > { %613 = vmatprep.subr.bf16.mxu0 %v1521_v1  ;;  %1381 = vmatprep.subr.bf16.mxu1 %v1521_v1  ;;  %v1425_v4 = vld [vmem:[%s1853_s1 + $0x20] sm:$0xff]   ;;  %s1330_s23 = sshll.u32 %s1857_s16, 3  ;;  %v1426_v5 = vld [vmem:[%s1853_s1 + $0x18] sm:$0xff]   ;;  %v1427_v7 = vld [vmem:[%s1853_s1 + $0x10] sm:$0xff]   ;;  %s1210_s29 = sshll.u32 %s1857_s16, 2 }
   0xd   : > { %614 = vmatpush1.bf16.msra.mxu0 %v1422_v0  ;;  %1397 = vmatpush1.bf16.msra.mxu1 %v1422_v0  ;;  %s1579_s28 = scalar_lea.vmem %s1852_s0, %s1330_s23  ;;  %v1428_v9 = vld [vmem:[%s1853_s1 + $0x8] sm:$0xff]   ;;  %v1429_v10 = vld [vmem:[%s1853_s1] sm:$0xff]   ;;  %v1430_v11 = vld [vmem:[%s1853_s1 + $0x78] sm:$0xff]  }
   0xe   : > { %615 = vmatprep.subr.bf16.mxu0 %v1521_v1  ;;  %1382 = vmatprep.subr.bf16.mxu1 %v1521_v1  ;;  %v1440_v6 = vld [vmem:[%s1579_s28 + $0x4] ss:$8 sps:$4 sm:$0xff]   ;;  %v1443_v8 = vld [vmem:[%s1579_s28 + $0xd4] ss:$8 sps:$4 sm:$0xff]   ;;  %v1438_v19 = vld [vmem:[%s1579_s28] ss:$8 sps:$4 sm:$0xff]  }
   0xf   : > { %645 = vmatprep.mubr.bf16.mxu0 %v1440_v6  ;;  %749 = vmatprep.mubr.bf16.mxu1 %v1443_v8  ;;  %v1431_v12 = vld [vmem:[%s1853_s1 + $0x70] sm:$0xff]   ;;  %v1432_v13 = vld [vmem:[%s1853_s1 + $0x68] sm:$0xff]   ;;  %v1433_v14 = vld [vmem:[%s1853_s1 + $0x60] sm:$0xff]  }
  0x10   : > { %v1434_v15 = vld [vmem:[%s1853_s1 + $0x58] sm:$0xff]   ;;  %v1435_v16 = vld [vmem:[%s1853_s1 + $0x50] sm:$0xff]   ;;  %v1436_v17 = vld [vmem:[%s1853_s1 + $0x48] sm:$0xff]  }
  0x11   : > { %616 = vmatpush1.bf16.msra.mxu0 %v1423_v2  ;;  %1398 = vmatpush1.bf16.msra.mxu1 %v1423_v2  ;;  %v1437_v18 = vld [vmem:[%s1853_s1 + $0x40] sm:$0xff]   ;;  %v1441_v20 = vld [vmem:[%s1579_s28 + $0xd0] ss:$8 sps:$4 sm:$0xff]   ;;  %v1444_v21 = vld [vmem:[%s1579_s28 + $0x14] ss:$8 sps:$4 sm:$0xff]  }
  0x12   : > { %617 = vmatprep.subr.bf16.mxu0 %v1521_v1  ;;  %1383 = vmatprep.subr.bf16.mxu1 %v1521_v1  ;;  %v1447_v22 = vld [vmem:[%s1579_s28 + $0xe4] ss:$8 sps:$4 sm:$0xff]   ;;  %v1446_v23 = vld [vmem:[%s1579_s28 + $0x10] ss:$8 sps:$4 sm:$0xff]   ;;  %v1449_v24 = vld [vmem:[%s1579_s28 + $0xe0] ss:$8 sps:$4 sm:$0xff]  }
  0x13   : > { %v1450_v25 = vld [vmem:[%s1579_s28 + $0x24] ss:$8 sps:$4 sm:$0xff]   ;;  %v1453_v26 = vld [vmem:[%s1579_s28 + $0xf4] ss:$8 sps:$4 sm:$0xff]   ;;  %v1452_v27 = vld [vmem:[%s1579_s28 + $0x20] ss:$8 sps:$4 sm:$0xff]  }
  0x14   : > { %v1455_v28 = vld [vmem:[%s1579_s28 + $0xf0] ss:$8 sps:$4 sm:$0xff]   ;;  %v1456_v29 = vld [vmem:[%s1579_s28 + $0x34] ss:$8 sps:$4 sm:$0xff]   ;;  %v1459_v30 = vld [vmem:[%s1579_s28 + $0x104] ss:$8 sps:$4 sm:$0xff]  }
  0x15   : > { %618 = vmatpush1.bf16.msra.mxu0 %v1424_v3  ;;  %1399 = vmatpush1.bf16.msra.mxu1 %v1424_v3  ;;  %v1458_v31 = vld [vmem:[%s1579_s28 + $0x30] ss:$8 sps:$4 sm:$0xff]   ;;  %v1461_v32 = vld [vmem:[%s1579_s28 + $0x100] ss:$8 sps:$4 sm:$0xff]   ;;  %v1462_v33 = vld [vmem:[%s1579_s28 + $0x44] ss:$8 sps:$4 sm:$0xff]  }
  0x16   : > { %619 = vmatprep.subr.bf16.mxu0 %v1521_v1  ;;  %1384 = vmatprep.subr.bf16.mxu1 %v1521_v1  ;;  %v1465_v34 = vld [vmem:[%s1579_s28 + $0x114] ss:$8 sps:$4 sm:$0xff]   ;;  %v1464_v35 = vld [vmem:[%s1579_s28 + $0x40] ss:$8 sps:$4 sm:$0xff]   ;;  %v1467_v36 = vld [vmem:[%s1579_s28 + $0x110] ss:$8 sps:$4 sm:$0xff]  }
  0x17   : > { %v1468_v37 = vld [vmem:[%s1579_s28 + $0x54] ss:$8 sps:$4 sm:$0xff]   ;;  %v1471_v38 = vld [vmem:[%s1579_s28 + $0x124] ss:$8 sps:$4 sm:$0xff]   ;;  %v1470_v39 = vld [vmem:[%s1579_s28 + $0x50] ss:$8 sps:$4 sm:$0xff]  }
  0x18   : > { %v1473_v40 = vld [vmem:[%s1579_s28 + $0x120] ss:$8 sps:$4 sm:$0xff]   ;;  %v1474_v41 = vld [vmem:[%s1579_s28 + $0x64] ss:$8 sps:$4 sm:$0xff]   ;;  %v1477_v42 = vld [vmem:[%s1579_s28 + $0x134] ss:$8 sps:$4 sm:$0xff]  }
  0x19   : > { %620 = vmatpush1.bf16.msra.mxu0 %v1425_v4  ;;  %1400 = vmatpush1.bf16.msra.mxu1 %v1425_v4  ;;  %v1476_v43 = vld [vmem:[%s1579_s28 + $0x60] ss:$8 sps:$4 sm:$0xff]   ;;  %v1479_v44 = vld [vmem:[%s1579_s28 + $0x130] ss:$8 sps:$4 sm:$0xff]   ;;  %v1480_v45 = vld [vmem:[%s1579_s28 + $0x74] ss:$8 sps:$4 sm:$0xff]  }
  0x1a   : > { %621 = vmatprep.subr.bf16.mxu0 %v1521_v1  ;;  %1385 = vmatprep.subr.bf16.mxu1 %v1521_v1  ;;  %v1483_v46 = vld [vmem:[%s1579_s28 + $0x144] ss:$8 sps:$4 sm:$0xff]   ;;  %v1482_v47 = vld [vmem:[%s1579_s28 + $0x70] ss:$8 sps:$4 sm:$0xff]   ;;  %v1485_v48 = vld [vmem:[%s1579_s28 + $0x140] ss:$8 sps:$4 sm:$0xff]  }
  0x1b   : > { %v1486_v49 = vld [vmem:[%s1579_s28 + $0x84] ss:$8 sps:$4 sm:$0xff]   ;;  %v1489_v50 = vld [vmem:[%s1579_s28 + $0x154] ss:$8 sps:$4 sm:$0xff]   ;;  %v1488_v51 = vld [vmem:[%s1579_s28 + $0x80] ss:$8 sps:$4 sm:$0xff]  }
  0x1c   : > { %v1491_v52 = vld [vmem:[%s1579_s28 + $0x150] ss:$8 sps:$4 sm:$0xff]   ;;  %v1492_v53 = vld [vmem:[%s1579_s28 + $0x94] ss:$8 sps:$4 sm:$0xff]   ;;  %v1495_v54 = vld [vmem:[%s1579_s28 + $0x164] ss:$8 sps:$4 sm:$0xff]  }
  0x1d   : > { %622 = vmatpush1.bf16.msra.mxu0 %v1426_v5  ;;  %1401 = vmatpush1.bf16.msra.mxu1 %v1426_v5  ;;  %v1494_v55 = vld [vmem:[%s1579_s28 + $0x90] ss:$8 sps:$4 sm:$0xff]   ;;  %v1497_v56 = vld [vmem:[%s1579_s28 + $0x160] ss:$8 sps:$4 sm:$0xff]   ;;  %v1498_v57 = vld [vmem:[%s1579_s28 + $0xa4] ss:$8 sps:$4 sm:$0xff]  }
  0x1e   : > { %623 = vmatprep.subr.bf16.mxu0 %v1521_v1  ;;  %1386 = vmatprep.subr.bf16.mxu1 %v1521_v1  ;;  %v1501_v58 = vld [vmem:[%s1579_s28 + $0x174] ss:$8 sps:$4 sm:$0xff]   ;;  %v1500_v59 = vld [vmem:[%s1579_s28 + $0xa0] ss:$8 sps:$4 sm:$0xff]   ;;  %v1503_v60 = vld [vmem:[%s1579_s28 + $0x170] ss:$8 sps:$4 sm:$0xff]  }
  0x1f   : > { %v1504_v61 = vld [vmem:[%s1579_s28 + $0xb4] ss:$8 sps:$4 sm:$0xff]   ;;  %v1507_v62 = vld [vmem:[%s1579_s28 + $0x184] ss:$8 sps:$4 sm:$0xff]   ;;  %v1506_v63 = vld [vmem:[%s1579_s28 + $0xb0] ss:$8 sps:$4 sm:$0xff]  }
  0x20   : > { %v1509_v0 = vld [vmem:[%s1579_s28 + $0x180] ss:$8 sps:$4 sm:$0xff]  }
  0x21   : > { %624 = vmatpush1.bf16.msra.mxu0 %v1427_v7  ;;  %1402 = vmatpush1.bf16.msra.mxu1 %v1427_v7  ;;  %v1512_v2 = vld [vmem:[%s1579_s28 + $0xc0] ss:$8 sps:$4 sm:$0xff]  }
  0x22   : > { %625 = vmatprep.subr.bf16.mxu0 %v1521_v1  ;;  %1387 = vmatprep.subr.bf16.mxu1 %v1521_v1  ;;  %v1691_v3 = vld [vmem:[%s1854_s2] ss:$0 sm:$0xff] }
  0x25   : > { %626 = vmatpush1.bf16.msra.mxu0 %v1428_v9  ;;  %1403 = vmatpush1.bf16.msra.mxu1 %v1428_v9 }
  0x26   : > { %627 = vmatprep.subr.bf16.mxu0 %v1521_v1  ;;  %1388 = vmatprep.subr.bf16.mxu1 %v1521_v1 }
  0x29   : > { %628 = vmatpush1.bf16.msra.mxu0 %v1429_v10  ;;  %1404 = vmatpush1.bf16.msra.mxu1 %v1429_v10 }
  0x2a   : > { %629 = vmatprep.subr.bf16.mxu0 %v1521_v1  ;;  %1389 = vmatprep.subr.bf16.mxu1 %v1521_v1 }
  0x2d   : > { %630 = vmatpush2.bf16.msra.mxu0 %v1430_v11  ;;  %1405 = vmatpush2.bf16.msra.mxu1 %v1430_v11 }
  0x2e   : > { %631 = vmatprep.subr.bf16.mxu0 %v1521_v1  ;;  %1390 = vmatprep.subr.bf16.mxu1 %v1521_v1 }
  0x31   : > { %632 = vmatpush2.bf16.msra.mxu0 %v1431_v12  ;;  %1406 = vmatpush2.bf16.msra.mxu1 %v1431_v12 }
  0x32   : > { %633 = vmatprep.subr.bf16.mxu0 %v1521_v1  ;;  %1391 = vmatprep.subr.bf16.mxu1 %v1521_v1 }
  0x35   : > { %634 = vmatpush2.bf16.msra.mxu0 %v1432_v13  ;;  %1407 = vmatpush2.bf16.msra.mxu1 %v1432_v13 }
  0x36   : > { %635 = vmatprep.subr.bf16.mxu0 %v1521_v1  ;;  %1392 = vmatprep.subr.bf16.mxu1 %v1521_v1 }
  0x39   : > { %636 = vmatpush2.bf16.msra.mxu0 %v1433_v14  ;;  %1408 = vmatpush2.bf16.msra.mxu1 %v1433_v14 }
  0x3a   : > { %637 = vmatprep.subr.bf16.mxu0 %v1521_v1  ;;  %1393 = vmatprep.subr.bf16.mxu1 %v1521_v1 }
  0x3d   : > { %638 = vmatpush2.bf16.msra.mxu0 %v1434_v15  ;;  %1409 = vmatpush2.bf16.msra.mxu1 %v1434_v15 }
  0x3e   : > { %639 = vmatprep.subr.bf16.mxu0 %v1521_v1  ;;  %1394 = vmatprep.subr.bf16.mxu1 %v1521_v1 }
  0x41   : > { %640 = vmatpush2.bf16.msra.mxu0 %v1435_v16  ;;  %1410 = vmatpush2.bf16.msra.mxu1 %v1435_v16 }
  0x42   : > { %641 = vmatprep.subr.bf16.mxu0 %v1521_v1  ;;  %1395 = vmatprep.subr.bf16.mxu1 %v1521_v1 }
  0x45   : > { %642 = vmatpush2.bf16.msra.mxu0 %v1436_v17  ;;  %1411 = vmatpush2.bf16.msra.mxu1 %v1436_v17 }
  0x46   : > { %643 = vmatprep.subr.bf16.mxu0 %v1521_v1  ;;  %1396 = vmatprep.subr.bf16.mxu1 %v1521_v1  ;;  %v1510_v1 = vld [vmem:[%s1579_s28 + $0xc4] ss:$8 sps:$4 sm:$0xff]   ;;  %s1699_s28 = scalar_lea.vmem %s1855_s3, %s1210_s29 }
  0x49   : > { %644 = vmatpush2.bf16.msra.mxu0 %v1437_v18  ;;  %1412 = vmatpush2.bf16.msra.mxu1 %v1437_v18 }
  0x4c   : > { %646 = vmatmul.mubr.bf16.vlgmr.msra.gmra.mxu0 %v1438_v19  ;;  %750 = vmatmul.mubr.bf16.vlgmr.msra.gmra.mxu1 %v1441_v20 }
  0x4d   : > { %653 = vmatprep.mubr.bf16.mxu0 %v1444_v21  ;;  %757 = vmatprep.mubr.bf16.mxu1 %v1447_v22 }
  0x54   : > { %654 = vmatmul.mubr.bf16.gmra.mxu0 %v1446_v23  ;;  %758 = vmatmul.mubr.bf16.gmra.mxu1 %v1449_v24 }
  0x55   : > { %661 = vmatprep.mubr.bf16.mxu0 %v1450_v25  ;;  %765 = vmatprep.mubr.bf16.mxu1 %v1453_v26 }
  0x5c   : > { %662 = vmatmul.mubr.bf16.gmra.mxu0 %v1452_v27  ;;  %766 = vmatmul.mubr.bf16.gmra.mxu1 %v1455_v28 }
  0x5d   : > { %669 = vmatprep.mubr.bf16.mxu0 %v1456_v29  ;;  %773 = vmatprep.mubr.bf16.mxu1 %v1459_v30 }
  0x64   : > { %670 = vmatmul.mubr.bf16.gmra.mxu0 %v1458_v31  ;;  %774 = vmatmul.mubr.bf16.gmra.mxu1 %v1461_v32 }
  0x65   : > { %677 = vmatprep.mubr.bf16.mxu0 %v1462_v33  ;;  %781 = vmatprep.mubr.bf16.mxu1 %v1465_v34 }
  0x6c   : > { %678 = vmatmul.mubr.bf16.gmra.mxu0 %v1464_v35  ;;  %782 = vmatmul.mubr.bf16.gmra.mxu1 %v1467_v36 }
  0x6d   : > { %685 = vmatprep.mubr.bf16.mxu0 %v1468_v37  ;;  %789 = vmatprep.mubr.bf16.mxu1 %v1471_v38 }
  0x74   : > { %686 = vmatmul.mubr.bf16.gmra.mxu0 %v1470_v39  ;;  %790 = vmatmul.mubr.bf16.gmra.mxu1 %v1473_v40 }
  0x75   : > { %693 = vmatprep.mubr.bf16.mxu0 %v1474_v41  ;;  %797 = vmatprep.mubr.bf16.mxu1 %v1477_v42 }
  0x7c   : > { %694 = vmatmul.mubr.bf16.gmra.mxu0 %v1476_v43  ;;  %798 = vmatmul.mubr.bf16.gmra.mxu1 %v1479_v44 }
  0x7d   : > { %701 = vmatprep.mubr.bf16.mxu0 %v1480_v45  ;;  %805 = vmatprep.mubr.bf16.mxu1 %v1483_v46 }
  0x84   : > { %702 = vmatmul.mubr.bf16.gmra.mxu0 %v1482_v47  ;;  %806 = vmatmul.mubr.bf16.gmra.mxu1 %v1485_v48 }
  0x85   : > { %709 = vmatprep.mubr.bf16.mxu0 %v1486_v49  ;;  %813 = vmatprep.mubr.bf16.mxu1 %v1489_v50 }
  0x8c   : > { %710 = vmatmul.mubr.bf16.gmra.mxu0 %v1488_v51  ;;  %814 = vmatmul.mubr.bf16.gmra.mxu1 %v1491_v52 }
  0x8d   : > { %717 = vmatprep.mubr.bf16.mxu0 %v1492_v53  ;;  %821 = vmatprep.mubr.bf16.mxu1 %v1495_v54 }
  0x94   : > { %718 = vmatmul.mubr.bf16.gmra.mxu0 %v1494_v55  ;;  %822 = vmatmul.mubr.bf16.gmra.mxu1 %v1497_v56 }
  0x95   : > { %725 = vmatprep.mubr.bf16.mxu0 %v1498_v57  ;;  %829 = vmatprep.mubr.bf16.mxu1 %v1501_v58 }
  0x9c   : > { %726 = vmatmul.mubr.bf16.gmra.mxu0 %v1500_v59  ;;  %830 = vmatmul.mubr.bf16.gmra.mxu1 %v1503_v60 }
  0x9d   : > { %733 = vmatprep.mubr.bf16.mxu0 %v1504_v61  ;;  %837 = vmatprep.mubr.bf16.mxu1 %v1507_v62 }
  0xa4   : > { %734 = vmatmul.mubr.bf16.gmra.mxu0 %v1506_v63  ;;  %838 = vmatmul.mubr.bf16.gmra.mxu1 %v1509_v0 }
  0xa5   : > { %741 = vmatprep.mubr.bf16.mxu0 %v1510_v1 }
  0xac   : > { %742 = vmatmul.mubr.bf16.gmra.mxu0 %v1512_v2 }
 0x10c   : > { %v647_v4 = vpop.f32.mrf.mxu0  ;;  %v751_v5 = vpop.f32.mrf.mxu1 }
 0x10d   : > { %v648_v6 = vadd.f32 %v1691_v3, %v647_v4  ;;  %v752_v7 = vadd.f32 %v1691_v3, %v751_v5 }
 0x10e   : > { %v649_v8 = vpop.f32.mrf.mxu0  ;;  %v753_v9 = vpop.f32.mrf.mxu1 }
 0x10f   : > { %v846_v10 = vmax.f32 %v648_v6, 0.0  ;;  %v872_v11 = vmax.f32 %v752_v7, 0.0 }
 0x110   : > { %v650_v12 = vpop.f32.mrf.mxu0  ;;  %v754_v13 = vpop.f32.mrf.mxu1 }
 0x111   : > { %v1331_v14 = vpack.c.bf16 %v846_v10, %v846_v10  ;;  %v1357_v15 = vpack.c.bf16 %v872_v11, %v872_v11  ;;  %v651_v16 = vadd.f32 %v1691_v3, %v650_v12  ;;  %v755_v17 = vadd.f32 %v1691_v3, %v754_v13 }
 0x112   : > { %v652_v18 = vpop.f32.mrf.mxu0  ;;  %v756_v19 = vpop.f32.mrf.mxu1 }
 0x113   : > { %1097 = vst.msk [vmem:[%s1699_s28] sm:$0xf] %vm1096_vm0, %v1331_v14  ;;  %1123 = vst.msk [vmem:[%s1699_s28 + $0x68] sm:$0xf] %vm1096_vm0, %v1357_v15  ;;  %v847_v20 = vmax.f32 %v651_v16, 0.0  ;;  %v873_v21 = vmax.f32 %v755_v17, 0.0 }
 0x114   : > { %v655_v22 = vpop.f32.mrf.mxu0  ;;  %v759_v23 = vpop.f32.mrf.mxu1 }
 0x115   : > { %v1332_v24 = vpack.c.bf16 %v847_v20, %v847_v20  ;;  %v1358_v25 = vpack.c.bf16 %v873_v21, %v873_v21  ;;  %v656_v26 = vadd.f32 %v1691_v3, %v655_v22  ;;  %v760_v27 = vadd.f32 %v1691_v3, %v759_v23 }
 0x116   : > { %v657_v28 = vpop.f32.mrf.mxu0  ;;  %v761_v29 = vpop.f32.mrf.mxu1 }
 0x117   : > { %1098 = vst.msk [vmem:[%s1699_s28 + $0x4] sm:$0xf] %vm1096_vm0, %v1332_v24  ;;  %1124 = vst.msk [vmem:[%s1699_s28 + $0x6c] sm:$0xf] %vm1096_vm0, %v1358_v25  ;;  %v848_v30 = vmax.f32 %v656_v26, 0.0  ;;  %v874_v31 = vmax.f32 %v760_v27, 0.0 }
 0x118   : > { %v658_v32 = vpop.f32.mrf.mxu0  ;;  %v762_v33 = vpop.f32.mrf.mxu1 }
 0x119   : > { %v1333_v34 = vpack.c.bf16 %v848_v30, %v848_v30  ;;  %v1359_v35 = vpack.c.bf16 %v874_v31, %v874_v31  ;;  %v659_v36 = vadd.f32 %v1691_v3, %v658_v32  ;;  %v763_v37 = vadd.f32 %v1691_v3, %v762_v33 }
 0x11a   : > { %v660_v38 = vpop.f32.mrf.mxu0  ;;  %v764_v39 = vpop.f32.mrf.mxu1 }
 0x11b   : > { %1099 = vst.msk [vmem:[%s1699_s28 + $0x8] sm:$0xf] %vm1096_vm0, %v1333_v34  ;;  %1125 = vst.msk [vmem:[%s1699_s28 + $0x70] sm:$0xf] %vm1096_vm0, %v1359_v35  ;;  %v849_v40 = vmax.f32 %v659_v36, 0.0  ;;  %v875_v41 = vmax.f32 %v763_v37, 0.0 }
 0x11c   : > { %v663_v42 = vpop.f32.mrf.mxu0  ;;  %v767_v43 = vpop.f32.mrf.mxu1 }
 0x11d   : > { %v1334_v44 = vpack.c.bf16 %v849_v40, %v849_v40  ;;  %v1360_v45 = vpack.c.bf16 %v875_v41, %v875_v41  ;;  %v664_v46 = vadd.f32 %v1691_v3, %v663_v42  ;;  %v768_v47 = vadd.f32 %v1691_v3, %v767_v43 }
 0x11e   : > { %v665_v48 = vpop.f32.mrf.mxu0  ;;  %v769_v49 = vpop.f32.mrf.mxu1 }
 0x11f   : > { %1100 = vst.msk [vmem:[%s1699_s28 + $0xc] sm:$0xf] %vm1096_vm0, %v1334_v44  ;;  %1126 = vst.msk [vmem:[%s1699_s28 + $0x74] sm:$0xf] %vm1096_vm0, %v1360_v45  ;;  %v850_v50 = vmax.f32 %v664_v46, 0.0  ;;  %v876_v51 = vmax.f32 %v768_v47, 0.0 }
 0x120   : > { %v666_v52 = vpop.f32.mrf.mxu0  ;;  %v770_v53 = vpop.f32.mrf.mxu1 }
 0x121   : > { %v1335_v54 = vpack.c.bf16 %v850_v50, %v850_v50  ;;  %v1361_v55 = vpack.c.bf16 %v876_v51, %v876_v51  ;;  %v667_v56 = vadd.f32 %v1691_v3, %v666_v52  ;;  %v771_v57 = vadd.f32 %v1691_v3, %v770_v53 }
 0x122   : > { %v668_v58 = vpop.f32.mrf.mxu0  ;;  %v772_v59 = vpop.f32.mrf.mxu1 }
 0x123   : > { %1101 = vst.msk [vmem:[%s1699_s28 + $0x10] sm:$0xf] %vm1096_vm0, %v1335_v54  ;;  %1127 = vst.msk [vmem:[%s1699_s28 + $0x78] sm:$0xf] %vm1096_vm0, %v1361_v55  ;;  %v851_v60 = vmax.f32 %v667_v56, 0.0  ;;  %v877_v61 = vmax.f32 %v771_v57, 0.0 }
 0x124   : > { %v671_v62 = vpop.f32.mrf.mxu0  ;;  %v775_v63 = vpop.f32.mrf.mxu1 }
 0x125   : > { %v1336_v0 = vpack.c.bf16 %v851_v60, %v851_v60  ;;  %v1362_v1 = vpack.c.bf16 %v877_v61, %v877_v61  ;;  %v672_v2 = vadd.f32 %v1691_v3, %v671_v62  ;;  %v776_v4 = vadd.f32 %v1691_v3, %v775_v63 }
 0x126   : > { %v673_v5 = vpop.f32.mrf.mxu0  ;;  %v777_v6 = vpop.f32.mrf.mxu1 }
 0x127   : > { %1102 = vst.msk [vmem:[%s1699_s28 + $0x14] sm:$0xf] %vm1096_vm0, %v1336_v0  ;;  %1128 = vst.msk [vmem:[%s1699_s28 + $0x7c] sm:$0xf] %vm1096_vm0, %v1362_v1  ;;  %v852_v7 = vmax.f32 %v672_v2, 0.0  ;;  %v878_v8 = vmax.f32 %v776_v4, 0.0 }
 0x128   : > { %v674_v9 = vpop.f32.mrf.mxu0  ;;  %v778_v10 = vpop.f32.mrf.mxu1 }
 0x129   : > { %v1337_v11 = vpack.c.bf16 %v852_v7, %v852_v7  ;;  %v1363_v12 = vpack.c.bf16 %v878_v8, %v878_v8  ;;  %v675_v13 = vadd.f32 %v1691_v3, %v674_v9  ;;  %v779_v14 = vadd.f32 %v1691_v3, %v778_v10 }
 0x12a   : > { %v676_v15 = vpop.f32.mrf.mxu0  ;;  %v780_v16 = vpop.f32.mrf.mxu1 }
 0x12b   : > { %1103 = vst.msk [vmem:[%s1699_s28 + $0x18] sm:$0xf] %vm1096_vm0, %v1337_v11  ;;  %1129 = vst.msk [vmem:[%s1699_s28 + $0x80] sm:$0xf] %vm1096_vm0, %v1363_v12  ;;  %v853_v17 = vmax.f32 %v675_v13, 0.0  ;;  %v879_v18 = vmax.f32 %v779_v14, 0.0 }
 0x12c   : > { %v679_v19 = vpop.f32.mrf.mxu0  ;;  %v783_v20 = vpop.f32.mrf.mxu1 }
 0x12d   : > { %v1338_v21 = vpack.c.bf16 %v853_v17, %v853_v17  ;;  %v1364_v22 = vpack.c.bf16 %v879_v18, %v879_v18  ;;  %v680_v23 = vadd.f32 %v1691_v3, %v679_v19  ;;  %v784_v24 = vadd.f32 %v1691_v3, %v783_v20 }
 0x12e   : > { %v681_v25 = vpop.f32.mrf.mxu0  ;;  %v785_v26 = vpop.f32.mrf.mxu1 }
 0x12f   : > { %1104 = vst.msk [vmem:[%s1699_s28 + $0x1c] sm:$0xf] %vm1096_vm0, %v1338_v21  ;;  %1130 = vst.msk [vmem:[%s1699_s28 + $0x84] sm:$0xf] %vm1096_vm0, %v1364_v22  ;;  %v854_v27 = vmax.f32 %v680_v23, 0.0  ;;  %v880_v28 = vmax.f32 %v784_v24, 0.0 }
 0x130   : > { %v682_v29 = vpop.f32.mrf.mxu0  ;;  %v786_v30 = vpop.f32.mrf.mxu1 }
 0x131   : > { %v1339_v31 = vpack.c.bf16 %v854_v27, %v854_v27  ;;  %v1365_v32 = vpack.c.bf16 %v880_v28, %v880_v28  ;;  %v683_v33 = vadd.f32 %v1691_v3, %v682_v29  ;;  %v787_v34 = vadd.f32 %v1691_v3, %v786_v30 }
 0x132   : > { %v684_v35 = vpop.f32.mrf.mxu0  ;;  %v788_v36 = vpop.f32.mrf.mxu1 }
 0x133   : > { %1105 = vst.msk [vmem:[%s1699_s28 + $0x20] sm:$0xf] %vm1096_vm0, %v1339_v31  ;;  %1131 = vst.msk [vmem:[%s1699_s28 + $0x88] sm:$0xf] %vm1096_vm0, %v1365_v32  ;;  %v855_v37 = vmax.f32 %v683_v33, 0.0  ;;  %v881_v38 = vmax.f32 %v787_v34, 0.0 }
 0x134   : > { %v687_v39 = vpop.f32.mrf.mxu0  ;;  %v791_v40 = vpop.f32.mrf.mxu1 }
 0x135   : > { %v1340_v41 = vpack.c.bf16 %v855_v37, %v855_v37  ;;  %v1366_v42 = vpack.c.bf16 %v881_v38, %v881_v38  ;;  %v688_v43 = vadd.f32 %v1691_v3, %v687_v39  ;;  %v792_v44 = vadd.f32 %v1691_v3, %v791_v40 }
 0x136   : > { %v689_v45 = vpop.f32.mrf.mxu0  ;;  %v793_v46 = vpop.f32.mrf.mxu1 }
 0x137   : > { %1106 = vst.msk [vmem:[%s1699_s28 + $0x24] sm:$0xf] %vm1096_vm0, %v1340_v41  ;;  %1132 = vst.msk [vmem:[%s1699_s28 + $0x8c] sm:$0xf] %vm1096_vm0, %v1366_v42  ;;  %v856_v47 = vmax.f32 %v688_v43, 0.0  ;;  %v882_v48 = vmax.f32 %v792_v44, 0.0 }
 0x138   : > { %v690_v49 = vpop.f32.mrf.mxu0  ;;  %v794_v50 = vpop.f32.mrf.mxu1 }
 0x139   : > { %v1341_v51 = vpack.c.bf16 %v856_v47, %v856_v47  ;;  %v1367_v52 = vpack.c.bf16 %v882_v48, %v882_v48  ;;  %v691_v53 = vadd.f32 %v1691_v3, %v690_v49  ;;  %v795_v54 = vadd.f32 %v1691_v3, %v794_v50 }
 0x13a   : > { %v692_v55 = vpop.f32.mrf.mxu0  ;;  %v796_v56 = vpop.f32.mrf.mxu1 }
 0x13b   : > { %1107 = vst.msk [vmem:[%s1699_s28 + $0x28] sm:$0xf] %vm1096_vm0, %v1341_v51  ;;  %1133 = vst.msk [vmem:[%s1699_s28 + $0x90] sm:$0xf] %vm1096_vm0, %v1367_v52  ;;  %v857_v57 = vmax.f32 %v691_v53, 0.0  ;;  %v883_v58 = vmax.f32 %v795_v54, 0.0 }
 0x13c   : > { %v695_v59 = vpop.f32.mrf.mxu0  ;;  %v799_v60 = vpop.f32.mrf.mxu1 }
 0x13d   : > { %v1342_v61 = vpack.c.bf16 %v857_v57, %v857_v57  ;;  %v1368_v62 = vpack.c.bf16 %v883_v58, %v883_v58  ;;  %v696_v63 = vadd.f32 %v1691_v3, %v695_v59  ;;  %v800_v0 = vadd.f32 %v1691_v3, %v799_v60 }
 0x13e   : > { %v697_v1 = vpop.f32.mrf.mxu0  ;;  %v801_v2 = vpop.f32.mrf.mxu1 }
 0x13f   : > { %1108 = vst.msk [vmem:[%s1699_s28 + $0x2c] sm:$0xf] %vm1096_vm0, %v1342_v61  ;;  %1134 = vst.msk [vmem:[%s1699_s28 + $0x94] sm:$0xf] %vm1096_vm0, %v1368_v62  ;;  %v858_v4 = vmax.f32 %v696_v63, 0.0  ;;  %v884_v5 = vmax.f32 %v800_v0, 0.0 }
 0x140   : > { %v698_v6 = vpop.f32.mrf.mxu0  ;;  %v802_v7 = vpop.f32.mrf.mxu1 }
 0x141   : > { %v1343_v8 = vpack.c.bf16 %v858_v4, %v858_v4  ;;  %v1369_v9 = vpack.c.bf16 %v884_v5, %v884_v5  ;;  %v699_v10 = vadd.f32 %v1691_v3, %v698_v6  ;;  %v803_v11 = vadd.f32 %v1691_v3, %v802_v7 }
 0x142   : > { %v700_v12 = vpop.f32.mrf.mxu0  ;;  %v804_v13 = vpop.f32.mrf.mxu1 }
 0x143   : > { %1109 = vst.msk [vmem:[%s1699_s28 + $0x30] sm:$0xf] %vm1096_vm0, %v1343_v8  ;;  %1135 = vst.msk [vmem:[%s1699_s28 + $0x98] sm:$0xf] %vm1096_vm0, %v1369_v9  ;;  %v859_v14 = vmax.f32 %v699_v10, 0.0  ;;  %v885_v15 = vmax.f32 %v803_v11, 0.0 }
 0x144   : > { %v703_v16 = vpop.f32.mrf.mxu0  ;;  %v807_v17 = vpop.f32.mrf.mxu1 }
 0x145   : > { %v1344_v18 = vpack.c.bf16 %v859_v14, %v859_v14  ;;  %v1370_v19 = vpack.c.bf16 %v885_v15, %v885_v15  ;;  %v704_v20 = vadd.f32 %v1691_v3, %v703_v16  ;;  %v808_v21 = vadd.f32 %v1691_v3, %v807_v17 }
 0x146   : > { %v705_v22 = vpop.f32.mrf.mxu0  ;;  %v809_v23 = vpop.f32.mrf.mxu1 }
 0x147   : > { %1110 = vst.msk [vmem:[%s1699_s28 + $0x34] sm:$0xf] %vm1096_vm0, %v1344_v18  ;;  %1136 = vst.msk [vmem:[%s1699_s28 + $0x9c] sm:$0xf] %vm1096_vm0, %v1370_v19  ;;  %v860_v24 = vmax.f32 %v704_v20, 0.0  ;;  %v886_v25 = vmax.f32 %v808_v21, 0.0 }
 0x148   : > { %v706_v26 = vpop.f32.mrf.mxu0  ;;  %v810_v27 = vpop.f32.mrf.mxu1 }
 0x149   : > { %v1345_v28 = vpack.c.bf16 %v860_v24, %v860_v24  ;;  %v1371_v29 = vpack.c.bf16 %v886_v25, %v886_v25  ;;  %v707_v30 = vadd.f32 %v1691_v3, %v706_v26  ;;  %v811_v31 = vadd.f32 %v1691_v3, %v810_v27 }
 0x14a   : > { %v708_v32 = vpop.f32.mrf.mxu0  ;;  %v812_v33 = vpop.f32.mrf.mxu1 }
 0x14b   : > { %1111 = vst.msk [vmem:[%s1699_s28 + $0x38] sm:$0xf] %vm1096_vm0, %v1345_v28  ;;  %1137 = vst.msk [vmem:[%s1699_s28 + $0xa0] sm:$0xf] %vm1096_vm0, %v1371_v29  ;;  %v861_v34 = vmax.f32 %v707_v30, 0.0  ;;  %v887_v35 = vmax.f32 %v811_v31, 0.0 }
 0x14c   : > { %v711_v36 = vpop.f32.mrf.mxu0  ;;  %v815_v37 = vpop.f32.mrf.mxu1 }
 0x14d   : > { %v1346_v38 = vpack.c.bf16 %v861_v34, %v861_v34  ;;  %v1372_v39 = vpack.c.bf16 %v887_v35, %v887_v35  ;;  %v712_v40 = vadd.f32 %v1691_v3, %v711_v36  ;;  %v816_v41 = vadd.f32 %v1691_v3, %v815_v37 }
 0x14e   : > { %v713_v42 = vpop.f32.mrf.mxu0  ;;  %v817_v43 = vpop.f32.mrf.mxu1 }
 0x14f   : > { %1112 = vst.msk [vmem:[%s1699_s28 + $0x3c] sm:$0xf] %vm1096_vm0, %v1346_v38  ;;  %1138 = vst.msk [vmem:[%s1699_s28 + $0xa4] sm:$0xf] %vm1096_vm0, %v1372_v39  ;;  %v862_v44 = vmax.f32 %v712_v40, 0.0  ;;  %v888_v45 = vmax.f32 %v816_v41, 0.0 }
 0x150   : > { %v714_v46 = vpop.f32.mrf.mxu0  ;;  %v818_v47 = vpop.f32.mrf.mxu1 }
 0x151   : > { %v1347_v48 = vpack.c.bf16 %v862_v44, %v862_v44  ;;  %v1373_v49 = vpack.c.bf16 %v888_v45, %v888_v45  ;;  %v715_v50 = vadd.f32 %v1691_v3, %v714_v46  ;;  %v819_v51 = vadd.f32 %v1691_v3, %v818_v47 }
 0x152   : > { %v716_v52 = vpop.f32.mrf.mxu0  ;;  %v820_v53 = vpop.f32.mrf.mxu1 }
 0x153   : > { %1113 = vst.msk [vmem:[%s1699_s28 + $0x40] sm:$0xf] %vm1096_vm0, %v1347_v48  ;;  %1139 = vst.msk [vmem:[%s1699_s28 + $0xa8] sm:$0xf] %vm1096_vm0, %v1373_v49  ;;  %v863_v54 = vmax.f32 %v715_v50, 0.0  ;;  %v889_v55 = vmax.f32 %v819_v51, 0.0 }
 0x154   : > { %v719_v56 = vpop.f32.mrf.mxu0  ;;  %v823_v57 = vpop.f32.mrf.mxu1 }
 0x155   : > { %v1348_v58 = vpack.c.bf16 %v863_v54, %v863_v54  ;;  %v1374_v59 = vpack.c.bf16 %v889_v55, %v889_v55  ;;  %v720_v60 = vadd.f32 %v1691_v3, %v719_v56  ;;  %v824_v61 = vadd.f32 %v1691_v3, %v823_v57 }
 0x156   : > { %v721_v62 = vpop.f32.mrf.mxu0  ;;  %v825_v63 = vpop.f32.mrf.mxu1 }
 0x157   : > { %1114 = vst.msk [vmem:[%s1699_s28 + $0x44] sm:$0xf] %vm1096_vm0, %v1348_v58  ;;  %1140 = vst.msk [vmem:[%s1699_s28 + $0xac] sm:$0xf] %vm1096_vm0, %v1374_v59  ;;  %v864_v0 = vmax.f32 %v720_v60, 0.0  ;;  %v890_v1 = vmax.f32 %v824_v61, 0.0 }
 0x158   : > { %v722_v2 = vpop.f32.mrf.mxu0  ;;  %v826_v4 = vpop.f32.mrf.mxu1 }
 0x159   : > { %v1349_v5 = vpack.c.bf16 %v864_v0, %v864_v0  ;;  %v1375_v6 = vpack.c.bf16 %v890_v1, %v890_v1  ;;  %v723_v7 = vadd.f32 %v1691_v3, %v722_v2  ;;  %v827_v8 = vadd.f32 %v1691_v3, %v826_v4 }
 0x15a   : > { %v724_v9 = vpop.f32.mrf.mxu0  ;;  %v828_v10 = vpop.f32.mrf.mxu1 }
 0x15b   : > { %1115 = vst.msk [vmem:[%s1699_s28 + $0x48] sm:$0xf] %vm1096_vm0, %v1349_v5  ;;  %1141 = vst.msk [vmem:[%s1699_s28 + $0xb0] sm:$0xf] %vm1096_vm0, %v1375_v6  ;;  %v865_v11 = vmax.f32 %v723_v7, 0.0  ;;  %v891_v12 = vmax.f32 %v827_v8, 0.0 }
 0x15c   : > { %v727_v13 = vpop.f32.mrf.mxu0  ;;  %v831_v14 = vpop.f32.mrf.mxu1 }
 0x15d   : > { %v1350_v15 = vpack.c.bf16 %v865_v11, %v865_v11  ;;  %v1376_v16 = vpack.c.bf16 %v891_v12, %v891_v12  ;;  %v728_v17 = vadd.f32 %v1691_v3, %v727_v13  ;;  %v832_v18 = vadd.f32 %v1691_v3, %v831_v14 }
 0x15e   : > { %v729_v19 = vpop.f32.mrf.mxu0  ;;  %v833_v20 = vpop.f32.mrf.mxu1 }
 0x15f   : > { %1116 = vst.msk [vmem:[%s1699_s28 + $0x4c] sm:$0xf] %vm1096_vm0, %v1350_v15  ;;  %1142 = vst.msk [vmem:[%s1699_s28 + $0xb4] sm:$0xf] %vm1096_vm0, %v1376_v16  ;;  %v866_v21 = vmax.f32 %v728_v17, 0.0  ;;  %v892_v22 = vmax.f32 %v832_v18, 0.0 }
 0x160   : > { %v730_v23 = vpop.f32.mrf.mxu0  ;;  %v834_v24 = vpop.f32.mrf.mxu1 }
 0x161   : > { %v1351_v25 = vpack.c.bf16 %v866_v21, %v866_v21  ;;  %v1377_v26 = vpack.c.bf16 %v892_v22, %v892_v22  ;;  %v731_v27 = vadd.f32 %v1691_v3, %v730_v23  ;;  %v835_v28 = vadd.f32 %v1691_v3, %v834_v24 }
 0x162   : > { %v732_v29 = vpop.f32.mrf.mxu0  ;;  %v836_v30 = vpop.f32.mrf.mxu1 }
 0x163   : > { %1117 = vst.msk [vmem:[%s1699_s28 + $0x50] sm:$0xf] %vm1096_vm0, %v1351_v25  ;;  %1143 = vst.msk [vmem:[%s1699_s28 + $0xb8] sm:$0xf] %vm1096_vm0, %v1377_v26  ;;  %v867_v31 = vmax.f32 %v731_v27, 0.0  ;;  %v893_v32 = vmax.f32 %v835_v28, 0.0 }
 0x164   : > { %v735_v33 = vpop.f32.mrf.mxu0  ;;  %v839_v34 = vpop.f32.mrf.mxu1 }
 0x165   : > { %v1352_v35 = vpack.c.bf16 %v867_v31, %v867_v31  ;;  %v1378_v36 = vpack.c.bf16 %v893_v32, %v893_v32  ;;  %v736_v37 = vadd.f32 %v1691_v3, %v735_v33  ;;  %v840_v38 = vadd.f32 %v1691_v3, %v839_v34 }
 0x166   : > { %v737_v39 = vpop.f32.mrf.mxu0  ;;  %v841_v40 = vpop.f32.mrf.mxu1 }
 0x167   : > { %1118 = vst.msk [vmem:[%s1699_s28 + $0x54] sm:$0xf] %vm1096_vm0, %v1352_v35  ;;  %1144 = vst.msk [vmem:[%s1699_s28 + $0xbc] sm:$0xf] %vm1096_vm0, %v1378_v36  ;;  %v868_v41 = vmax.f32 %v736_v37, 0.0  ;;  %v894_v42 = vmax.f32 %v840_v38, 0.0 }
 0x168   : > { %v738_v43 = vpop.f32.mrf.mxu0  ;;  %v842_v44 = vpop.f32.mrf.mxu1 }
 0x169   : > { %v1353_v45 = vpack.c.bf16 %v868_v41, %v868_v41  ;;  %v1379_v46 = vpack.c.bf16 %v894_v42, %v894_v42  ;;  %v739_v47 = vadd.f32 %v1691_v3, %v738_v43  ;;  %v843_v48 = vadd.f32 %v1691_v3, %v842_v44 }
 0x16a   : > { %v740_v49 = vpop.f32.mrf.mxu0  ;;  %v844_v50 = vpop.f32.mrf.mxu1 }
 0x16b   : > { %1119 = vst.msk [vmem:[%s1699_s28 + $0x58] sm:$0xf] %vm1096_vm0, %v1353_v45  ;;  %1145 = vst.msk [vmem:[%s1699_s28 + $0xc0] sm:$0xf] %vm1096_vm0, %v1379_v46  ;;  %v869_v51 = vmax.f32 %v739_v47, 0.0  ;;  %v895_v52 = vmax.f32 %v843_v48, 0.0 }
 0x16c   : > { %v743_v53 = vpop.f32.mrf.mxu0 }
 0x16d   : > { %v1354_v54 = vpack.c.bf16 %v869_v51, %v869_v51  ;;  %v1380_v55 = vpack.c.bf16 %v895_v52, %v895_v52  ;;  %v744_v56 = vadd.f32 %v1691_v3, %v743_v53 }
 0x16e   : > { %v745_v57 = vpop.f32.mrf.mxu0 }
 0x16f   : > { %1120 = vst.msk [vmem:[%s1699_s28 + $0x5c] sm:$0xf] %vm1096_vm0, %v1354_v54  ;;  %1146 = vst.msk [vmem:[%s1699_s28 + $0xc4] sm:$0xf] %vm1096_vm0, %v1380_v55  ;;  %v870_v58 = vmax.f32 %v744_v56, 0.0 }
 0x170   : > { %v746_v59 = vpop.f32.mrf.mxu0 }
 0x171   : > { %v1355_v60 = vpack.c.bf16 %v870_v58, %v870_v58  ;;  %v747_v61 = vadd.f32 %v1691_v3, %v746_v59 }
 0x172   : > { %v748_v62 = vpop.f32.mrf.mxu0 }
 0x173   : > { %1121 = vst.msk [vmem:[%s1699_s28 + $0x60] sm:$0xf] %vm1096_vm0, %v1355_v60  ;;  %v871_v63 = vmax.f32 %v747_v61, 0.0 }
 0x175   : > { %v1356_v0 = vpack.c.bf16 %v871_v63, %v871_v63 }
 0x177   : > { %1122 = vst.msk [vmem:[%s1699_s28 + $0x64] sm:$0xf] %vm1096_vm0, %v1356_v0 }
 0x178 PF: > { %s13_s12 = sadd.s32 1, %s1519_s12  }
 0x179   : > { %p10_p4 = scmp.ge.s32.totalorder %s13_s12, 4  }
 0x17b   :  { %12 = sbr.rel (!%p10_p4) target bundleno = 1 (0x1), region = 62 }

// kernel: crnn_forward.4
= control target key start
LH: loop header
LB: loop body
LE: loop exit
PB: predicated region body
PF: predicated region fallthrough
CT: control target
= control target key end

     0   :  { %vm880_vm0 = vcmask 519168   ;;  %vm901_vm1 = vcmask 516096   ;;  %s1637_s1 = inlined_call_operand.vmem [shape: bf16[512,64], index: 1, kind: input, shape index: {}]   ;;  %s1638_s0 = inlined_call_operand.vmem [shape: bf16[162,512], index: 0, kind: input, shape index: {}]   ;;  %s1639_s2 = inlined_call_operand.vmem [shape: f32[1,64], index: 2, kind: input, shape index: {}]   ;;  %s1640_s3 = inlined_call_operand.vmem [shape: bf16[162,64], index: 3, kind: output, shape index: {}]  }
   0x1   :  { %v1190_v0 = vld [vmem:[%s1637_s1 + $0x78] sm:$0xff]   ;;  %v1194_v4 = vld [vmem:[%s1637_s1 + $0x70] sm:$0xff]   ;;  %v1198_v8 = vld [vmem:[%s1637_s1 + $0x68] sm:$0xff]  }
   0x2   :  { %v1191_v1 = vld [vmem:[%s1637_s1 + $0xf8] sm:$0xff]   ;;  %1026 = vmatprep.subr.bf16.mxu0 %v1190_v0  ;;  %v1195_v5 = vld [vmem:[%s1637_s1 + $0xf0] sm:$0xff]   ;;  %v1199_v9 = vld [vmem:[%s1637_s1 + $0xe8] sm:$0xff]  }
   0x3   :  { %v1192_v2 = vld [vmem:[%s1637_s1 + $0x38] sm:$0xff]   ;;  %1108 = vmatprep.subr.bf16.mxu1 %v1191_v1  ;;  %v1196_v6 = vld [vmem:[%s1637_s1 + $0x30] sm:$0xff]   ;;  %v1200_v10 = vld [vmem:[%s1637_s1 + $0x28] sm:$0xff]  }
   0x4   :  { %v1193_v3 = vld [vmem:[%s1637_s1 + $0xb8] sm:$0xff]   ;;  %1027 = vmatpush3.bf16.msra.mxu0 %v1192_v2  ;;  %v1197_v7 = vld [vmem:[%s1637_s1 + $0xb0] sm:$0xff]   ;;  %v1201_v11 = vld [vmem:[%s1637_s1 + $0xa8] sm:$0xff]  }
   0x5   :  { %1109 = vmatpush3.bf16.msra.mxu1 %v1193_v3  ;;  %1028 = vmatprep.subr.bf16.mxu0 %v1194_v4  ;;  %v1202_v12 = vld [vmem:[%s1637_s1 + $0x60] sm:$0xff]   ;;  %v1206_v16 = vld [vmem:[%s1637_s1 + $0x58] sm:$0xff]   ;;  %v1210_v20 = vld [vmem:[%s1637_s1 + $0x50] sm:$0xff]  }
   0x6   :  { %1110 = vmatprep.subr.bf16.mxu1 %v1195_v5  ;;  %v1203_v13 = vld [vmem:[%s1637_s1 + $0xe0] sm:$0xff]   ;;  %v1207_v17 = vld [vmem:[%s1637_s1 + $0xd8] sm:$0xff]   ;;  %v1211_v21 = vld [vmem:[%s1637_s1 + $0xd0] sm:$0xff]  }
   0x7   :  { %v1204_v14 = vld [vmem:[%s1637_s1 + $0x20] sm:$0xff]   ;;  %v1208_v18 = vld [vmem:[%s1637_s1 + $0x18] sm:$0xff]   ;;  %v1212_v22 = vld [vmem:[%s1637_s1 + $0x10] sm:$0xff]  }
   0x8   :  { %1029 = vmatpush3.bf16.msra.mxu0 %v1196_v6  ;;  %v1205_v15 = vld [vmem:[%s1637_s1 + $0xa0] sm:$0xff]   ;;  %v1209_v19 = vld [vmem:[%s1637_s1 + $0x98] sm:$0xff]   ;;  %v1213_v23 = vld [vmem:[%s1637_s1 + $0x90] sm:$0xff]  }
   0x9   :  { %1111 = vmatpush3.bf16.msra.mxu1 %v1197_v7  ;;  %1030 = vmatprep.subr.bf16.mxu0 %v1198_v8  ;;  %v1214_v24 = vld [vmem:[%s1637_s1 + $0x48] sm:$0xff]   ;;  %v1218_v28 = vld [vmem:[%s1637_s1 + $0x40] sm:$0xff]  }
   0xa   :  { %1112 = vmatprep.subr.bf16.mxu1 %v1199_v9  ;;  %v1215_v25 = vld [vmem:[%s1637_s1 + $0xc8] sm:$0xff]   ;;  %v1219_v29 = vld [vmem:[%s1637_s1 + $0xc0] sm:$0xff]  }
   0xb   :  { %v1216_v26 = vld [vmem:[%s1637_s1 + $0x8] sm:$0xff]   ;;  %v1220_v30 = vld [vmem:[%s1637_s1] sm:$0xff]  }
   0xc   :  { %1031 = vmatpush3.bf16.msra.mxu0 %v1200_v10  ;;  %v1217_v27 = vld [vmem:[%s1637_s1 + $0x88] sm:$0xff]   ;;  %v1221_v31 = vld [vmem:[%s1637_s1 + $0x80] sm:$0xff]  }
   0xd   :  { %1113 = vmatpush3.bf16.msra.mxu1 %v1201_v11  ;;  %1032 = vmatprep.subr.bf16.mxu0 %v1202_v12  ;;  %v1222_v32 = vld [vmem:[%s1638_s0] ss:$16 sps:$4 sm:$0xff]   ;;  %v1224_v33 = vld [vmem:[%s1638_s0 + $0x4] ss:$16 sps:$4 sm:$0xff]   ;;  %v1225_v34 = vld [vmem:[%s1638_s0 + $0x8] ss:$16 sps:$4 sm:$0xff]  }
   0xe   :  { %1114 = vmatprep.subr.bf16.mxu1 %v1203_v13  ;;  %v1227_v35 = vld [vmem:[%s1638_s0 + $0xc] ss:$16 sps:$4 sm:$0xff]   ;;  %566 = vmatprep.mubr.bf16.mxu0 %v1224_v33  ;;  %v1228_v36 = vld [vmem:[%s1638_s0 + $0x24] ss:$16 sps:$4 sm:$0xff]   ;;  %v1232_v38 = vld [vmem:[%s1638_s0 + $0x20] ss:$16 sps:$4 sm:$0xff]  }
   0xf   :  { %686 = vmatprep.mubr.bf16.mxu1 %v1227_v35  ;;  %v1230_v37 = vld [vmem:[%s1638_s0 + $0x2c] ss:$16 sps:$4 sm:$0xff]   ;;  %v1233_v39 = vld [vmem:[%s1638_s0 + $0x28] ss:$16 sps:$4 sm:$0xff]   ;;  %v1234_v40 = vld [vmem:[%s1638_s0 + $0x44] ss:$16 sps:$4 sm:$0xff]  }
  0x10   :  { %1033 = vmatpush3.bf16.msra.mxu0 %v1204_v14  ;;  %v1236_v41 = vld [vmem:[%s1638_s0 + $0x4c] ss:$16 sps:$4 sm:$0xff]   ;;  %v1238_v42 = vld [vmem:[%s1638_s0 + $0x40] ss:$16 sps:$4 sm:$0xff]   ;;  %v1239_v43 = vld [vmem:[%s1638_s0 + $0x48] ss:$16 sps:$4 sm:$0xff]  }
  0x11   :  { %1115 = vmatpush3.bf16.msra.mxu1 %v1205_v15  ;;  %1034 = vmatprep.subr.bf16.mxu0 %v1206_v16  ;;  %v1240_v44 = vld [vmem:[%s1638_s0 + $0x64] ss:$16 sps:$4 sm:$0xff]   ;;  %v1242_v45 = vld [vmem:[%s1638_s0 + $0x6c] ss:$16 sps:$4 sm:$0xff]   ;;  %v1244_v46 = vld [vmem:[%s1638_s0 + $0x60] ss:$16 sps:$4 sm:$0xff]  }
  0x12   :  { %1116 = vmatprep.subr.bf16.mxu1 %v1207_v17  ;;  %v1245_v47 = vld [vmem:[%s1638_s0 + $0x68] ss:$16 sps:$4 sm:$0xff]   ;;  %v1246_v48 = vld [vmem:[%s1638_s0 + $0x84] ss:$16 sps:$4 sm:$0xff]   ;;  %v1248_v49 = vld [vmem:[%s1638_s0 + $0x8c] ss:$16 sps:$4 sm:$0xff]  }
  0x13   :  { %v1250_v50 = vld [vmem:[%s1638_s0 + $0x80] ss:$16 sps:$4 sm:$0xff]   ;;  %v1251_v51 = vld [vmem:[%s1638_s0 + $0x88] ss:$16 sps:$4 sm:$0xff]   ;;  %v1252_v52 = vld [vmem:[%s1638_s0 + $0xa4] ss:$16 sps:$4 sm:$0xff]  }
  0x14   :  { %1035 = vmatpush3.bf16.msra.mxu0 %v1208_v18  ;;  %v1254_v53 = vld [vmem:[%s1638_s0 + $0xac] ss:$16 sps:$4 sm:$0xff]   ;;  %v1256_v54 = vld [vmem:[%s1638_s0 + $0xa0] ss:$16 sps:$4 sm:$0xff]   ;;  %v1257_v55 = vld [vmem:[%s1638_s0 + $0xa8] ss:$16 sps:$4 sm:$0xff]  }
  0x15   :  { %1117 = vmatpush3.bf16.msra.mxu1 %v1209_v19  ;;  %1036 = vmatprep.subr.bf16.mxu0 %v1210_v20  ;;  %v1258_v56 = vld [vmem:[%s1638_s0 + $0xc4] ss:$16 sps:$4 sm:$0xff]   ;;  %v1260_v57 = vld [vmem:[%s1638_s0 + $0xcc] ss:$16 sps:$4 sm:$0xff]   ;;  %v1262_v58 = vld [vmem:[%s1638_s0 + $0xc0] ss:$16 sps:$4 sm:$0xff]  }
  0x16   :  { %1118 = vmatprep.subr.bf16.mxu1 %v1211_v21  ;;  %v1263_v59 = vld [vmem:[%s1638_s0 + $0xc8] ss:$16 sps:$4 sm:$0xff]   ;;  %v1264_v60 = vld [vmem:[%s1638_s0 + $0xe4] ss:$16 sps:$4 sm:$0xff]   ;;  %v1266_v61 = vld [vmem:[%s1638_s0 + $0xec] ss:$16 sps:$4 sm:$0xff]  }
  0x17   :  { %v1268_v62 = vld [vmem:[%s1638_s0 + $0xe0] ss:$16 sps:$4 sm:$0xff]   ;;  %v1269_v63 = vld [vmem:[%s1638_s0 + $0xe8] ss:$16 sps:$4 sm:$0xff]   ;;  %v1270_v0 = vld [vmem:[%s1638_s0 + $0x104] ss:$16 sps:$4 sm:$0xff]  }
  0x18   :  { %1037 = vmatpush3.bf16.msra.mxu0 %v1212_v22  ;;  %v1272_v1 = vld [vmem:[%s1638_s0 + $0x10c] ss:$16 sps:$4 sm:$0xff]   ;;  %v1274_v2 = vld [vmem:[%s1638_s0 + $0x100] ss:$16 sps:$4 sm:$0xff]   ;;  %v1275_v3 = vld [vmem:[%s1638_s0 + $0x108] ss:$16 sps:$4 sm:$0xff]  }
  0x19   :  { %1119 = vmatpush3.bf16.msra.mxu1 %v1213_v23  ;;  %1038 = vmatprep.subr.bf16.mxu0 %v1214_v24  ;;  %v1276_v4 = vld [vmem:[%s1638_s0 + $0x124] ss:$16 sps:$4 sm:$0xff]   ;;  %v1278_v5 = vld [vmem:[%s1638_s0 + $0x12c] ss:$16 sps:$4 sm:$0xff]   ;;  %v1280_v8 = vld [vmem:[%s1638_s0 + $0x120] ss:$16 sps:$4 sm:$0xff]  }
  0x1a   :  { %1120 = vmatprep.subr.bf16.mxu1 %v1215_v25  ;;  %v55_v6 = vld [vmem:[%s1638_s0 + $0x140] sm:$0x11]  ;;  %v56_v7 = vld [vmem:[%s1638_s0 + $0x148] sm:$0x11] }
  0x1b   :  { %v1281_v9 = vld [vmem:[%s1638_s0 + $0x128] ss:$16 sps:$4 sm:$0xff]   ;;  %v949_v10 = vcombine.high %v55_v6, %v55_v6  ;;  %v951_v11 = vcombine.high %v56_v7, %v56_v7  ;;  %v948_v12 = vcombine.low %v55_v6, %v55_v6  ;;  %v950_v13 = vcombine.low %v56_v7, %v56_v7  ;;  %v1531_v16 = vld [vmem:[%s1639_s2] ss:$0 sm:$0xff] }
  0x1c   :  { %1039 = vmatpush3.bf16.msra.mxu0 %v1216_v26 }
  0x1d   :  { %1121 = vmatpush3.bf16.msra.mxu1 %v1217_v27  ;;  %1040 = vmatprep.subr.bf16.mxu0 %v1218_v28 }
  0x1e   :  { %1122 = vmatprep.subr.bf16.mxu1 %v1219_v29 }
  0x20   :  { %1041 = vmatpush3.bf16.msra.mxu0 %v1220_v30 }
  0x21   :  { %1123 = vmatpush3.bf16.msra.mxu1 %v1221_v31 }
  0x23   :  { %567 = vmatmul.mubr.bf16.vlgmr.msra.gmra.mxu0 %v1222_v32 }
  0x24   :  { %687 = vmatmul.mubr.bf16.vlgmr.msra.gmra.mxu1 %v1225_v34  ;;  %574 = vmatprep.mubr.bf16.mxu0 %v1228_v36 }
  0x25   :  { %694 = vmatprep.mubr.bf16.mxu1 %v1230_v37 }
  0x2b   :  { %575 = vmatmul.mubr.bf16.gmra.mxu0 %v1232_v38 }
  0x2c   :  { %695 = vmatmul.mubr.bf16.gmra.mxu1 %v1233_v39  ;;  %582 = vmatprep.mubr.bf16.mxu0 %v1234_v40 }
  0x2d   :  { %702 = vmatprep.mubr.bf16.mxu1 %v1236_v41 }
  0x33   :  { %583 = vmatmul.mubr.bf16.gmra.mxu0 %v1238_v42 }
  0x34   :  { %703 = vmatmul.mubr.bf16.gmra.mxu1 %v1239_v43  ;;  %590 = vmatprep.mubr.bf16.mxu0 %v1240_v44 }
  0x35   :  { %710 = vmatprep.mubr.bf16.mxu1 %v1242_v45 }
  0x3b   :  { %591 = vmatmul.mubr.bf16.gmra.mxu0 %v1244_v46 }
  0x3c   :  { %711 = vmatmul.mubr.bf16.gmra.mxu1 %v1245_v47  ;;  %598 = vmatprep.mubr.bf16.mxu0 %v1246_v48 }
  0x3d   :  { %718 = vmatprep.mubr.bf16.mxu1 %v1248_v49 }
  0x43   :  { %599 = vmatmul.mubr.bf16.gmra.mxu0 %v1250_v50 }
  0x44   :  { %719 = vmatmul.mubr.bf16.gmra.mxu1 %v1251_v51  ;;  %606 = vmatprep.mubr.bf16.mxu0 %v1252_v52 }
  0x45   :  { %726 = vmatprep.mubr.bf16.mxu1 %v1254_v53 }
  0x4b   :  { %607 = vmatmul.mubr.bf16.gmra.mxu0 %v1256_v54 }
  0x4c   :  { %727 = vmatmul.mubr.bf16.gmra.mxu1 %v1257_v55  ;;  %614 = vmatprep.mubr.bf16.mxu0 %v1258_v56 }
  0x4d   :  { %734 = vmatprep.mubr.bf16.mxu1 %v1260_v57 }
  0x53   :  { %615 = vmatmul.mubr.bf16.gmra.mxu0 %v1262_v58 }
  0x54   :  { %735 = vmatmul.mubr.bf16.gmra.mxu1 %v1263_v59  ;;  %622 = vmatprep.mubr.bf16.mxu0 %v1264_v60 }
  0x55   :  { %742 = vmatprep.mubr.bf16.mxu1 %v1266_v61 }
  0x5b   :  { %623 = vmatmul.mubr.bf16.gmra.mxu0 %v1268_v62 }
  0x5c   :  { %743 = vmatmul.mubr.bf16.gmra.mxu1 %v1269_v63  ;;  %630 = vmatprep.mubr.bf16.mxu0 %v1270_v0 }
  0x5d   :  { %750 = vmatprep.mubr.bf16.mxu1 %v1272_v1 }
  0x63   :  { %631 = vmatmul.mubr.bf16.gmra.mxu0 %v1274_v2 }
  0x64   :  { %751 = vmatmul.mubr.bf16.gmra.mxu1 %v1275_v3  ;;  %638 = vmatprep.mubr.bf16.mxu0 %v1276_v4 }
  0x65   :  { %758 = vmatprep.mubr.bf16.mxu1 %v1278_v5 }
  0x6b   :  { %639 = vmatmul.mubr.bf16.gmra.mxu0 %v1280_v8 }
  0x6c   :  { %759 = vmatmul.mubr.bf16.gmra.mxu1 %v1281_v9  ;;  %646 = vmatprep.mubr.bf16.mxu0 %v949_v10 }
  0x6d   :  { %766 = vmatprep.mubr.bf16.mxu1 %v951_v11 }
  0x73   :  { %647 = vmatmul.mubr.bf16.gmra.mxu0 %v948_v12 }
  0x74   :  { %767 = vmatmul.mubr.bf16.gmra.mxu1 %v950_v13 }
  0xe3   :  { %v1042_v14 = vpop.f32.mrf.mxu0 }
  0xe4   :  { %v1124_v15 = vpop.f32.mrf.mxu1 }
  0xe5   :  { %v1043_v17 = vpop.f32.mrf.mxu0 }
  0xe6   :  { %v1044_v18 = vadd.f32 %v1043_v17, %v1042_v14  ;;  %v1125_v19 = vpop.f32.mrf.mxu1 }
  0xe7   :  { %v1045_v20 = vpop.f32.mrf.mxu0  ;;  %v1126_v22 = vadd.f32 %v1125_v19, %v1124_v15 }
  0xe8   :  { %v569_v21 = vadd.f32 %v1044_v18, %v1531_v16  ;;  %v1127_v23 = vpop.f32.mrf.mxu1 }
  0xe9   :  { %v1046_v24 = vpop.f32.mrf.mxu0 }
  0xea   :  { %v689_v25 = vadd.f32 %v1126_v22, %v569_v21  ;;  %v1047_v26 = vadd.f32 %v1046_v24, %v1045_v20  ;;  %v1128_v27 = vpop.f32.mrf.mxu1 }
  0xeb   :  { %v1048_v28 = vpop.f32.mrf.mxu0  ;;  %v1129_v31 = vadd.f32 %v1128_v27, %v1127_v23 }
  0xec   :  { %v774_v29 = vmax.f32 %v689_v25, 0.0  ;;  %v572_v30 = vadd.f32 %v1047_v26, %v1531_v16  ;;  %v1130_v32 = vpop.f32.mrf.mxu1 }
  0xed   :  { %v1049_v33 = vpop.f32.mrf.mxu0 }
  0xee   :  { %v1005_v34 = vpack.c.bf16 %v774_v29, %v774_v29  ;;  %v692_v35 = vadd.f32 %v1129_v31, %v572_v30  ;;  %v1050_v36 = vadd.f32 %v1049_v33, %v1048_v28  ;;  %v1131_v37 = vpop.f32.mrf.mxu1 }
  0xef   :  { %v1051_v38 = vpop.f32.mrf.mxu0  ;;  %v1132_v41 = vadd.f32 %v1131_v37, %v1130_v32 }
  0xf0   :  { %881 = vst.msk [vmem:[%s1640_s3] sm:$0xf] %vm880_vm0, %v1005_v34  ;;  %v775_v39 = vmax.f32 %v692_v35, 0.0  ;;  %v577_v40 = vadd.f32 %v1050_v36, %v1531_v16  ;;  %v1133_v42 = vpop.f32.mrf.mxu1 }
  0xf1   :  { %v1052_v43 = vpop.f32.mrf.mxu0 }
  0xf2   :  { %v1006_v44 = vpack.c.bf16 %v775_v39, %v775_v39  ;;  %v697_v45 = vadd.f32 %v1132_v41, %v577_v40  ;;  %v1053_v46 = vadd.f32 %v1052_v43, %v1051_v38  ;;  %v1134_v47 = vpop.f32.mrf.mxu1 }
  0xf3   :  { %v1054_v48 = vpop.f32.mrf.mxu0  ;;  %v1135_v51 = vadd.f32 %v1134_v47, %v1133_v42 }
  0xf4   :  { %882 = vst.msk [vmem:[%s1640_s3 + $0x4] sm:$0xf] %vm880_vm0, %v1006_v44  ;;  %v776_v49 = vmax.f32 %v697_v45, 0.0  ;;  %v580_v50 = vadd.f32 %v1053_v46, %v1531_v16  ;;  %v1136_v52 = vpop.f32.mrf.mxu1 }
  0xf5   :  { %v1055_v53 = vpop.f32.mrf.mxu0 }
  0xf6   :  { %v1007_v54 = vpack.c.bf16 %v776_v49, %v776_v49  ;;  %v700_v55 = vadd.f32 %v1135_v51, %v580_v50  ;;  %v1056_v56 = vadd.f32 %v1055_v53, %v1054_v48  ;;  %v1137_v57 = vpop.f32.mrf.mxu1 }
  0xf7   :  { %v1057_v58 = vpop.f32.mrf.mxu0  ;;  %v1138_v61 = vadd.f32 %v1137_v57, %v1136_v52 }
  0xf8   :  { %883 = vst.msk [vmem:[%s1640_s3 + $0x8] sm:$0xf] %vm880_vm0, %v1007_v54  ;;  %v777_v59 = vmax.f32 %v700_v55, 0.0  ;;  %v585_v60 = vadd.f32 %v1056_v56, %v1531_v16  ;;  %v1139_v62 = vpop.f32.mrf.mxu1 }
  0xf9   :  { %v1058_v63 = vpop.f32.mrf.mxu0 }
  0xfa   :  { %v1008_v0 = vpack.c.bf16 %v777_v59, %v777_v59  ;;  %v705_v1 = vadd.f32 %v1138_v61, %v585_v60  ;;  %v1059_v2 = vadd.f32 %v1058_v63, %v1057_v58  ;;  %v1140_v3 = vpop.f32.mrf.mxu1 }
  0xfb   :  { %v1060_v4 = vpop.f32.mrf.mxu0  ;;  %v1141_v7 = vadd.f32 %v1140_v3, %v1139_v62 }
  0xfc   :  { %884 = vst.msk [vmem:[%s1640_s3 + $0xc] sm:$0xf] %vm880_vm0, %v1008_v0  ;;  %v778_v5 = vmax.f32 %v705_v1, 0.0  ;;  %v588_v6 = vadd.f32 %v1059_v2, %v1531_v16  ;;  %v1142_v8 = vpop.f32.mrf.mxu1 }
  0xfd   :  { %v1061_v9 = vpop.f32.mrf.mxu0 }
  0xfe   :  { %v1009_v10 = vpack.c.bf16 %v778_v5, %v778_v5  ;;  %v708_v11 = vadd.f32 %v1141_v7, %v588_v6  ;;  %v1062_v12 = vadd.f32 %v1061_v9, %v1060_v4  ;;  %v1143_v13 = vpop.f32.mrf.mxu1 }
  0xff   :  { %v1063_v14 = vpop.f32.mrf.mxu0  ;;  %v1144_v18 = vadd.f32 %v1143_v13, %v1142_v8 }
 0x100   :  { %885 = vst.msk [vmem:[%s1640_s3 + $0x10] sm:$0xf] %vm880_vm0, %v1009_v10  ;;  %v779_v15 = vmax.f32 %v708_v11, 0.0  ;;  %v593_v17 = vadd.f32 %v1062_v12, %v1531_v16  ;;  %v1145_v19 = vpop.f32.mrf.mxu1 }
 0x101   :  { %v1064_v20 = vpop.f32.mrf.mxu0 }
 0x102   :  { %v1010_v21 = vpack.c.bf16 %v779_v15, %v779_v15  ;;  %v713_v22 = vadd.f32 %v1144_v18, %v593_v17  ;;  %v1065_v23 = vadd.f32 %v1064_v20, %v1063_v14  ;;  %v1146_v24 = vpop.f32.mrf.mxu1 }
 0x103   :  { %v1066_v25 = vpop.f32.mrf.mxu0  ;;  %v1147_v28 = vadd.f32 %v1146_v24, %v1145_v19 }
 0x104   :  { %886 = vst.msk [vmem:[%s1640_s3 + $0x14] sm:$0xf] %vm880_vm0, %v1010_v21  ;;  %v780_v26 = vmax.f32 %v713_v22, 0.0  ;;  %v596_v27 = vadd.f32 %v1065_v23, %v1531_v16  ;;  %v1148_v29 = vpop.f32.mrf.mxu1 }
 0x105   :  { %v1067_v30 = vpop.f32.mrf.mxu0 }
 0x106   :  { %v1011_v31 = vpack.c.bf16 %v780_v26, %v780_v26  ;;  %v716_v32 = vadd.f32 %v1147_v28, %v596_v27  ;;  %v1068_v33 = vadd.f32 %v1067_v30, %v1066_v25  ;;  %v1149_v34 = vpop.f32.mrf.mxu1 }
 0x107   :  { %v1069_v35 = vpop.f32.mrf.mxu0  ;;  %v1150_v38 = vadd.f32 %v1149_v34, %v1148_v29 }
 0x108   :  { %887 = vst.msk [vmem:[%s1640_s3 + $0x18] sm:$0xf] %vm880_vm0, %v1011_v31  ;;  %v781_v36 = vmax.f32 %v716_v32, 0.0  ;;  %v601_v37 = vadd.f32 %v1068_v33, %v1531_v16  ;;  %v1151_v39 = vpop.f32.mrf.mxu1 }
 0x109   :  { %v1070_v40 = vpop.f32.mrf.mxu0 }
 0x10a   :  { %v1012_v41 = vpack.c.bf16 %v781_v36, %v781_v36  ;;  %v721_v42 = vadd.f32 %v1150_v38, %v601_v37  ;;  %v1071_v43 = vadd.f32 %v1070_v40, %v1069_v35  ;;  %v1152_v44 = vpop.f32.mrf.mxu1 }
 0x10b   :  { %v1072_v45 = vpop.f32.mrf.mxu0  ;;  %v1153_v48 = vadd.f32 %v1152_v44, %v1151_v39 }
 0x10c   :  { %888 = vst.msk [vmem:[%s1640_s3 + $0x1c] sm:$0xf] %vm880_vm0, %v1012_v41  ;;  %v782_v46 = vmax.f32 %v721_v42, 0.0  ;;  %v604_v47 = vadd.f32 %v1071_v43, %v1531_v16  ;;  %v1154_v49 = vpop.f32.mrf.mxu1 }
 0x10d   :  { %v1073_v50 = vpop.f32.mrf.mxu0 }
 0x10e   :  { %v1013_v51 = vpack.c.bf16 %v782_v46, %v782_v46  ;;  %v724_v52 = vadd.f32 %v1153_v48, %v604_v47  ;;  %v1074_v53 = vadd.f32 %v1073_v50, %v1072_v45  ;;  %v1155_v54 = vpop.f32.mrf.mxu1 }
 0x10f   :  { %v1075_v55 = vpop.f32.mrf.mxu0  ;;  %v1156_v58 = vadd.f32 %v1155_v54, %v1154_v49 }
 0x110   :  { %889 = vst.msk [vmem:[%s1640_s3 + $0x20] sm:$0xf] %vm880_vm0, %v1013_v51  ;;  %v783_v56 = vmax.f32 %v724_v52, 0.0  ;;  %v609_v57 = vadd.f32 %v1074_v53, %v1531_v16  ;;  %v1157_v59 = vpop.f32.mrf.mxu1 }
 0x111   :  { %v1076_v60 = vpop.f32.mrf.mxu0 }
 0x112   :  { %v1014_v61 = vpack.c.bf16 %v783_v56, %v783_v56  ;;  %v729_v62 = vadd.f32 %v1156_v58, %v609_v57  ;;  %v1077_v63 = vadd.f32 %v1076_v60, %v1075_v55  ;;  %v1158_v0 = vpop.f32.mrf.mxu1 }
 0x113   :  { %v1078_v1 = vpop.f32.mrf.mxu0  ;;  %v1159_v4 = vadd.f32 %v1158_v0, %v1157_v59 }
 0x114   :  { %890 = vst.msk [vmem:[%s1640_s3 + $0x24] sm:$0xf] %vm880_vm0, %v1014_v61  ;;  %v784_v2 = vmax.f32 %v729_v62, 0.0  ;;  %v612_v3 = vadd.f32 %v1077_v63, %v1531_v16  ;;  %v1160_v5 = vpop.f32.mrf.mxu1 }
 0x115   :  { %v1079_v6 = vpop.f32.mrf.mxu0 }
 0x116   :  { %v1015_v7 = vpack.c.bf16 %v784_v2, %v784_v2  ;;  %v732_v8 = vadd.f32 %v1159_v4, %v612_v3  ;;  %v1080_v9 = vadd.f32 %v1079_v6, %v1078_v1  ;;  %v1161_v10 = vpop.f32.mrf.mxu1 }
 0x117   :  { %v1081_v11 = vpop.f32.mrf.mxu0  ;;  %v1162_v14 = vadd.f32 %v1161_v10, %v1160_v5 }
 0x118   :  { %891 = vst.msk [vmem:[%s1640_s3 + $0x28] sm:$0xf] %vm880_vm0, %v1015_v7  ;;  %v785_v12 = vmax.f32 %v732_v8, 0.0  ;;  %v617_v13 = vadd.f32 %v1080_v9, %v1531_v16  ;;  %v1163_v15 = vpop.f32.mrf.mxu1 }
 0x119   :  { %v1082_v17 = vpop.f32.mrf.mxu0 }
 0x11a   :  { %v1016_v18 = vpack.c.bf16 %v785_v12, %v785_v12  ;;  %v737_v19 = vadd.f32 %v1162_v14, %v617_v13  ;;  %v1083_v20 = vadd.f32 %v1082_v17, %v1081_v11  ;;  %v1164_v21 = vpop.f32.mrf.mxu1 }
 0x11b   :  { %v1084_v22 = vpop.f32.mrf.mxu0  ;;  %v1165_v25 = vadd.f32 %v1164_v21, %v1163_v15 }
 0x11c   :  { %892 = vst.msk [vmem:[%s1640_s3 + $0x2c] sm:$0xf] %vm880_vm0, %v1016_v18  ;;  %v786_v23 = vmax.f32 %v737_v19, 0.0  ;;  %v620_v24 = vadd.f32 %v1083_v20, %v1531_v16  ;;  %v1166_v26 = vpop.f32.mrf.mxu1 }
 0x11d   :  { %v1085_v27 = vpop.f32.mrf.mxu0 }
 0x11e   :  { %v1017_v28 = vpack.c.bf16 %v786_v23, %v786_v23  ;;  %v740_v29 = vadd.f32 %v1165_v25, %v620_v24  ;;  %v1086_v30 = vadd.f32 %v1085_v27, %v1084_v22  ;;  %v1167_v31 = vpop.f32.mrf.mxu1 }
 0x11f   :  { %v1087_v32 = vpop.f32.mrf.mxu0  ;;  %v1168_v35 = vadd.f32 %v1167_v31, %v1166_v26 }
 0x120   :  { %893 = vst.msk [vmem:[%s1640_s3 + $0x30] sm:$0xf] %vm880_vm0, %v1017_v28  ;;  %v787_v33 = vmax.f32 %v740_v29, 0.0  ;;  %v625_v34 = vadd.f32 %v1086_v30, %v1531_v16  ;;  %v1169_v36 = vpop.f32.mrf.mxu1 }
 0x121   :  { %v1088_v37 = vpop.f32.mrf.mxu0 }
 0x122   :  { %v1018_v38 = vpack.c.bf16 %v787_v33, %v787_v33  ;;  %v745_v39 = vadd.f32 %v1168_v35, %v625_v34  ;;  %v1089_v40 = vadd.f32 %v1088_v37, %v1087_v32  ;;  %v1170_v41 = vpop.f32.mrf.mxu1 }
 0x123   :  { %v1090_v42 = vpop.f32.mrf.mxu0  ;;  %v1171_v45 = vadd.f32 %v1170_v41, %v1169_v36 }
 0x124   :  { %894 = vst.msk [vmem:[%s1640_s3 + $0x34] sm:$0xf] %vm880_vm0, %v1018_v38  ;;  %v788_v43 = vmax.f32 %v745_v39, 0.0  ;;  %v628_v44 = vadd.f32 %v1089_v40, %v1531_v16  ;;  %v1172_v46 = vpop.f32.mrf.mxu1 }
 0x125   :  { %v1091_v47 = vpop.f32.mrf.mxu0 }
 0x126   :  { %v1019_v48 = vpack.c.bf16 %v788_v43, %v788_v43  ;;  %v748_v49 = vadd.f32 %v1171_v45, %v628_v44  ;;  %v1092_v50 = vadd.f32 %v1091_v47, %v1090_v42  ;;  %v1173_v51 = vpop.f32.mrf.mxu1 }
 0x127   :  { %v1093_v52 = vpop.f32.mrf.mxu0  ;;  %v1174_v55 = vadd.f32 %v1173_v51, %v1172_v46 }
 0x128   :  { %895 = vst.msk [vmem:[%s1640_s3 + $0x38] sm:$0xf] %vm880_vm0, %v1019_v48  ;;  %v789_v53 = vmax.f32 %v748_v49, 0.0  ;;  %v633_v54 = vadd.f32 %v1092_v50, %v1531_v16  ;;  %v1175_v56 = vpop.f32.mrf.mxu1 }
 0x129   :  { %v1094_v57 = vpop.f32.mrf.mxu0 }
 0x12a   :  { %v1020_v58 = vpack.c.bf16 %v789_v53, %v789_v53  ;;  %v753_v59 = vadd.f32 %v1174_v55, %v633_v54  ;;  %v1095_v60 = vadd.f32 %v1094_v57, %v1093_v52  ;;  %v1176_v61 = vpop.f32.mrf.mxu1 }
 0x12b   :  { %v1096_v62 = vpop.f32.mrf.mxu0  ;;  %v1177_v1 = vadd.f32 %v1176_v61, %v1175_v56 }
 0x12c   :  { %896 = vst.msk [vmem:[%s1640_s3 + $0x3c] sm:$0xf] %vm880_vm0, %v1020_v58  ;;  %v790_v63 = vmax.f32 %v753_v59, 0.0  ;;  %v636_v0 = vadd.f32 %v1095_v60, %v1531_v16  ;;  %v1178_v2 = vpop.f32.mrf.mxu1 }
 0x12d   :  { %v1097_v3 = vpop.f32.mrf.mxu0 }
 0x12e   :  { %v1021_v4 = vpack.c.bf16 %v790_v63, %v790_v63  ;;  %v756_v5 = vadd.f32 %v1177_v1, %v636_v0  ;;  %v1098_v6 = vadd.f32 %v1097_v3, %v1096_v62  ;;  %v1179_v7 = vpop.f32.mrf.mxu1 }
 0x12f   :  { %v1099_v8 = vpop.f32.mrf.mxu0  ;;  %v1180_v11 = vadd.f32 %v1179_v7, %v1178_v2 }
 0x130   :  { %897 = vst.msk [vmem:[%s1640_s3 + $0x40] sm:$0xf] %vm880_vm0, %v1021_v4  ;;  %v791_v9 = vmax.f32 %v756_v5, 0.0  ;;  %v641_v10 = vadd.f32 %v1098_v6, %v1531_v16  ;;  %v1181_v12 = vpop.f32.mrf.mxu1 }
 0x131   :  { %v1100_v13 = vpop.f32.mrf.mxu0 }
 0x132   :  { %v1022_v14 = vpack.c.bf16 %v791_v9, %v791_v9  ;;  %v761_v15 = vadd.f32 %v1180_v11, %v641_v10  ;;  %v1101_v17 = vadd.f32 %v1100_v13, %v1099_v8  ;;  %v1182_v18 = vpop.f32.mrf.mxu1 }
 0x133   :  { %v1102_v19 = vpop.f32.mrf.mxu0  ;;  %v1183_v22 = vadd.f32 %v1182_v18, %v1181_v12 }
 0x134   :  { %898 = vst.msk [vmem:[%s1640_s3 + $0x44] sm:$0xf] %vm880_vm0, %v1022_v14  ;;  %v792_v20 = vmax.f32 %v761_v15, 0.0  ;;  %v644_v21 = vadd.f32 %v1101_v17, %v1531_v16  ;;  %v1184_v23 = vpop.f32.mrf.mxu1 }
 0x135   :  { %v1103_v24 = vpop.f32.mrf.mxu0 }
 0x136   :  { %v1023_v25 = vpack.c.bf16 %v792_v20, %v792_v20  ;;  %v764_v26 = vadd.f32 %v1183_v22, %v644_v21  ;;  %v1104_v27 = vadd.f32 %v1103_v24, %v1102_v19  ;;  %v1185_v28 = vpop.f32.mrf.mxu1 }
 0x137   :  { %v1105_v29 = vpop.f32.mrf.mxu0  ;;  %v1186_v32 = vadd.f32 %v1185_v28, %v1184_v23 }
 0x138   :  { %899 = vst.msk [vmem:[%s1640_s3 + $0x48] sm:$0xf] %vm880_vm0, %v1023_v25  ;;  %v793_v30 = vmax.f32 %v764_v26, 0.0  ;;  %v649_v31 = vadd.f32 %v1104_v27, %v1531_v16  ;;  %v1187_v33 = vpop.f32.mrf.mxu1 }
 0x139   :  { %v1106_v34 = vpop.f32.mrf.mxu0 }
 0x13a   :  { %v1024_v35 = vpack.c.bf16 %v793_v30, %v793_v30  ;;  %v769_v36 = vadd.f32 %v1186_v32, %v649_v31  ;;  %v1188_v37 = vpop.f32.mrf.mxu1 }
 0x13c   :  { %900 = vst.msk [vmem:[%s1640_s3 + $0x4c] sm:$0xf] %vm880_vm0, %v1024_v35  ;;  %v794_v38 = vmax.f32 %v769_v36, 0.0 }
 0x13e   :  { %v1025_v39 = vpack.c.bf16 %v794_v38, %v794_v38 }
 0x140   :  { %902 = vst.msk [vmem:[%s1640_s3 + $0x50] sm:$0x1] %vm901_vm1, %v1025_v39 }

// kernel: crnn_forward.5
= control target key start
LH: loop header
LB: loop body
LE: loop exit
PB: predicated region body
PF: predicated region fallthrough
CT: control target
= control target key end

     0   :  { %17 = vsyncpa [#allocation3], 0  ;;  %v696_v35 = vlaneseq  ;;  %v7220_v36 = vmov 1966171168   ;;  %s9550_s0 = inlined_call_operand.vmem [shape: bf16[2,5184], index: 0, kind: input, shape index: {}]   ;;  %s9551_s1 = inlined_call_operand.vmem [shape: bf16[5184,256], index: 1, kind: input, shape index: {}]   ;;  %s9552_s2 = inlined_call_operand.vmem [shape: f32[1,256], index: 2, kind: input, shape index: {}]   ;;  %s9553_s3 = inlined_call_operand.vmem [shape: f32[2,32], index: 3, kind: input, shape index: {}]   ;;  %s9554_s4 = inlined_call_operand.vmem [shape: f32[256,96], index: 4, kind: input, shape index: {}]   ;;  %s9555_s5 = inlined_call_operand.vmem [shape: f32[32,96], index: 5, kind: input, shape index: {}]   ;;  %s9556_s6 = inlined_call_operand.vmem [shape: f32[1,96], index: 6, kind: input, shape index: {}]   ;;  %s9557_s7 = inlined_call_operand.vmem [shape: f32[1,96], index: 7, kind: input, shape index: {}]   ;;  %s9558_s8 = inlined_call_operand.vmem [shape: f32[32,6], index: 8, kind: input, shape index: {}]   ;;  %s9559_s9 = inlined_call_operand.vmem [shape: f32[1,6], index: 9, kind: input, shape index: {}]   ;;  %s9560_s10 = inlined_call_operand.hbm [shape: f32[2,6], index: 10, kind: output, shape index: {0}]   ;;  %s9561_s11 = inlined_call_operand.hbm [shape: f32[2,32], index: 11, kind: output, shape index: {1}]  }
   0x1   :  { %v6193_v0 = vld [vmem:[%s9551_s1 + $0x74] ss:$8 sps:$4 sm:$0xff]   ;;  %v6195_v1 = vld [vmem:[%s9551_s1 + $0x70] ss:$8 sps:$4 sm:$0xff]   ;;  %v6199_v4 = vld [vmem:[%s9551_s1 + $0x64] ss:$8 sps:$4 sm:$0xff]   ;;  %v714_v37 = vunpack.c.l.s4 %v7220_v36 }
   0x2   :  { %4255 = vmatprep.subr.bf16.mxu0 %v6193_v0  ;;  %v6196_v2 = vld [vmem:[%s9551_s1 + $0x174] ss:$8 sps:$4 sm:$0xff]   ;;  %v6198_v3 = vld [vmem:[%s9551_s1 + $0x170] ss:$8 sps:$4 sm:$0xff]   ;;  %v6201_v5 = vld [vmem:[%s9551_s1 + $0x60] ss:$8 sps:$4 sm:$0xff]  }
   0x3   :  { %4256 = vmatpush1.bf16.msra.mxu0 %v6195_v1  ;;  %4296 = vmatprep.subr.bf16.mxu1 %v6196_v2  ;;  %v6202_v6 = vld [vmem:[%s9551_s1 + $0x164] ss:$8 sps:$4 sm:$0xff]   ;;  %v6204_v7 = vld [vmem:[%s9551_s1 + $0x160] ss:$8 sps:$4 sm:$0xff]   ;;  %v6205_v8 = vld [vmem:[%s9551_s1 + $0x54] ss:$8 sps:$4 sm:$0xff]   ;;  %v715_v43 = vunpack.c.0.s8 %v714_v37 }
   0x4   :  { %4297 = vmatpush1.bf16.msra.mxu1 %v6198_v3  ;;  %4257 = vmatprep.subr.bf16.mxu0 %v6199_v4  ;;  %v6207_v9 = vld [vmem:[%s9551_s1 + $0x50] ss:$8 sps:$4 sm:$0xff]   ;;  %v6208_v10 = vld [vmem:[%s9551_s1 + $0x154] ss:$8 sps:$4 sm:$0xff]   ;;  %v6211_v11 = vld [vmem:[%s9551_s1 + $0x44] ss:$8 sps:$4 sm:$0xff]  }
   0x5   :  { %4298 = vmatprep.subr.bf16.mxu1 %v6202_v6  ;;  %v6210_v12 = vld [vmem:[%s9551_s1 + $0x150] ss:$8 sps:$4 sm:$0xff]   ;;  %v6214_v13 = vld [vmem:[%s9551_s1 + $0x144] ss:$8 sps:$4 sm:$0xff]   ;;  %v6213_v14 = vld [vmem:[%s9551_s1 + $0x40] ss:$8 sps:$4 sm:$0xff]  }
   0x6   :  { %v6217_v15 = vld [vmem:[%s9551_s1 + $0x34] ss:$8 sps:$4 sm:$0xff]   ;;  %v6216_v16 = vld [vmem:[%s9551_s1 + $0x140] ss:$8 sps:$4 sm:$0xff]   ;;  %v6219_v18 = vld [vmem:[%s9551_s1 + $0x30] ss:$8 sps:$4 sm:$0xff]  }
   0x7   :  { %4258 = vmatpush1.bf16.msra.mxu0 %v6201_v5  ;;  %v6220_v17 = vld [vmem:[%s9551_s1 + $0x134] ss:$8 sps:$4 sm:$0xff]   ;;  %v6223_v19 = vld [vmem:[%s9551_s1 + $0x24] ss:$8 sps:$4 sm:$0xff]   ;;  %v6222_v20 = vld [vmem:[%s9551_s1 + $0x130] ss:$8 sps:$4 sm:$0xff]  }
   0x8   :  { %4259 = vmatprep.subr.bf16.mxu0 %v6205_v8  ;;  %4299 = vmatpush1.bf16.msra.mxu1 %v6204_v7  ;;  %v6226_v21 = vld [vmem:[%s9551_s1 + $0x124] ss:$8 sps:$4 sm:$0xff]   ;;  %v6225_v22 = vld [vmem:[%s9551_s1 + $0x20] ss:$8 sps:$4 sm:$0xff]   ;;  %v6229_v23 = vld [vmem:[%s9551_s1 + $0x14] ss:$8 sps:$4 sm:$0xff]  }
   0x9   :  { %4300 = vmatprep.subr.bf16.mxu1 %v6208_v10  ;;  %v6228_v24 = vld [vmem:[%s9551_s1 + $0x120] ss:$8 sps:$4 sm:$0xff]   ;;  %v6232_v25 = vld [vmem:[%s9551_s1 + $0x114] ss:$8 sps:$4 sm:$0xff]   ;;  %v6231_v26 = vld [vmem:[%s9551_s1 + $0x10] ss:$8 sps:$4 sm:$0xff]  }
   0xa   :  { %v6235_v27 = vld [vmem:[%s9551_s1 + $0x4] ss:$8 sps:$4 sm:$0xff]   ;;  %v6234_v28 = vld [vmem:[%s9551_s1 + $0x110] ss:$8 sps:$4 sm:$0xff]   ;;  %v6237_v30 = vld [vmem:[%s9551_s1] ss:$8 sps:$4 sm:$0xff]  }
   0xb   :  { %4260 = vmatpush1.bf16.msra.mxu0 %v6207_v9  ;;  %v6238_v29 = vld [vmem:[%s9551_s1 + $0x104] ss:$8 sps:$4 sm:$0xff]   ;;  %v6241_v31 = vld [vmem:[%s9551_s1 + $0xf4] ss:$8 sps:$4 sm:$0xff]   ;;  %v6240_v32 = vld [vmem:[%s9551_s1 + $0x100] ss:$8 sps:$4 sm:$0xff]  }
   0xc   :  { %4261 = vmatprep.subr.bf16.mxu0 %v6211_v11  ;;  %4301 = vmatpush1.bf16.msra.mxu1 %v6210_v12  ;;  %v6244_v33 = vld [vmem:[%s9551_s1 + $0x1f4] ss:$8 sps:$4 sm:$0xff]   ;;  %v6243_v34 = vld [vmem:[%s9551_s1 + $0xf0] ss:$8 sps:$4 sm:$0xff]   ;;  %v6247_v38 = vld [vmem:[%s9551_s1 + $0xe4] ss:$8 sps:$4 sm:$0xff]  }
   0xd   :  { %4302 = vmatprep.subr.bf16.mxu1 %v6214_v13  ;;  %v6246_v39 = vld [vmem:[%s9551_s1 + $0x1f0] ss:$8 sps:$4 sm:$0xff]   ;;  %v6250_v40 = vld [vmem:[%s9551_s1 + $0x1e4] ss:$8 sps:$4 sm:$0xff]   ;;  %v6249_v41 = vld [vmem:[%s9551_s1 + $0xe0] ss:$8 sps:$4 sm:$0xff]  }
   0xe   :  { %v7406_v42 = vshrl.u32 %v696_v35, 7  ;;  %v6253_v44 = vld [vmem:[%s9551_s1 + $0xd4] ss:$8 sps:$4 sm:$0xff]   ;;  %v6252_v45 = vld [vmem:[%s9551_s1 + $0x1e0] ss:$8 sps:$4 sm:$0xff]  }
   0xf   :  { %4262 = vmatpush1.bf16.msra.mxu0 %v6213_v14  ;;  %v6256_v46 = vld [vmem:[%s9551_s1 + $0x1d4] ss:$8 sps:$4 sm:$0xff]   ;;  %v6255_v47 = vld [vmem:[%s9551_s1 + $0xd0] ss:$8 sps:$4 sm:$0xff]   ;;  %v6259_v49 = vld [vmem:[%s9551_s1 + $0xc4] ss:$8 sps:$4 sm:$0xff]  }
  0x10   :  { %4263 = vmatprep.subr.bf16.mxu0 %v6217_v15  ;;  %4303 = vmatpush1.bf16.msra.mxu1 %v6216_v16  ;;  %v7421_v48 = vsub.s32 %v715_v43, %v7406_v42  ;;  %v6258_v50 = vld [vmem:[%s9551_s1 + $0x1d0] ss:$8 sps:$4 sm:$0xff]   ;;  %v6262_v51 = vld [vmem:[%s9551_s1 + $0x1c4] ss:$8 sps:$4 sm:$0xff]   ;;  %v6261_v53 = vld [vmem:[%s9551_s1 + $0xc0] ss:$8 sps:$4 sm:$0xff]  }
  0x11   :  { %4304 = vmatprep.subr.bf16.mxu1 %v6220_v17  ;;  %v40_v52 = vld [vmem:[%s9550_s0] sm:$0xff]  ;;  %v6265_v55 = vld [vmem:[%s9551_s1 + $0xb4] ss:$8 sps:$4 sm:$0xff]   ;;  %v6267_v59 = vld [vmem:[%s9551_s1 + $0xb0] ss:$8 sps:$4 sm:$0xff]  }
  0x12   :  { %v719_v54 = vrot.slane %v40_v52, %v7421_v48  ;;  %v6264_v56 = vld [vmem:[%s9551_s1 + $0x1c0] ss:$8 sps:$4 sm:$0xff]   ;;  %v6268_v58 = vld [vmem:[%s9551_s1 + $0x1b4] ss:$8 sps:$4 sm:$0xff]   ;;  %v6271_v61 = vld [vmem:[%s9551_s1 + $0xa4] ss:$8 sps:$4 sm:$0xff]   ;;  %v712_v63 = vcombine.high %v40_v52, %v40_v52 }
  0x13   :  { %4264 = vmatpush1.bf16.msra.mxu0 %v6219_v18  ;;  %v6270_v62 = vld [vmem:[%s9551_s1 + $0x1b0] ss:$8 sps:$4 sm:$0xff]   ;;  %v6274_v1 = vld [vmem:[%s9551_s1 + $0x1a4] ss:$8 sps:$4 sm:$0xff]   ;;  %v6273_v2 = vld [vmem:[%s9551_s1 + $0xa0] ss:$8 sps:$4 sm:$0xff]  }
  0x14   :  { %4265 = vmatprep.subr.bf16.mxu0 %v6223_v19  ;;  %4305 = vmatpush1.bf16.msra.mxu1 %v6222_v20  ;;  %v727_v57 = vcombine.high %v719_v54, %v719_v54  ;;  %v6277_v3 = vld [vmem:[%s9551_s1 + $0x94] ss:$8 sps:$4 sm:$0xff]   ;;  %v6276_v4 = vld [vmem:[%s9551_s1 + $0x1a0] ss:$8 sps:$4 sm:$0xff]   ;;  %v7471_v5 = vrot.slane %v712_v63, %v7421_v48  ;;  %v6279_v7 = vld [vmem:[%s9551_s1 + $0x90] ss:$8 sps:$4 sm:$0xff]   ;;  %v735_v13 = vrot.slane %v719_v54, %v7421_v48 }
  0x15   :  { %4306 = vmatprep.subr.bf16.mxu1 %v6226_v21  ;;  %v6280_v6 = vld [vmem:[%s9551_s1 + $0x194] ss:$8 sps:$4 sm:$0xff]   ;;  %v6283_v8 = vld [vmem:[%s9551_s1 + $0x84] ss:$8 sps:$4 sm:$0xff]   ;;  %v6282_v9 = vld [vmem:[%s9551_s1 + $0x190] ss:$8 sps:$4 sm:$0xff]  }
  0x16   :  { %v749_v60 = vrot.slane %v727_v57, %v7421_v48  ;;  %v728_v10 = vcombine.high %v7471_v5, %v7471_v5  ;;  %v6286_v11 = vld [vmem:[%s9551_s1 + $0x184] ss:$8 sps:$4 sm:$0xff]   ;;  %v6285_v12 = vld [vmem:[%s9551_s1 + $0x80] ss:$8 sps:$4 sm:$0xff]   ;;  %v6292_v14 = vld [vmem:[%s9551_s1 + $0x274] ss:$8 sps:$4 sm:$0xff]   ;;  %v757_v19 = vcombine.high %v735_v13, %v735_v13 }
  0x17   :  { %4266 = vmatpush1.bf16.msra.mxu0 %v6225_v22  ;;  %v6289_v15 = vld [vmem:[%s9551_s1 + $0x180] ss:$8 sps:$4 sm:$0xff]   ;;  %v6295_v17 = vld [vmem:[%s9551_s1 + $0x374] ss:$8 sps:$4 sm:$0xff]   ;;  %v6290_v18 = vld [vmem:[%s9551_s1 + $0x270] ss:$8 sps:$4 sm:$0xff]  }
  0x18   :  { %4267 = vmatprep.subr.bf16.mxu0 %v6229_v23  ;;  %4307 = vmatpush1.bf16.msra.mxu1 %v6228_v24  ;;  %v759_v0 = vcombine.high %v749_v60, %v749_v60  ;;  %v756_v16 = vrot.slane %v728_v10, %v7421_v48  ;;  %v6298_v20 = vld [vmem:[%s9551_s1 + $0x264] ss:$8 sps:$4 sm:$0xff]   ;;  %v6293_v21 = vld [vmem:[%s9551_s1 + $0x370] ss:$8 sps:$4 sm:$0xff]   ;;  %v6296_v24 = vld [vmem:[%s9551_s1 + $0x260] ss:$8 sps:$4 sm:$0xff]  }
  0x19   :  { %4308 = vmatprep.subr.bf16.mxu1 %v6232_v25  ;;  %4287 = vmatprep.mubr.bf16.mxu0 %v749_v60  ;;  %v6301_v23 = vld [vmem:[%s9551_s1 + $0x364] ss:$8 sps:$4 sm:$0xff]   ;;  %v6304_v25 = vld [vmem:[%s9551_s1 + $0x254] ss:$8 sps:$4 sm:$0xff]   ;;  %v6314_v36 = vld [vmem:[%s9551_s1 + $0x230] ss:$8 sps:$4 sm:$0xff]  }
  0x1a   :  { %4328 = vmatprep.mubr.bf16.mxu1 %v759_v0  ;;  %v760_v22 = vcombine.high %v756_v16, %v756_v16  ;;  %v6319_v35 = vld [vmem:[%s9551_s1 + $0x334] ss:$8 sps:$4 sm:$0xff]   ;;  %v6322_v37 = vld [vmem:[%s9551_s1 + $0x224] ss:$8 sps:$4 sm:$0xff]   ;;  %v6323_v43 = vld [vmem:[%s9551_s1 + $0x320] ss:$8 sps:$4 sm:$0xff]  }
  0x1b   :  { %4268 = vmatpush1.bf16.msra.mxu0 %v6231_v26  ;;  %v6299_v26 = vld [vmem:[%s9551_s1 + $0x360] ss:$8 sps:$4 sm:$0xff]   ;;  %v6338_v54 = vld [vmem:[%s9551_s1 + $0x2f0] ss:$8 sps:$4 sm:$0xff]   ;;  %v6349_v57 = vld [vmem:[%s9551_s1 + $0x3e4] ss:$8 sps:$4 sm:$0xff]  }
  0x1c   :  { %4269 = vmatprep.subr.bf16.mxu0 %v6235_v27  ;;  %4309 = vmatpush1.bf16.msra.mxu1 %v6234_v28  ;;  %v6307_v27 = vld [vmem:[%s9551_s1 + $0x354] ss:$8 sps:$4 sm:$0xff]   ;;  %v6302_v28 = vld [vmem:[%s9551_s1 + $0x250] ss:$8 sps:$4 sm:$0xff]   ;;  %v6335_v52 = vld [vmem:[%s9551_s1 + $0x300] ss:$8 sps:$4 sm:$0xff]  }
  0x1d   :  { %4310 = vmatprep.subr.bf16.mxu1 %v6238_v29  ;;  %v6310_v29 = vld [vmem:[%s9551_s1 + $0x244] ss:$8 sps:$4 sm:$0xff]   ;;  %v6347_v60 = vld [vmem:[%s9551_s1 + $0x3e0] ss:$8 sps:$4 sm:$0xff]   ;;  %v6353_v0 = vld [vmem:[%s9551_s1 + $0x3d0] ss:$8 sps:$4 sm:$0xff]  }
  0x1e   :  { %v6358_v63 = vld [vmem:[%s9551_s1 + $0x2c4] ss:$8 sps:$4 sm:$0xff]  }
  0x1f   :  { %4270 = vmatpush1.bf16.msra.mxu0 %v6237_v30  ;;  %v6305_v30 = vld [vmem:[%s9551_s1 + $0x350] ss:$8 sps:$4 sm:$0xff]   ;;  %v6373_v10 = vld [vmem:[%s9551_s1 + $0x3a4] ss:$8 sps:$4 sm:$0xff]  }
  0x20   :  { %4271 = vmatprep.subr.bf16.mxu0 %v6241_v31  ;;  %4311 = vmatpush1.bf16.msra.mxu1 %v6240_v32  ;;  %v6313_v31 = vld [vmem:[%s9551_s1 + $0x344] ss:$8 sps:$4 sm:$0xff]   ;;  %v6308_v32 = vld [vmem:[%s9551_s1 + $0x240] ss:$8 sps:$4 sm:$0xff]  }
  0x21   :  { %4312 = vmatprep.subr.bf16.mxu1 %v6244_v33  ;;  %v6316_v33 = vld [vmem:[%s9551_s1 + $0x234] ss:$8 sps:$4 sm:$0xff]  }
  0x23   :  { %4272 = vmatpush2.bf16.msra.mxu0 %v6243_v34  ;;  %v6311_v34 = vld [vmem:[%s9551_s1 + $0x340] ss:$8 sps:$4 sm:$0xff]  }
  0x24   :  { %4273 = vmatprep.subr.bf16.mxu0 %v6247_v38  ;;  %4313 = vmatpush2.bf16.msra.mxu1 %v6246_v39  ;;  %v6317_v38 = vld [vmem:[%s9551_s1 + $0x330] ss:$8 sps:$4 sm:$0xff]   ;;  %v6325_v39 = vld [vmem:[%s9551_s1 + $0x324] ss:$8 sps:$4 sm:$0xff]  }
  0x25   :  { %4314 = vmatprep.subr.bf16.mxu1 %v6250_v40  ;;  %v6320_v40 = vld [vmem:[%s9551_s1 + $0x220] ss:$8 sps:$4 sm:$0xff]  }
  0x27   :  { %4274 = vmatpush2.bf16.msra.mxu0 %v6249_v41  ;;  %v6328_v41 = vld [vmem:[%s9551_s1 + $0x214] ss:$8 sps:$4 sm:$0xff]  }
  0x28   :  { %4275 = vmatprep.subr.bf16.mxu0 %v6253_v44  ;;  %4315 = vmatpush2.bf16.msra.mxu1 %v6252_v45  ;;  %v6331_v44 = vld [vmem:[%s9551_s1 + $0x314] ss:$8 sps:$4 sm:$0xff]   ;;  %v6326_v45 = vld [vmem:[%s9551_s1 + $0x210] ss:$8 sps:$4 sm:$0xff]  }
  0x29   :  { %4316 = vmatprep.subr.bf16.mxu1 %v6256_v46  ;;  %v6334_v46 = vld [vmem:[%s9551_s1 + $0x204] ss:$8 sps:$4 sm:$0xff]  }
  0x2b   :  { %4276 = vmatpush2.bf16.msra.mxu0 %v6255_v47  ;;  %v6329_v47 = vld [vmem:[%s9551_s1 + $0x310] ss:$8 sps:$4 sm:$0xff]  }
  0x2c   :  { %4277 = vmatprep.subr.bf16.mxu0 %v6259_v49  ;;  %4317 = vmatpush2.bf16.msra.mxu1 %v6258_v50  ;;  %v6337_v49 = vld [vmem:[%s9551_s1 + $0x304] ss:$8 sps:$4 sm:$0xff]   ;;  %v6332_v50 = vld [vmem:[%s9551_s1 + $0x200] ss:$8 sps:$4 sm:$0xff]  }
  0x2d   :  { %4318 = vmatprep.subr.bf16.mxu1 %v6262_v51  ;;  %v6340_v51 = vld [vmem:[%s9551_s1 + $0x2f4] ss:$8 sps:$4 sm:$0xff]  }
  0x2f   :  { %4278 = vmatpush2.bf16.msra.mxu0 %v6261_v53  ;;  %v6343_v53 = vld [vmem:[%s9551_s1 + $0x3f4] ss:$8 sps:$4 sm:$0xff]  }
  0x30   :  { %4279 = vmatprep.subr.bf16.mxu0 %v6265_v55  ;;  %4319 = vmatpush2.bf16.msra.mxu1 %v6264_v56  ;;  %v6346_v55 = vld [vmem:[%s9551_s1 + $0x2e4] ss:$8 sps:$4 sm:$0xff]   ;;  %v6341_v56 = vld [vmem:[%s9551_s1 + $0x3f0] ss:$8 sps:$4 sm:$0xff]  }
  0x31   :  { %4320 = vmatprep.subr.bf16.mxu1 %v6268_v58  ;;  %v6344_v58 = vld [vmem:[%s9551_s1 + $0x2e0] ss:$8 sps:$4 sm:$0xff]  }
  0x33   :  { %4280 = vmatpush2.bf16.msra.mxu0 %v6267_v59  ;;  %v6352_v59 = vld [vmem:[%s9551_s1 + $0x2d4] ss:$8 sps:$4 sm:$0xff]  }
  0x34   :  { %4281 = vmatprep.subr.bf16.mxu0 %v6271_v61  ;;  %4321 = vmatpush2.bf16.msra.mxu1 %v6270_v62  ;;  %v6355_v61 = vld [vmem:[%s9551_s1 + $0x3d4] ss:$8 sps:$4 sm:$0xff]   ;;  %v6350_v62 = vld [vmem:[%s9551_s1 + $0x2d0] ss:$8 sps:$4 sm:$0xff]  }
  0x35   :  { %4322 = vmatprep.subr.bf16.mxu1 %v6274_v1  ;;  %v6361_v1 = vld [vmem:[%s9551_s1 + $0x3c4] ss:$8 sps:$4 sm:$0xff]  }
  0x37   :  { %4282 = vmatpush2.bf16.msra.mxu0 %v6273_v2  ;;  %v6356_v2 = vld [vmem:[%s9551_s1 + $0x2c0] ss:$8 sps:$4 sm:$0xff]  }
  0x38   :  { %4283 = vmatprep.subr.bf16.mxu0 %v6277_v3  ;;  %4323 = vmatpush2.bf16.msra.mxu1 %v6276_v4  ;;  %v6364_v3 = vld [vmem:[%s9551_s1 + $0x2b4] ss:$8 sps:$4 sm:$0xff]   ;;  %v6359_v4 = vld [vmem:[%s9551_s1 + $0x3c0] ss:$8 sps:$4 sm:$0xff]  }
  0x39   :  { %4324 = vmatprep.subr.bf16.mxu1 %v6280_v6  ;;  %v6367_v6 = vld [vmem:[%s9551_s1 + $0x3b4] ss:$8 sps:$4 sm:$0xff]  }
  0x3b   :  { %4284 = vmatpush2.bf16.msra.mxu0 %v6279_v7  ;;  %v6362_v7 = vld [vmem:[%s9551_s1 + $0x2b0] ss:$8 sps:$4 sm:$0xff]  }
  0x3c   :  { %4285 = vmatprep.subr.bf16.mxu0 %v6283_v8  ;;  %4325 = vmatpush2.bf16.msra.mxu1 %v6282_v9  ;;  %v6370_v8 = vld [vmem:[%s9551_s1 + $0x2a4] ss:$8 sps:$4 sm:$0xff]   ;;  %v6365_v9 = vld [vmem:[%s9551_s1 + $0x3b0] ss:$8 sps:$4 sm:$0xff]  }
  0x3d   :  { %4326 = vmatprep.subr.bf16.mxu1 %v6286_v11  ;;  %v6368_v11 = vld [vmem:[%s9551_s1 + $0x2a0] ss:$8 sps:$4 sm:$0xff]  }
  0x3f   :  { %4286 = vmatpush2.bf16.msra.mxu0 %v6285_v12  ;;  %v6376_v12 = vld [vmem:[%s9551_s1 + $0x294] ss:$8 sps:$4 sm:$0xff]  }
  0x40   :  { %4337 = vmatprep.subr.bf16.mxu0 %v6292_v14  ;;  %4327 = vmatpush2.bf16.msra.mxu1 %v6289_v15  ;;  %v6379_v14 = vld [vmem:[%s9551_s1 + $0x394] ss:$8 sps:$4 sm:$0xff]   ;;  %v6374_v15 = vld [vmem:[%s9551_s1 + $0x290] ss:$8 sps:$4 sm:$0xff]  }
  0x41   :  { %4378 = vmatprep.subr.bf16.mxu1 %v6295_v17  ;;  %v6377_v17 = vld [vmem:[%s9551_s1 + $0x390] ss:$8 sps:$4 sm:$0xff]  }
  0x42   :  { %4288 = vmatmul.mubr.bf16.vlgmr.msra.gmra.mxu0 %v735_v13  ;;  %v6371_v13 = vld [vmem:[%s9551_s1 + $0x3a0] ss:$8 sps:$4 sm:$0xff]  }
  0x43   :  { %4338 = vmatpush1.bf16.msra.mxu0 %v6290_v18  ;;  %4369 = vmatprep.mubr.bf16.mxu0 %v756_v16  ;;  %v6382_v16 = vld [vmem:[%s9551_s1 + $0x284] ss:$8 sps:$4 sm:$0xff]  }
  0x44   :  { %4329 = vmatmul.mubr.bf16.vlgmr.msra.gmra.mxu1 %v757_v19  ;;  %4339 = vmatprep.subr.bf16.mxu0 %v6298_v20  ;;  %v6385_v18 = vld [vmem:[%s9551_s1 + $0x384] ss:$8 sps:$4 sm:$0xff]   ;;  %v6380_v19 = vld [vmem:[%s9551_s1 + $0x280] ss:$8 sps:$4 sm:$0xff]   ;;  %v742_v20 = vrot.slane %v7471_v5, %v7421_v48 }
  0x45   :  { %4379 = vmatpush1.bf16.msra.mxu1 %v6293_v21  ;;  %4410 = vmatprep.mubr.bf16.mxu1 %v760_v22  ;;  %v6388_v21 = vld [vmem:[%s9551_s1 + $0x474] ss:$8 sps:$4 sm:$0xff]   ;;  %v6383_v22 = vld [vmem:[%s9551_s1 + $0x380] ss:$8 sps:$4 sm:$0xff]  }
  0x46   :  { %4380 = vmatprep.subr.bf16.mxu1 %v6301_v23  ;;  %v6391_v23 = vld [vmem:[%s9551_s1 + $0x574] ss:$8 sps:$4 sm:$0xff]   ;;  %v758_v5 = vcombine.high %v742_v20, %v742_v20 }
  0x47   :  { %4340 = vmatpush1.bf16.msra.mxu0 %v6296_v24  ;;  %v6386_v24 = vld [vmem:[%s9551_s1 + $0x470] ss:$8 sps:$4 sm:$0xff]  }
  0x48   :  { %4341 = vmatprep.subr.bf16.mxu0 %v6304_v25  ;;  %v6394_v25 = vld [vmem:[%s9551_s1 + $0x464] ss:$8 sps:$4 sm:$0xff]  }
  0x49   :  { %4381 = vmatpush1.bf16.msra.mxu1 %v6299_v26  ;;  %v7707_v26 = vld [vmem:[%s9550_s0 + $0x8] sm:$0xff] }
  0x4a   :  { %4382 = vmatprep.subr.bf16.mxu1 %v6307_v27  ;;  %v6389_v27 = vld [vmem:[%s9551_s1 + $0x570] ss:$8 sps:$4 sm:$0xff]  }
  0x4b   :  { %4342 = vmatpush1.bf16.msra.mxu0 %v6302_v28  ;;  %v7714_v28 = vrot.slane %v7707_v26, %v7421_v48 }
  0x4c   :  { %4343 = vmatprep.subr.bf16.mxu0 %v6310_v29  ;;  %v6397_v29 = vld [vmem:[%s9551_s1 + $0x564] ss:$8 sps:$4 sm:$0xff]  }
  0x4d   :  { %4383 = vmatpush1.bf16.msra.mxu1 %v6305_v30  ;;  %v6392_v30 = vld [vmem:[%s9551_s1 + $0x460] ss:$8 sps:$4 sm:$0xff]  }
  0x4e   :  { %4384 = vmatprep.subr.bf16.mxu1 %v6313_v31  ;;  %v776_v31 = vcombine.high %v7714_v28, %v7714_v28 }
  0x4f   :  { %4344 = vmatpush1.bf16.msra.mxu0 %v6308_v32  ;;  %v6400_v32 = vld [vmem:[%s9551_s1 + $0x454] ss:$8 sps:$4 sm:$0xff]  }
  0x50   :  { %4345 = vmatprep.subr.bf16.mxu0 %v6316_v33  ;;  %v6395_v33 = vld [vmem:[%s9551_s1 + $0x560] ss:$8 sps:$4 sm:$0xff]  }
  0x51   :  { %4385 = vmatpush1.bf16.msra.mxu1 %v6311_v34  ;;  %v798_v34 = vrot.slane %v776_v31, %v7421_v48  ;;  %v6476_v31 = vld [vmem:[%s9551_s1 + $0x480] ss:$8 sps:$4 sm:$0xff]  }
  0x52   :  { %4386 = vmatprep.subr.bf16.mxu1 %v6319_v35  ;;  %v6403_v35 = vld [vmem:[%s9551_s1 + $0x554] ss:$8 sps:$4 sm:$0xff]  }
  0x53   :  { %4346 = vmatpush1.bf16.msra.mxu0 %v6314_v36  ;;  %v6398_v36 = vld [vmem:[%s9551_s1 + $0x450] ss:$8 sps:$4 sm:$0xff]  }
  0x54   :  { %4347 = vmatprep.subr.bf16.mxu0 %v6322_v37  ;;  %v808_v37 = vcombine.high %v798_v34, %v798_v34 }
  0x55   :  { %4387 = vmatpush1.bf16.msra.mxu1 %v6317_v38  ;;  %v6406_v38 = vld [vmem:[%s9551_s1 + $0x444] ss:$8 sps:$4 sm:$0xff]  }
  0x56   :  { %4388 = vmatprep.subr.bf16.mxu1 %v6325_v39  ;;  %v6401_v39 = vld [vmem:[%s9551_s1 + $0x550] ss:$8 sps:$4 sm:$0xff]  }
  0x57   :  { %4348 = vmatpush1.bf16.msra.mxu0 %v6320_v40  ;;  %v6409_v40 = vld [vmem:[%s9551_s1 + $0x544] ss:$8 sps:$4 sm:$0xff]  }
  0x58   :  { %4349 = vmatprep.subr.bf16.mxu0 %v6328_v41  ;;  %v6404_v41 = vld [vmem:[%s9551_s1 + $0x440] ss:$8 sps:$4 sm:$0xff]  }
  0x59   :  { %4389 = vmatpush1.bf16.msra.mxu1 %v6323_v43  ;;  %v6412_v43 = vld [vmem:[%s9551_s1 + $0x434] ss:$8 sps:$4 sm:$0xff]  }
  0x5a   :  { %4390 = vmatprep.subr.bf16.mxu1 %v6331_v44  ;;  %v6407_v44 = vld [vmem:[%s9551_s1 + $0x540] ss:$8 sps:$4 sm:$0xff]  }
  0x5b   :  { %4350 = vmatpush1.bf16.msra.mxu0 %v6326_v45  ;;  %v6415_v45 = vld [vmem:[%s9551_s1 + $0x534] ss:$8 sps:$4 sm:$0xff]  }
  0x5c   :  { %4351 = vmatprep.subr.bf16.mxu0 %v6334_v46  ;;  %v6410_v46 = vld [vmem:[%s9551_s1 + $0x430] ss:$8 sps:$4 sm:$0xff]  }
  0x5d   :  { %4391 = vmatpush1.bf16.msra.mxu1 %v6329_v47  ;;  %v6418_v47 = vld [vmem:[%s9551_s1 + $0x424] ss:$8 sps:$4 sm:$0xff]  }
  0x5e   :  { %4392 = vmatprep.subr.bf16.mxu1 %v6337_v49  ;;  %v6413_v49 = vld [vmem:[%s9551_s1 + $0x530] ss:$8 sps:$4 sm:$0xff]  }
  0x5f   :  { %4352 = vmatpush1.bf16.msra.mxu0 %v6332_v50  ;;  %v6421_v50 = vld [vmem:[%s9551_s1 + $0x524] ss:$8 sps:$4 sm:$0xff]  }
  0x60   :  { %4353 = vmatprep.subr.bf16.mxu0 %v6340_v51  ;;  %v6416_v51 = vld [vmem:[%s9551_s1 + $0x420] ss:$8 sps:$4 sm:$0xff]  }
  0x61   :  { %4393 = vmatpush1.bf16.msra.mxu1 %v6335_v52  ;;  %v6424_v52 = vld [vmem:[%s9551_s1 + $0x414] ss:$8 sps:$4 sm:$0xff]  }
  0x62   :  { %4394 = vmatprep.subr.bf16.mxu1 %v6343_v53  ;;  %v6419_v53 = vld [vmem:[%s9551_s1 + $0x520] ss:$8 sps:$4 sm:$0xff]  }
  0x63   :  { %4354 = vmatpush2.bf16.msra.mxu0 %v6338_v54  ;;  %v6427_v54 = vld [vmem:[%s9551_s1 + $0x514] ss:$8 sps:$4 sm:$0xff]  }
  0x64   :  { %4355 = vmatprep.subr.bf16.mxu0 %v6346_v55  ;;  %v6422_v55 = vld [vmem:[%s9551_s1 + $0x410] ss:$8 sps:$4 sm:$0xff]  }
  0x65   :  { %4395 = vmatpush2.bf16.msra.mxu1 %v6341_v56  ;;  %v6430_v56 = vld [vmem:[%s9551_s1 + $0x404] ss:$8 sps:$4 sm:$0xff]  }
  0x66   :  { %4396 = vmatprep.subr.bf16.mxu1 %v6349_v57  ;;  %v6425_v57 = vld [vmem:[%s9551_s1 + $0x510] ss:$8 sps:$4 sm:$0xff]  }
  0x67   :  { %4356 = vmatpush2.bf16.msra.mxu0 %v6344_v58  ;;  %v6433_v58 = vld [vmem:[%s9551_s1 + $0x504] ss:$8 sps:$4 sm:$0xff]  }
  0x68   :  { %4357 = vmatprep.subr.bf16.mxu0 %v6352_v59  ;;  %v6428_v59 = vld [vmem:[%s9551_s1 + $0x400] ss:$8 sps:$4 sm:$0xff]  }
  0x69   :  { %4397 = vmatpush2.bf16.msra.mxu1 %v6347_v60  ;;  %v6436_v60 = vld [vmem:[%s9551_s1 + $0x4f4] ss:$8 sps:$4 sm:$0xff]  }
  0x6a   :  { %4398 = vmatprep.subr.bf16.mxu1 %v6355_v61  ;;  %v6431_v61 = vld [vmem:[%s9551_s1 + $0x500] ss:$8 sps:$4 sm:$0xff]  }
  0x6b   :  { %4358 = vmatpush2.bf16.msra.mxu0 %v6350_v62  ;;  %v6439_v62 = vld [vmem:[%s9551_s1 + $0x5f4] ss:$8 sps:$4 sm:$0xff]  }
  0x6c   :  { %4359 = vmatprep.subr.bf16.mxu0 %v6358_v63  ;;  %v6434_v63 = vld [vmem:[%s9551_s1 + $0x4f0] ss:$8 sps:$4 sm:$0xff]  }
  0x6d   :  { %4399 = vmatpush2.bf16.msra.mxu1 %v6353_v0  ;;  %v6442_v0 = vld [vmem:[%s9551_s1 + $0x4e4] ss:$8 sps:$4 sm:$0xff]  }
  0x6e   :  { %4400 = vmatprep.subr.bf16.mxu1 %v6361_v1  ;;  %v6437_v1 = vld [vmem:[%s9551_s1 + $0x5f0] ss:$8 sps:$4 sm:$0xff]  }
  0x6f   :  { %4360 = vmatpush2.bf16.msra.mxu0 %v6356_v2  ;;  %v6445_v2 = vld [vmem:[%s9551_s1 + $0x5e4] ss:$8 sps:$4 sm:$0xff]  }
  0x70   :  { %4361 = vmatprep.subr.bf16.mxu0 %v6364_v3  ;;  %v6440_v3 = vld [vmem:[%s9551_s1 + $0x4e0] ss:$8 sps:$4 sm:$0xff]  }
  0x71   :  { %4401 = vmatpush2.bf16.msra.mxu1 %v6359_v4  ;;  %v6448_v4 = vld [vmem:[%s9551_s1 + $0x4d4] ss:$8 sps:$4 sm:$0xff]  }
  0x72   :  { %4402 = vmatprep.subr.bf16.mxu1 %v6367_v6  ;;  %v6443_v6 = vld [vmem:[%s9551_s1 + $0x5e0] ss:$8 sps:$4 sm:$0xff]  }
  0x73   :  { %4362 = vmatpush2.bf16.msra.mxu0 %v6362_v7  ;;  %v6451_v7 = vld [vmem:[%s9551_s1 + $0x5d4] ss:$8 sps:$4 sm:$0xff]  }
  0x74   :  { %4363 = vmatprep.subr.bf16.mxu0 %v6370_v8  ;;  %v6446_v8 = vld [vmem:[%s9551_s1 + $0x4d0] ss:$8 sps:$4 sm:$0xff]  }
  0x75   :  { %4403 = vmatpush2.bf16.msra.mxu1 %v6365_v9  ;;  %v6454_v9 = vld [vmem:[%s9551_s1 + $0x4c4] ss:$8 sps:$4 sm:$0xff]  }
  0x76   :  { %4404 = vmatprep.subr.bf16.mxu1 %v6373_v10  ;;  %v6449_v10 = vld [vmem:[%s9551_s1 + $0x5d0] ss:$8 sps:$4 sm:$0xff]  }
  0x77   :  { %4364 = vmatpush2.bf16.msra.mxu0 %v6368_v11  ;;  %v6457_v11 = vld [vmem:[%s9551_s1 + $0x5c4] ss:$8 sps:$4 sm:$0xff]  }
  0x78   :  { %4365 = vmatprep.subr.bf16.mxu0 %v6376_v12  ;;  %v6452_v12 = vld [vmem:[%s9551_s1 + $0x4c0] ss:$8 sps:$4 sm:$0xff]  }
  0x79   :  { %4405 = vmatpush2.bf16.msra.mxu1 %v6371_v13  ;;  %v6460_v13 = vld [vmem:[%s9551_s1 + $0x4b4] ss:$8 sps:$4 sm:$0xff]  }
  0x7a   :  { %4406 = vmatprep.subr.bf16.mxu1 %v6379_v14  ;;  %v6455_v14 = vld [vmem:[%s9551_s1 + $0x5c0] ss:$8 sps:$4 sm:$0xff]  }
  0x7b   :  { %4366 = vmatpush2.bf16.msra.mxu0 %v6374_v15  ;;  %v6463_v15 = vld [vmem:[%s9551_s1 + $0x5b4] ss:$8 sps:$4 sm:$0xff]  }
  0x7c   :  { %4367 = vmatprep.subr.bf16.mxu0 %v6382_v16  ;;  %v6458_v16 = vld [vmem:[%s9551_s1 + $0x4b0] ss:$8 sps:$4 sm:$0xff]  }
  0x7d   :  { %4407 = vmatpush2.bf16.msra.mxu1 %v6377_v17  ;;  %v6466_v17 = vld [vmem:[%s9551_s1 + $0x4a4] ss:$8 sps:$4 sm:$0xff]  }
  0x7e   :  { %4408 = vmatprep.subr.bf16.mxu1 %v6385_v18  ;;  %v6461_v18 = vld [vmem:[%s9551_s1 + $0x5b0] ss:$8 sps:$4 sm:$0xff]  }
  0x7f   :  { %4368 = vmatpush2.bf16.msra.mxu0 %v6380_v19  ;;  %v761_v19 = vcombine.high %v7707_v26, %v7707_v26  ;;  %v6478_v26 = vld [vmem:[%s9551_s1 + $0x484] ss:$8 sps:$4 sm:$0xff]  }
  0x80   :  { %4419 = vmatprep.subr.bf16.mxu0 %v6388_v21  ;;  %v6464_v21 = vld [vmem:[%s9551_s1 + $0x4a0] ss:$8 sps:$4 sm:$0xff]  }
  0x81   :  { %4409 = vmatpush2.bf16.msra.mxu1 %v6383_v22  ;;  %v6472_v22 = vld [vmem:[%s9551_s1 + $0x494] ss:$8 sps:$4 sm:$0xff]  }
  0x82   :  { %4370 = vmatmul.mubr.bf16.vlgmr.msra.gmra.mxu0 %v742_v20  ;;  %4460 = vmatprep.subr.bf16.mxu1 %v6391_v23  ;;  %v6469_v20 = vld [vmem:[%s9551_s1 + $0x5a4] ss:$8 sps:$4 sm:$0xff]   ;;  %v6467_v23 = vld [vmem:[%s9551_s1 + $0x5a0] ss:$8 sps:$4 sm:$0xff]  }
  0x83   :  { %4420 = vmatpush1.bf16.msra.mxu0 %v6386_v24  ;;  %4451 = vmatprep.mubr.bf16.mxu0 %v798_v34  ;;  %v7878_v24 = vrot.slane %v761_v19, %v7421_v48  ;;  %v6479_v34 = vld [vmem:[%s9551_s1 + $0x580] ss:$8 sps:$4 sm:$0xff]   ;;  %v6545_v19 = vld [vmem:[%s9551_s1 + $0x7d0] ss:$8 sps:$4 sm:$0xff]  }
  0x84   :  { %4411 = vmatmul.mubr.bf16.vlgmr.msra.gmra.mxu1 %v758_v5  ;;  %4421 = vmatprep.subr.bf16.mxu0 %v6394_v25  ;;  %v6475_v5 = vld [vmem:[%s9551_s1 + $0x594] ss:$8 sps:$4 sm:$0xff]   ;;  %v6470_v25 = vld [vmem:[%s9551_s1 + $0x490] ss:$8 sps:$4 sm:$0xff]  }
  0x85   :  { %4461 = vmatpush1.bf16.msra.mxu1 %v6389_v27  ;;  %4492 = vmatprep.mubr.bf16.mxu1 %v808_v37  ;;  %v6473_v27 = vld [vmem:[%s9551_s1 + $0x590] ss:$8 sps:$4 sm:$0xff]  }
  0x86   :  { %4462 = vmatprep.subr.bf16.mxu1 %v6397_v29  ;;  %v777_v29 = vcombine.high %v7878_v24, %v7878_v24 }
  0x87   :  { %4422 = vmatpush1.bf16.msra.mxu0 %v6392_v30  ;;  %v6481_v30 = vld [vmem:[%s9551_s1 + $0x584] ss:$8 sps:$4 sm:$0xff]  }
  0x88   :  { %4423 = vmatprep.subr.bf16.mxu0 %v6400_v32  ;;  %v784_v32 = vrot.slane %v7714_v28, %v7421_v48  ;;  %v6482_v28 = vld [vmem:[%s9551_s1 + $0x670] ss:$8 sps:$4 sm:$0xff]  }
  0x89   :  { %4463 = vmatpush1.bf16.msra.mxu1 %v6395_v33  ;;  %v6484_v33 = vld [vmem:[%s9551_s1 + $0x674] ss:$8 sps:$4 sm:$0xff]  }
  0x8a   :  { %4464 = vmatprep.subr.bf16.mxu1 %v6403_v35  ;;  %v805_v35 = vrot.slane %v777_v29, %v7421_v48  ;;  %v806_v37 = vcombine.high %v784_v32, %v784_v32  ;;  %v6565_v29 = vld [vmem:[%s9551_s1 + $0x7a4] ss:$8 sps:$4 sm:$0xff]  }
  0x8b   :  { %4424 = vmatpush1.bf16.msra.mxu0 %v6398_v36  ;;  %v6487_v36 = vld [vmem:[%s9551_s1 + $0x774] ss:$8 sps:$4 sm:$0xff]  }
  0x8c   :  { %4425 = vmatprep.subr.bf16.mxu0 %v6406_v38  ;;  %v6490_v38 = vld [vmem:[%s9551_s1 + $0x664] ss:$8 sps:$4 sm:$0xff]  }
  0x8d   :  { %4465 = vmatpush1.bf16.msra.mxu1 %v6401_v39  ;;  %v6485_v39 = vld [vmem:[%s9551_s1 + $0x770] ss:$8 sps:$4 sm:$0xff]  }
  0x8e   :  { %4466 = vmatprep.subr.bf16.mxu1 %v6409_v40  ;;  %v809_v40 = vcombine.high %v805_v35, %v805_v35 }
  0x8f   :  { %4426 = vmatpush1.bf16.msra.mxu0 %v6404_v41  ;;  %v6493_v41 = vld [vmem:[%s9551_s1 + $0x764] ss:$8 sps:$4 sm:$0xff]  }
  0x90   :  { %4427 = vmatprep.subr.bf16.mxu0 %v6412_v43  ;;  %v6488_v43 = vld [vmem:[%s9551_s1 + $0x660] ss:$8 sps:$4 sm:$0xff]  }
  0x91   :  { %4467 = vmatpush1.bf16.msra.mxu1 %v6407_v44  ;;  %v6496_v44 = vld [vmem:[%s9551_s1 + $0x654] ss:$8 sps:$4 sm:$0xff]  }
  0x92   :  { %4468 = vmatprep.subr.bf16.mxu1 %v6415_v45  ;;  %v6491_v45 = vld [vmem:[%s9551_s1 + $0x760] ss:$8 sps:$4 sm:$0xff]  }
  0x93   :  { %4428 = vmatpush1.bf16.msra.mxu0 %v6410_v46  ;;  %v6499_v46 = vld [vmem:[%s9551_s1 + $0x754] ss:$8 sps:$4 sm:$0xff]  }
  0x94   :  { %4429 = vmatprep.subr.bf16.mxu0 %v6418_v47  ;;  %v6494_v47 = vld [vmem:[%s9551_s1 + $0x650] ss:$8 sps:$4 sm:$0xff]  }
  0x95   :  { %4469 = vmatpush1.bf16.msra.mxu1 %v6413_v49  ;;  %v6502_v49 = vld [vmem:[%s9551_s1 + $0x644] ss:$8 sps:$4 sm:$0xff]  }
  0x96   :  { %4470 = vmatprep.subr.bf16.mxu1 %v6421_v50  ;;  %v6497_v50 = vld [vmem:[%s9551_s1 + $0x750] ss:$8 sps:$4 sm:$0xff]  }
  0x97   :  { %4430 = vmatpush1.bf16.msra.mxu0 %v6416_v51  ;;  %v6505_v51 = vld [vmem:[%s9551_s1 + $0x744] ss:$8 sps:$4 sm:$0xff]  }
  0x98   :  { %4431 = vmatprep.subr.bf16.mxu0 %v6424_v52  ;;  %v6500_v52 = vld [vmem:[%s9551_s1 + $0x640] ss:$8 sps:$4 sm:$0xff]  }
  0x99   :  { %4471 = vmatpush1.bf16.msra.mxu1 %v6419_v53  ;;  %v6508_v53 = vld [vmem:[%s9551_s1 + $0x634] ss:$8 sps:$4 sm:$0xff]  }
  0x9a   :  { %4472 = vmatprep.subr.bf16.mxu1 %v6427_v54  ;;  %v6503_v54 = vld [vmem:[%s9551_s1 + $0x740] ss:$8 sps:$4 sm:$0xff]  }
  0x9b   :  { %4432 = vmatpush1.bf16.msra.mxu0 %v6422_v55  ;;  %v6511_v55 = vld [vmem:[%s9551_s1 + $0x734] ss:$8 sps:$4 sm:$0xff]  }
  0x9c   :  { %4433 = vmatprep.subr.bf16.mxu0 %v6430_v56  ;;  %v6506_v56 = vld [vmem:[%s9551_s1 + $0x630] ss:$8 sps:$4 sm:$0xff]  }
  0x9d   :  { %4473 = vmatpush1.bf16.msra.mxu1 %v6425_v57  ;;  %v6514_v57 = vld [vmem:[%s9551_s1 + $0x624] ss:$8 sps:$4 sm:$0xff]  }
  0x9e   :  { %4474 = vmatprep.subr.bf16.mxu1 %v6433_v58  ;;  %v6509_v58 = vld [vmem:[%s9551_s1 + $0x730] ss:$8 sps:$4 sm:$0xff]  }
  0x9f   :  { %4434 = vmatpush1.bf16.msra.mxu0 %v6428_v59  ;;  %v6517_v59 = vld [vmem:[%s9551_s1 + $0x724] ss:$8 sps:$4 sm:$0xff]  }
  0xa0   :  { %4435 = vmatprep.subr.bf16.mxu0 %v6436_v60  ;;  %v6512_v60 = vld [vmem:[%s9551_s1 + $0x620] ss:$8 sps:$4 sm:$0xff]  }
  0xa1   :  { %4475 = vmatpush1.bf16.msra.mxu1 %v6431_v61  ;;  %v6520_v61 = vld [vmem:[%s9551_s1 + $0x614] ss:$8 sps:$4 sm:$0xff]  }
  0xa2   :  { %4476 = vmatprep.subr.bf16.mxu1 %v6439_v62  ;;  %v6515_v62 = vld [vmem:[%s9551_s1 + $0x720] ss:$8 sps:$4 sm:$0xff]  }
  0xa3   :  { %4436 = vmatpush2.bf16.msra.mxu0 %v6434_v63  ;;  %v6523_v63 = vld [vmem:[%s9551_s1 + $0x714] ss:$8 sps:$4 sm:$0xff]  }
  0xa4   :  { %4437 = vmatprep.subr.bf16.mxu0 %v6442_v0  ;;  %v6518_v0 = vld [vmem:[%s9551_s1 + $0x610] ss:$8 sps:$4 sm:$0xff]  }
  0xa5   :  { %4477 = vmatpush2.bf16.msra.mxu1 %v6437_v1  ;;  %v6526_v1 = vld [vmem:[%s9551_s1 + $0x604] ss:$8 sps:$4 sm:$0xff]  }
  0xa6   :  { %4478 = vmatprep.subr.bf16.mxu1 %v6445_v2  ;;  %v6521_v2 = vld [vmem:[%s9551_s1 + $0x710] ss:$8 sps:$4 sm:$0xff]  }
  0xa7   :  { %4438 = vmatpush2.bf16.msra.mxu0 %v6440_v3  ;;  %v6529_v3 = vld [vmem:[%s9551_s1 + $0x704] ss:$8 sps:$4 sm:$0xff]  }
  0xa8   :  { %4439 = vmatprep.subr.bf16.mxu0 %v6448_v4  ;;  %v6524_v4 = vld [vmem:[%s9551_s1 + $0x600] ss:$8 sps:$4 sm:$0xff]  }
  0xa9   :  { %4479 = vmatpush2.bf16.msra.mxu1 %v6443_v6  ;;  %v6532_v6 = vld [vmem:[%s9551_s1 + $0x6f4] ss:$8 sps:$4 sm:$0xff]  }
  0xaa   :  { %4480 = vmatprep.subr.bf16.mxu1 %v6451_v7  ;;  %v6527_v7 = vld [vmem:[%s9551_s1 + $0x700] ss:$8 sps:$4 sm:$0xff]  }
  0xab   :  { %4440 = vmatpush2.bf16.msra.mxu0 %v6446_v8  ;;  %v6535_v8 = vld [vmem:[%s9551_s1 + $0x7f4] ss:$8 sps:$4 sm:$0xff]  }
  0xac   :  { %4441 = vmatprep.subr.bf16.mxu0 %v6454_v9  ;;  %v6530_v9 = vld [vmem:[%s9551_s1 + $0x6f0] ss:$8 sps:$4 sm:$0xff]  }
  0xad   :  { %4481 = vmatpush2.bf16.msra.mxu1 %v6449_v10  ;;  %v6538_v10 = vld [vmem:[%s9551_s1 + $0x6e4] ss:$8 sps:$4 sm:$0xff]  }
  0xae   :  { %4482 = vmatprep.subr.bf16.mxu1 %v6457_v11  ;;  %v6533_v11 = vld [vmem:[%s9551_s1 + $0x7f0] ss:$8 sps:$4 sm:$0xff]  }
  0xaf   :  { %4442 = vmatpush2.bf16.msra.mxu0 %v6452_v12  ;;  %v6541_v12 = vld [vmem:[%s9551_s1 + $0x7e4] ss:$8 sps:$4 sm:$0xff]  }
  0xb0   :  { %4443 = vmatprep.subr.bf16.mxu0 %v6460_v13  ;;  %v6536_v13 = vld [vmem:[%s9551_s1 + $0x6e0] ss:$8 sps:$4 sm:$0xff]  }
  0xb1   :  { %4483 = vmatpush2.bf16.msra.mxu1 %v6455_v14  ;;  %v6544_v14 = vld [vmem:[%s9551_s1 + $0x6d4] ss:$8 sps:$4 sm:$0xff]  }
  0xb2   :  { %4484 = vmatprep.subr.bf16.mxu1 %v6463_v15  ;;  %v6539_v15 = vld [vmem:[%s9551_s1 + $0x7e0] ss:$8 sps:$4 sm:$0xff]  }
  0xb3   :  { %4444 = vmatpush2.bf16.msra.mxu0 %v6458_v16  ;;  %v6547_v16 = vld [vmem:[%s9551_s1 + $0x7d4] ss:$8 sps:$4 sm:$0xff]  }
  0xb4   :  { %4445 = vmatprep.subr.bf16.mxu0 %v6466_v17  ;;  %v6542_v17 = vld [vmem:[%s9551_s1 + $0x6d0] ss:$8 sps:$4 sm:$0xff]  }
  0xb5   :  { %4485 = vmatpush2.bf16.msra.mxu1 %v6461_v18  ;;  %v6550_v18 = vld [vmem:[%s9551_s1 + $0x6c4] ss:$8 sps:$4 sm:$0xff]  }
  0xb6   :  { %4486 = vmatprep.subr.bf16.mxu1 %v6469_v20  ;;  %v6553_v20 = vld [vmem:[%s9551_s1 + $0x7c4] ss:$8 sps:$4 sm:$0xff]  }
  0xb7   :  { %4446 = vmatpush2.bf16.msra.mxu0 %v6464_v21  ;;  %v6548_v21 = vld [vmem:[%s9551_s1 + $0x6c0] ss:$8 sps:$4 sm:$0xff]  }
  0xb8   :  { %4447 = vmatprep.subr.bf16.mxu0 %v6472_v22  ;;  %v6556_v22 = vld [vmem:[%s9551_s1 + $0x6b4] ss:$8 sps:$4 sm:$0xff]  }
  0xb9   :  { %4487 = vmatpush2.bf16.msra.mxu1 %v6467_v23  ;;  %v6551_v23 = vld [vmem:[%s9551_s1 + $0x7c0] ss:$8 sps:$4 sm:$0xff]  }
  0xba   :  { %4488 = vmatprep.subr.bf16.mxu1 %v6475_v5  ;;  %v6559_v5 = vld [vmem:[%s9551_s1 + $0x7b4] ss:$8 sps:$4 sm:$0xff]  }
  0xbb   :  { %4448 = vmatpush2.bf16.msra.mxu0 %v6470_v25  ;;  %v6554_v25 = vld [vmem:[%s9551_s1 + $0x6b0] ss:$8 sps:$4 sm:$0xff]  }
  0xbc   :  { %4449 = vmatprep.subr.bf16.mxu0 %v6478_v26  ;;  %v6562_v26 = vld [vmem:[%s9551_s1 + $0x6a4] ss:$8 sps:$4 sm:$0xff]  }
  0xbd   :  { %4489 = vmatpush2.bf16.msra.mxu1 %v6473_v27  ;;  %v6557_v27 = vld [vmem:[%s9551_s1 + $0x7b0] ss:$8 sps:$4 sm:$0xff]  }
  0xbe   :  { %4490 = vmatprep.subr.bf16.mxu1 %v6481_v30  ;;  %v8071_v30 = vld [vmem:[%s9550_s0 + $0x10] sm:$0xff] }
  0xbf   :  { %4450 = vmatpush2.bf16.msra.mxu0 %v6476_v31  ;;  %v6560_v31 = vld [vmem:[%s9551_s1 + $0x6a0] ss:$8 sps:$4 sm:$0xff]  }
  0xc0   :  { %4501 = vmatprep.subr.bf16.mxu0 %v6484_v33  ;;  %v6563_v33 = vld [vmem:[%s9551_s1 + $0x7a0] ss:$8 sps:$4 sm:$0xff]  }
  0xc1   :  { %4491 = vmatpush2.bf16.msra.mxu1 %v6479_v34  ;;  %v8084_v34 = vrot.slane %v8071_v30, %v7421_v48 }
  0xc2   :  { %4452 = vmatmul.mubr.bf16.vlgmr.msra.gmra.mxu0 %v784_v32  ;;  %4542 = vmatprep.subr.bf16.mxu1 %v6487_v36  ;;  %v6568_v32 = vld [vmem:[%s9551_s1 + $0x694] ss:$8 sps:$4 sm:$0xff]   ;;  %v6566_v36 = vld [vmem:[%s9551_s1 + $0x690] ss:$8 sps:$4 sm:$0xff]  }
  0xc3   :  { %4502 = vmatpush1.bf16.msra.mxu0 %v6482_v28  ;;  %4533 = vmatprep.mubr.bf16.mxu0 %v805_v35  ;;  %v6571_v35 = vld [vmem:[%s9551_s1 + $0x794] ss:$8 sps:$4 sm:$0xff]   ;;  %v6574_v28 = vld [vmem:[%s9551_s1 + $0x684] ss:$8 sps:$4 sm:$0xff]  }
  0xc4   :  { %4493 = vmatmul.mubr.bf16.vlgmr.msra.gmra.mxu1 %v806_v37  ;;  %4503 = vmatprep.subr.bf16.mxu0 %v6490_v38  ;;  %v6569_v37 = vld [vmem:[%s9551_s1 + $0x790] ss:$8 sps:$4 sm:$0xff]   ;;  %v825_v38 = vcombine.high %v8084_v34, %v8084_v34 }
  0xc5   :  { %4543 = vmatpush1.bf16.msra.mxu1 %v6485_v39  ;;  %4574 = vmatprep.mubr.bf16.mxu1 %v809_v40  ;;  %v6577_v39 = vld [vmem:[%s9551_s1 + $0x784] ss:$8 sps:$4 sm:$0xff]   ;;  %v6572_v40 = vld [vmem:[%s9551_s1 + $0x680] ss:$8 sps:$4 sm:$0xff]  }
  0xc6   :  { %4544 = vmatprep.subr.bf16.mxu1 %v6493_v41  ;;  %v694_v41 = vld [vmem:[%s9552_s2] sm:$0x3] }
  0xc7   :  { %4504 = vmatpush1.bf16.msra.mxu0 %v6488_v43  ;;  %v698_v43 = vsub.s32 0, %v7406_v42 }
  0xc8   :  { %4505 = vmatprep.subr.bf16.mxu0 %v6496_v44  ;;  %v791_v44 = vrot.slane %v7878_v24, %v7421_v48 }
  0xc9   :  { %4545 = vmatpush1.bf16.msra.mxu1 %v6491_v45  ;;  %v6581_v45 = vld [vmem:[%s9551_s1 + $0x874] ss:$8 sps:$4 sm:$0xff]   ;;  %v699_v24 = vrot.slane %v694_v41, %v698_v43  ;;  %v6636_v43 = vld [vmem:[%s9551_s1 + $0x9e0] ss:$8 sps:$4 sm:$0xff]  }
  0xca   :  { %4546 = vmatprep.subr.bf16.mxu1 %v6499_v46  ;;  %v6575_v46 = vld [vmem:[%s9551_s1 + $0x780] ss:$8 sps:$4 sm:$0xff]  }
  0xcb   :  { %4506 = vmatpush1.bf16.msra.mxu0 %v6494_v47  ;;  %v702_v47 = vsub.s32 1, %v7406_v42 }
  0xcc   :  { %4507 = vmatprep.subr.bf16.mxu0 %v6502_v49  ;;  %v847_v49 = vrot.slane %v825_v38, %v7421_v48  ;;  %v6630_v38 = vld [vmem:[%s9551_s1 + $0x9f0] ss:$8 sps:$4 sm:$0xff]  }
  0xcd   :  { %4547 = vmatpush1.bf16.msra.mxu1 %v6497_v50  ;;  %v6584_v50 = vld [vmem:[%s9551_s1 + $0x974] ss:$8 sps:$4 sm:$0xff]   ;;  %v703_v42 = vrot.slane %v694_v41, %v702_v47  ;;  %v6642_v47 = vld [vmem:[%s9551_s1 + $0x9d0] ss:$8 sps:$4 sm:$0xff]  }
  0xce   :  { %4548 = vmatprep.subr.bf16.mxu1 %v6505_v51  ;;  %v6579_v51 = vld [vmem:[%s9551_s1 + $0x870] ss:$8 sps:$4 sm:$0xff]   ;;  %v6641_v41 = vld [vmem:[%s9551_s1 + $0x8d4] ss:$8 sps:$4 sm:$0xff]  }
  0xcf   :  { %4508 = vmatpush1.bf16.msra.mxu0 %v6500_v52  ;;  %v807_v52 = vcombine.high %v791_v44, %v791_v44 }
  0xd0   :  { %4509 = vmatprep.subr.bf16.mxu0 %v6508_v53  ;;  %v6587_v53 = vld [vmem:[%s9551_s1 + $0x864] ss:$8 sps:$4 sm:$0xff]  }
  0xd1   :  { %4549 = vmatpush1.bf16.msra.mxu1 %v6503_v54  ;;  %v6582_v54 = vld [vmem:[%s9551_s1 + $0x970] ss:$8 sps:$4 sm:$0xff]  }
  0xd2   :  { %4550 = vmatprep.subr.bf16.mxu1 %v6511_v55  ;;  %v857_v55 = vcombine.high %v847_v49, %v847_v49 }
  0xd3   :  { %4510 = vmatpush1.bf16.msra.mxu0 %v6506_v56 }
  0xd4   :  { %4511 = vmatprep.subr.bf16.mxu0 %v6514_v57  ;;  %v6590_v57 = vld [vmem:[%s9551_s1 + $0x964] ss:$8 sps:$4 sm:$0xff]  }
  0xd5   :  { %4551 = vmatpush1.bf16.msra.mxu1 %v6509_v58 }
  0xd6   :  { %4552 = vmatprep.subr.bf16.mxu1 %v6517_v59  ;;  %v6585_v59 = vld [vmem:[%s9551_s1 + $0x860] ss:$8 sps:$4 sm:$0xff]  }
  0xd7   :  { %4512 = vmatpush1.bf16.msra.mxu0 %v6512_v60 }
  0xd8   :  { %4513 = vmatprep.subr.bf16.mxu0 %v6520_v61 }
  0xd9   :  { %4553 = vmatpush1.bf16.msra.mxu1 %v6515_v62  ;;  %v6593_v62 = vld [vmem:[%s9551_s1 + $0x854] ss:$8 sps:$4 sm:$0xff]  }
  0xda   :  { %4554 = vmatprep.subr.bf16.mxu1 %v6523_v63 }
  0xdb   :  { %4514 = vmatpush1.bf16.msra.mxu0 %v6518_v0 }
  0xdc   :  { %4515 = vmatprep.subr.bf16.mxu0 %v6526_v1  ;;  %v6588_v1 = vld [vmem:[%s9551_s1 + $0x960] ss:$8 sps:$4 sm:$0xff]  }
  0xdd   :  { %4555 = vmatpush1.bf16.msra.mxu1 %v6521_v2 }
  0xde   :  { %4556 = vmatprep.subr.bf16.mxu1 %v6529_v3 }
  0xdf   :  { %4516 = vmatpush1.bf16.msra.mxu0 %v6524_v4  ;;  %v6596_v4 = vld [vmem:[%s9551_s1 + $0x954] ss:$8 sps:$4 sm:$0xff]  }
  0xe0   :  { %4517 = vmatprep.subr.bf16.mxu0 %v6532_v6 }
  0xe1   :  { %4557 = vmatpush1.bf16.msra.mxu1 %v6527_v7  ;;  %v6591_v7 = vld [vmem:[%s9551_s1 + $0x850] ss:$8 sps:$4 sm:$0xff]  }
  0xe2   :  { %4558 = vmatprep.subr.bf16.mxu1 %v6535_v8 }
  0xe3   :  { %4518 = vmatpush2.bf16.msra.mxu0 %v6530_v9  ;;  %v6599_v9 = vld [vmem:[%s9551_s1 + $0x844] ss:$8 sps:$4 sm:$0xff]  }
  0xe4   :  { %4519 = vmatprep.subr.bf16.mxu0 %v6538_v10 }
  0xe5   :  { %4559 = vmatpush2.bf16.msra.mxu1 %v6533_v11  ;;  %v6594_v11 = vld [vmem:[%s9551_s1 + $0x950] ss:$8 sps:$4 sm:$0xff]  }
  0xe6   :  { %4560 = vmatprep.subr.bf16.mxu1 %v6541_v12  ;;  %v6602_v12 = vld [vmem:[%s9551_s1 + $0x944] ss:$8 sps:$4 sm:$0xff]  }
  0xe7   :  { %4520 = vmatpush2.bf16.msra.mxu0 %v6536_v13 }
  0xe8   :  { %4521 = vmatprep.subr.bf16.mxu0 %v6544_v14  ;;  %v6597_v14 = vld [vmem:[%s9551_s1 + $0x840] ss:$8 sps:$4 sm:$0xff]  }
  0xe9   :  { %4561 = vmatpush2.bf16.msra.mxu1 %v6539_v15  ;;  %v6605_v15 = vld [vmem:[%s9551_s1 + $0x834] ss:$8 sps:$4 sm:$0xff]  }
  0xea   :  { %4562 = vmatprep.subr.bf16.mxu1 %v6547_v16  ;;  %v6600_v16 = vld [vmem:[%s9551_s1 + $0x940] ss:$8 sps:$4 sm:$0xff]  }
  0xeb   :  { %4522 = vmatpush2.bf16.msra.mxu0 %v6542_v17  ;;  %v6608_v17 = vld [vmem:[%s9551_s1 + $0x934] ss:$8 sps:$4 sm:$0xff]  }
  0xec   :  { %4523 = vmatprep.subr.bf16.mxu0 %v6550_v18  ;;  %v6603_v18 = vld [vmem:[%s9551_s1 + $0x830] ss:$8 sps:$4 sm:$0xff]  }
  0xed   :  { %4563 = vmatpush2.bf16.msra.mxu1 %v6545_v19  ;;  %v6611_v19 = vld [vmem:[%s9551_s1 + $0x824] ss:$8 sps:$4 sm:$0xff]  }
  0xee   :  { %4564 = vmatprep.subr.bf16.mxu1 %v6553_v20  ;;  %v6606_v20 = vld [vmem:[%s9551_s1 + $0x930] ss:$8 sps:$4 sm:$0xff]  }
  0xef   :  { %4524 = vmatpush2.bf16.msra.mxu0 %v6548_v21  ;;  %v6614_v21 = vld [vmem:[%s9551_s1 + $0x924] ss:$8 sps:$4 sm:$0xff]  }
  0xf0   :  { %4525 = vmatprep.subr.bf16.mxu0 %v6556_v22  ;;  %v6609_v22 = vld [vmem:[%s9551_s1 + $0x820] ss:$8 sps:$4 sm:$0xff]  }
  0xf1   :  { %4565 = vmatpush2.bf16.msra.mxu1 %v6551_v23  ;;  %v6617_v23 = vld [vmem:[%s9551_s1 + $0x814] ss:$8 sps:$4 sm:$0xff]  }
  0xf2   :  { %4566 = vmatprep.subr.bf16.mxu1 %v6559_v5  ;;  %v6612_v5 = vld [vmem:[%s9551_s1 + $0x920] ss:$8 sps:$4 sm:$0xff]  }
  0xf3   :  { %4526 = vmatpush2.bf16.msra.mxu0 %v6554_v25  ;;  %v6620_v25 = vld [vmem:[%s9551_s1 + $0x914] ss:$8 sps:$4 sm:$0xff]  }
  0xf4   :  { %4527 = vmatprep.subr.bf16.mxu0 %v6562_v26  ;;  %v6615_v26 = vld [vmem:[%s9551_s1 + $0x810] ss:$8 sps:$4 sm:$0xff]  }
  0xf5   :  { %4567 = vmatpush2.bf16.msra.mxu1 %v6557_v27  ;;  %v6623_v27 = vld [vmem:[%s9551_s1 + $0x804] ss:$8 sps:$4 sm:$0xff]  }
  0xf6   :  { %4568 = vmatprep.subr.bf16.mxu1 %v6565_v29  ;;  %v6618_v29 = vld [vmem:[%s9551_s1 + $0x910] ss:$8 sps:$4 sm:$0xff]  }
  0xf7   :  { %4528 = vmatpush2.bf16.msra.mxu0 %v6560_v31  ;;  %v6626_v31 = vld [vmem:[%s9551_s1 + $0x904] ss:$8 sps:$4 sm:$0xff]  }
  0xf8   :  { %4529 = vmatprep.subr.bf16.mxu0 %v6568_v32  ;;  %v6621_v32 = vld [vmem:[%s9551_s1 + $0x800] ss:$8 sps:$4 sm:$0xff]  }
  0xf9   :  { %4569 = vmatpush2.bf16.msra.mxu1 %v6563_v33  ;;  %v6629_v33 = vld [vmem:[%s9551_s1 + $0x8f4] ss:$8 sps:$4 sm:$0xff]  }
  0xfa   :  { %4570 = vmatprep.subr.bf16.mxu1 %v6571_v35  ;;  %v6624_v35 = vld [vmem:[%s9551_s1 + $0x900] ss:$8 sps:$4 sm:$0xff]  }
  0xfb   :  { %4530 = vmatpush2.bf16.msra.mxu0 %v6566_v36  ;;  %v6632_v36 = vld [vmem:[%s9551_s1 + $0x9f4] ss:$8 sps:$4 sm:$0xff]  }
  0xfc   :  { %4531 = vmatprep.subr.bf16.mxu0 %v6574_v28  ;;  %v6627_v28 = vld [vmem:[%s9551_s1 + $0x8f0] ss:$8 sps:$4 sm:$0xff]  }
  0xfd   :  { %4571 = vmatpush2.bf16.msra.mxu1 %v6569_v37  ;;  %v6635_v37 = vld [vmem:[%s9551_s1 + $0x8e4] ss:$8 sps:$4 sm:$0xff]  }
  0xfe   :  { %4572 = vmatprep.subr.bf16.mxu1 %v6577_v39  ;;  %v6638_v39 = vld [vmem:[%s9551_s1 + $0x9e4] ss:$8 sps:$4 sm:$0xff]  }
  0xff   :  { %4532 = vmatpush2.bf16.msra.mxu0 %v6572_v40  ;;  %v6633_v40 = vld [vmem:[%s9551_s1 + $0x8e0] ss:$8 sps:$4 sm:$0xff]  }
 0x100   :  { %4583 = vmatprep.subr.bf16.mxu0 %v6581_v45  ;;  %v6639_v45 = vld [vmem:[%s9551_s1 + $0x8d0] ss:$8 sps:$4 sm:$0xff]  }
 0x101   :  { %4573 = vmatpush2.bf16.msra.mxu1 %v6575_v46  ;;  %v6647_v46 = vld [vmem:[%s9551_s1 + $0x8c4] ss:$8 sps:$4 sm:$0xff]  }
 0x102   :  { %v4289_v56 = vpop.f32.mrf.mxu0  ;;  %4534 = vmatmul.mubr.bf16.vlgmr.msra.gmra.mxu0 %v791_v44  ;;  %4624 = vmatprep.subr.bf16.mxu1 %v6584_v50  ;;  %v6644_v44 = vld [vmem:[%s9551_s1 + $0x9d4] ss:$8 sps:$4 sm:$0xff]   ;;  %v6645_v50 = vld [vmem:[%s9551_s1 + $0x8c0] ss:$8 sps:$4 sm:$0xff]  }
 0x103   :  { %v4290_v58 = vadd.f32 %v4289_v56, %v699_v24  ;;  %4584 = vmatpush1.bf16.msra.mxu0 %v6579_v51  ;;  %4615 = vmatprep.mubr.bf16.mxu0 %v847_v49  ;;  %v6650_v49 = vld [vmem:[%s9551_s1 + $0x9c4] ss:$8 sps:$4 sm:$0xff]   ;;  %v6653_v24 = vld [vmem:[%s9551_s1 + $0x8b4] ss:$8 sps:$4 sm:$0xff]   ;;  %v6648_v51 = vld [vmem:[%s9551_s1 + $0x9c0] ss:$8 sps:$4 sm:$0xff]  }
 0x104   :  { %v4291_v60 = vpop.f32.mrf.mxu0  ;;  %v4330_v61 = vpop.f32.mrf.mxu1  ;;  %4575 = vmatmul.mubr.bf16.vlgmr.msra.gmra.mxu1 %v807_v52  ;;  %4585 = vmatprep.subr.bf16.mxu0 %v6587_v53  ;;  %v6656_v52 = vld [vmem:[%s9551_s1 + $0x9b4] ss:$8 sps:$4 sm:$0xff]   ;;  %v6651_v53 = vld [vmem:[%s9551_s1 + $0x8b0] ss:$8 sps:$4 sm:$0xff]   ;;  %v6662_v56 = vld [vmem:[%s9551_s1 + $0x9a4] ss:$8 sps:$4 sm:$0xff]  }
 0x105   :  { %v4292_v63 = vadd.f32 %v4291_v60, %v703_v42  ;;  %v8141_v0 = vadd.f32 %v4330_v61, %v4290_v58  ;;  %4625 = vmatpush1.bf16.msra.mxu1 %v6582_v54  ;;  %4656 = vmatprep.mubr.bf16.mxu1 %v857_v55  ;;  %v6659_v42 = vld [vmem:[%s9551_s1 + $0x8a4] ss:$8 sps:$4 sm:$0xff]   ;;  %v6654_v54 = vld [vmem:[%s9551_s1 + $0x9b0] ss:$8 sps:$4 sm:$0xff]   ;;  %v810_v55 = vcombine.high %v8071_v30, %v8071_v30  ;;  %v6665_v58 = vld [vmem:[%s9551_s1 + $0x894] ss:$8 sps:$4 sm:$0xff]  }
 0x106   :  { %v4293_v2 = vpop.f32.mrf.mxu0  ;;  %v4332_v3 = vpop.f32.mrf.mxu1  ;;  %4626 = vmatprep.subr.bf16.mxu1 %v6590_v57  ;;  %v6657_v57 = vld [vmem:[%s9551_s1 + $0x8a0] ss:$8 sps:$4 sm:$0xff]   ;;  %v6668_v60 = vld [vmem:[%s9551_s1 + $0x994] ss:$8 sps:$4 sm:$0xff]   ;;  %v6663_v61 = vld [vmem:[%s9551_s1 + $0x890] ss:$8 sps:$4 sm:$0xff]  }
 0x107   :  { %v8149_v6 = vadd.f32 %v4332_v3, %v4292_v63  ;;  %4586 = vmatpush1.bf16.msra.mxu0 %v6585_v59  ;;  %v6660_v30 = vld [vmem:[%s9551_s1 + $0x9a0] ss:$8 sps:$4 sm:$0xff]   ;;  %v8295_v59 = vrot.slane %v810_v55, %v7421_v48  ;;  %v6666_v63 = vld [vmem:[%s9551_s1 + $0x990] ss:$8 sps:$4 sm:$0xff]   ;;  %v6674_v3 = vld [vmem:[%s9551_s1 + $0x984] ss:$8 sps:$4 sm:$0xff]  }
 0x108   :  { %v4294_v8 = vpop.f32.mrf.mxu0  ;;  %4587 = vmatprep.subr.bf16.mxu0 %v6593_v62  ;;  %v4334_v10 = vpop.f32.mrf.mxu1  ;;  %v6671_v62 = vld [vmem:[%s9551_s1 + $0x884] ss:$8 sps:$4 sm:$0xff]   ;;  %v6669_v2 = vld [vmem:[%s9551_s1 + $0x880] ss:$8 sps:$4 sm:$0xff]   ;;  %v6723_v55 = vld [vmem:[%s9551_s1 + $0xaf0] ss:$8 sps:$4 sm:$0xff]  }
 0x109   :  { %4627 = vmatpush1.bf16.msra.mxu1 %v6588_v1  ;;  %v826_v1 = vcombine.high %v8295_v59, %v8295_v59  ;;  %v6677_v8 = vld [vmem:[%s9551_s1 + $0xa74] ss:$8 sps:$4 sm:$0xff]  }
 0x10a   :  { %4628 = vmatprep.subr.bf16.mxu1 %v6596_v4  ;;  %v4335_v13 = vpop.f32.mrf.mxu1  ;;  %v6672_v4 = vld [vmem:[%s9551_s1 + $0x980] ss:$8 sps:$4 sm:$0xff]  }
 0x10b   :  { %4588 = vmatpush1.bf16.msra.mxu0 %v6591_v7  ;;  %v833_v7 = vrot.slane %v8084_v34, %v7421_v48  ;;  %v854_v10 = vrot.slane %v826_v1, %v7421_v48  ;;  %v6678_v34 = vld [vmem:[%s9551_s1 + $0xb70] ss:$8 sps:$4 sm:$0xff]   ;;  %v6683_v13 = vld [vmem:[%s9551_s1 + $0xa64] ss:$8 sps:$4 sm:$0xff]   ;;  %v6740_v1 = vld [vmem:[%s9551_s1 + $0xbd4] ss:$8 sps:$4 sm:$0xff]  }
 0x10c   :  { %4589 = vmatprep.subr.bf16.mxu0 %v6599_v9  ;;  %v6675_v9 = vld [vmem:[%s9551_s1 + $0xa70] ss:$8 sps:$4 sm:$0xff]  }
 0x10d   :  { %4629 = vmatpush1.bf16.msra.mxu1 %v6594_v11  ;;  %v6680_v11 = vld [vmem:[%s9551_s1 + $0xb74] ss:$8 sps:$4 sm:$0xff]  }
 0x10e   :  { %4630 = vmatprep.subr.bf16.mxu1 %v6602_v12  ;;  %v855_v12 = vcombine.high %v833_v7, %v833_v7 }
 0x10f   :  { %4590 = vmatpush1.bf16.msra.mxu0 %v6597_v14  ;;  %v6681_v14 = vld [vmem:[%s9551_s1 + $0xa60] ss:$8 sps:$4 sm:$0xff]  }
 0x110   :  { %4591 = vmatprep.subr.bf16.mxu0 %v6605_v15  ;;  %v858_v15 = vcombine.high %v854_v10, %v854_v10 }
 0x111   :  { %4631 = vmatpush1.bf16.msra.mxu1 %v6600_v16 }
 0x112   :  { %4632 = vmatprep.subr.bf16.mxu1 %v6608_v17  ;;  %v6686_v17 = vld [vmem:[%s9551_s1 + $0xb64] ss:$8 sps:$4 sm:$0xff]  }
 0x113   :  { %4592 = vmatpush1.bf16.msra.mxu0 %v6603_v18 }
 0x114   :  { %4593 = vmatprep.subr.bf16.mxu0 %v6611_v19  ;;  %v6684_v19 = vld [vmem:[%s9551_s1 + $0xb60] ss:$8 sps:$4 sm:$0xff]  }
 0x115   :  { %4633 = vmatpush1.bf16.msra.mxu1 %v6606_v20 }
 0x116   :  { %4634 = vmatprep.subr.bf16.mxu1 %v6614_v21 }
 0x117   :  { %4594 = vmatpush1.bf16.msra.mxu0 %v6609_v22  ;;  %v6689_v22 = vld [vmem:[%s9551_s1 + $0xa54] ss:$8 sps:$4 sm:$0xff]  }
 0x118   :  { %4595 = vmatprep.subr.bf16.mxu0 %v6617_v23 }
 0x119   :  { %4635 = vmatpush1.bf16.msra.mxu1 %v6612_v5 }
 0x11a   :  { %4636 = vmatprep.subr.bf16.mxu1 %v6620_v25 }
 0x11b   :  { %4596 = vmatpush1.bf16.msra.mxu0 %v6615_v26 }
 0x11c   :  { %4597 = vmatprep.subr.bf16.mxu0 %v6623_v27  ;;  %v6692_v27 = vld [vmem:[%s9551_s1 + $0xb54] ss:$8 sps:$4 sm:$0xff]  }
 0x11d   :  { %4637 = vmatpush1.bf16.msra.mxu1 %v6618_v29 }
 0x11e   :  { %4638 = vmatprep.subr.bf16.mxu1 %v6626_v31 }
 0x11f   :  { %4598 = vmatpush1.bf16.msra.mxu0 %v6621_v32  ;;  %v6695_v32 = vld [vmem:[%s9551_s1 + $0xa44] ss:$8 sps:$4 sm:$0xff]  }
 0x120   :  { %4599 = vmatprep.subr.bf16.mxu0 %v6629_v33 }
 0x121   :  { %4639 = vmatpush1.bf16.msra.mxu1 %v6624_v35  ;;  %v6693_v35 = vld [vmem:[%s9551_s1 + $0xa40] ss:$8 sps:$4 sm:$0xff]  }
 0x122   :  { %4640 = vmatprep.subr.bf16.mxu1 %v6632_v36  ;;  %v6698_v36 = vld [vmem:[%s9551_s1 + $0xb44] ss:$8 sps:$4 sm:$0xff]  }
 0x123   :  { %4600 = vmatpush2.bf16.msra.mxu0 %v6627_v28 }
 0x124   :  { %4601 = vmatprep.subr.bf16.mxu0 %v6635_v37  ;;  %v6696_v37 = vld [vmem:[%s9551_s1 + $0xb40] ss:$8 sps:$4 sm:$0xff]  }
 0x125   :  { %4641 = vmatpush2.bf16.msra.mxu1 %v6630_v38  ;;  %v6701_v38 = vld [vmem:[%s9551_s1 + $0xa34] ss:$8 sps:$4 sm:$0xff]  }
 0x126   :  { %4642 = vmatprep.subr.bf16.mxu1 %v6638_v39  ;;  %v6699_v39 = vld [vmem:[%s9551_s1 + $0xa30] ss:$8 sps:$4 sm:$0xff]  }
 0x127   :  { %4602 = vmatpush2.bf16.msra.mxu0 %v6633_v40  ;;  %v6704_v40 = vld [vmem:[%s9551_s1 + $0xb34] ss:$8 sps:$4 sm:$0xff]  }
 0x128   :  { %4603 = vmatprep.subr.bf16.mxu0 %v6641_v41  ;;  %v6702_v41 = vld [vmem:[%s9551_s1 + $0xb30] ss:$8 sps:$4 sm:$0xff]  }
 0x129   :  { %4643 = vmatpush2.bf16.msra.mxu1 %v6636_v43  ;;  %v6707_v43 = vld [vmem:[%s9551_s1 + $0xa24] ss:$8 sps:$4 sm:$0xff]  }
 0x12a   :  { %4644 = vmatprep.subr.bf16.mxu1 %v6644_v44  ;;  %v6705_v44 = vld [vmem:[%s9551_s1 + $0xa20] ss:$8 sps:$4 sm:$0xff]  }
 0x12b   :  { %4604 = vmatpush2.bf16.msra.mxu0 %v6639_v45  ;;  %v6710_v45 = vld [vmem:[%s9551_s1 + $0xb24] ss:$8 sps:$4 sm:$0xff]  }
 0x12c   :  { %4605 = vmatprep.subr.bf16.mxu0 %v6647_v46  ;;  %v6708_v46 = vld [vmem:[%s9551_s1 + $0xb20] ss:$8 sps:$4 sm:$0xff]  }
 0x12d   :  { %4645 = vmatpush2.bf16.msra.mxu1 %v6642_v47  ;;  %v6713_v47 = vld [vmem:[%s9551_s1 + $0xa14] ss:$8 sps:$4 sm:$0xff]  }
 0x12e   :  { %4646 = vmatprep.subr.bf16.mxu1 %v6650_v49  ;;  %v6711_v49 = vld [vmem:[%s9551_s1 + $0xa10] ss:$8 sps:$4 sm:$0xff]  }
 0x12f   :  { %4606 = vmatpush2.bf16.msra.mxu0 %v6645_v50  ;;  %v6716_v50 = vld [vmem:[%s9551_s1 + $0xb14] ss:$8 sps:$4 sm:$0xff]  }
 0x130   :  { %4607 = vmatprep.subr.bf16.mxu0 %v6653_v24  ;;  %v6714_v24 = vld [vmem:[%s9551_s1 + $0xb10] ss:$8 sps:$4 sm:$0xff]  }
 0x131   :  { %4647 = vmatpush2.bf16.msra.mxu1 %v6648_v51  ;;  %v6719_v51 = vld [vmem:[%s9551_s1 + $0xa04] ss:$8 sps:$4 sm:$0xff]  }
 0x132   :  { %4648 = vmatprep.subr.bf16.mxu1 %v6656_v52  ;;  %v6717_v52 = vld [vmem:[%s9551_s1 + $0xa00] ss:$8 sps:$4 sm:$0xff]  }
 0x133   :  { %4608 = vmatpush2.bf16.msra.mxu0 %v6651_v53  ;;  %v6722_v53 = vld [vmem:[%s9551_s1 + $0xb04] ss:$8 sps:$4 sm:$0xff]  }
 0x134   :  { %4609 = vmatprep.subr.bf16.mxu0 %v6659_v42  ;;  %v6720_v42 = vld [vmem:[%s9551_s1 + $0xb00] ss:$8 sps:$4 sm:$0xff]  }
 0x135   :  { %4649 = vmatpush2.bf16.msra.mxu1 %v6654_v54  ;;  %v6725_v54 = vld [vmem:[%s9551_s1 + $0xaf4] ss:$8 sps:$4 sm:$0xff]  }
 0x136   :  { %4650 = vmatprep.subr.bf16.mxu1 %v6662_v56  ;;  %v6728_v56 = vld [vmem:[%s9551_s1 + $0xbf4] ss:$8 sps:$4 sm:$0xff]  }
 0x137   :  { %4610 = vmatpush2.bf16.msra.mxu0 %v6657_v57  ;;  %v6726_v57 = vld [vmem:[%s9551_s1 + $0xbf0] ss:$8 sps:$4 sm:$0xff]  }
 0x138   :  { %4611 = vmatprep.subr.bf16.mxu0 %v6665_v58  ;;  %v6731_v58 = vld [vmem:[%s9551_s1 + $0xae4] ss:$8 sps:$4 sm:$0xff]  }
 0x139   :  { %4651 = vmatpush2.bf16.msra.mxu1 %v6660_v30  ;;  %v6729_v30 = vld [vmem:[%s9551_s1 + $0xae0] ss:$8 sps:$4 sm:$0xff]  }
 0x13a   :  { %4652 = vmatprep.subr.bf16.mxu1 %v6668_v60  ;;  %v6734_v60 = vld [vmem:[%s9551_s1 + $0xbe4] ss:$8 sps:$4 sm:$0xff]  }
 0x13b   :  { %4612 = vmatpush2.bf16.msra.mxu0 %v6663_v61  ;;  %v6732_v61 = vld [vmem:[%s9551_s1 + $0xbe0] ss:$8 sps:$4 sm:$0xff]  }
 0x13c   :  { %4613 = vmatprep.subr.bf16.mxu0 %v6671_v62  ;;  %v6737_v62 = vld [vmem:[%s9551_s1 + $0xad4] ss:$8 sps:$4 sm:$0xff]  }
 0x13d   :  { %4653 = vmatpush2.bf16.msra.mxu1 %v6666_v63  ;;  %v6735_v63 = vld [vmem:[%s9551_s1 + $0xad0] ss:$8 sps:$4 sm:$0xff]  }
 0x13e   :  { %4654 = vmatprep.subr.bf16.mxu1 %v6674_v3  ;;  %v6743_v3 = vld [vmem:[%s9551_s1 + $0xac4] ss:$8 sps:$4 sm:$0xff]  }
 0x13f   :  { %4614 = vmatpush2.bf16.msra.mxu0 %v6669_v2  ;;  %v6738_v2 = vld [vmem:[%s9551_s1 + $0xbd0] ss:$8 sps:$4 sm:$0xff]  }
 0x140   :  { %4665 = vmatprep.subr.bf16.mxu0 %v6677_v8  ;;  %v6744_v8 = vld [vmem:[%s9551_s1 + $0xbc0] ss:$8 sps:$4 sm:$0xff]  }
 0x141   :  { %4655 = vmatpush2.bf16.msra.mxu1 %v6672_v4  ;;  %v6741_v4 = vld [vmem:[%s9551_s1 + $0xac0] ss:$8 sps:$4 sm:$0xff]  }
 0x142   :  { %v4371_v16 = vpop.f32.mrf.mxu0  ;;  %4616 = vmatmul.mubr.bf16.vlgmr.msra.gmra.mxu0 %v833_v7  ;;  %4706 = vmatprep.subr.bf16.mxu1 %v6680_v11  ;;  %v6746_v7 = vld [vmem:[%s9551_s1 + $0xbc4] ss:$8 sps:$4 sm:$0xff]   ;;  %v6752_v11 = vld [vmem:[%s9551_s1 + $0xbb4] ss:$8 sps:$4 sm:$0xff]  }
 0x143   :  { %v4372_v18 = vadd.f32 %v4371_v16, %v8141_v0  ;;  %4666 = vmatpush1.bf16.msra.mxu0 %v6675_v9  ;;  %4697 = vmatprep.mubr.bf16.mxu0 %v854_v10  ;;  %v6687_v0 = vld [vmem:[%s9551_s1 + $0xa50] ss:$8 sps:$4 sm:$0xff]   ;;  %v6749_v9 = vld [vmem:[%s9551_s1 + $0xab4] ss:$8 sps:$4 sm:$0xff]  }
 0x144   :  { %v4373_v20 = vpop.f32.mrf.mxu0  ;;  %v4412_v21 = vpop.f32.mrf.mxu1  ;;  %4657 = vmatmul.mubr.bf16.vlgmr.msra.gmra.mxu1 %v855_v12  ;;  %4667 = vmatprep.subr.bf16.mxu0 %v6683_v13  ;;  %v6747_v10 = vld [vmem:[%s9551_s1 + $0xab0] ss:$8 sps:$4 sm:$0xff]   ;;  %v6755_v12 = vld [vmem:[%s9551_s1 + $0xaa4] ss:$8 sps:$4 sm:$0xff]   ;;  %v6761_v16 = vld [vmem:[%s9551_s1 + $0xa94] ss:$8 sps:$4 sm:$0xff]  }
 0x145   :  { %v4374_v23 = vadd.f32 %v4373_v20, %v8149_v6  ;;  %v8352_v5 = vadd.f32 %v4412_v21, %v4372_v18  ;;  %4707 = vmatpush1.bf16.msra.mxu1 %v6678_v34  ;;  %4738 = vmatprep.mubr.bf16.mxu1 %v858_v15  ;;  %v6690_v6 = vld [vmem:[%s9551_s1 + $0xb50] ss:$8 sps:$4 sm:$0xff]   ;;  %v6758_v13 = vld [vmem:[%s9551_s1 + $0xba4] ss:$8 sps:$4 sm:$0xff]   ;;  %v6753_v15 = vld [vmem:[%s9551_s1 + $0xaa0] ss:$8 sps:$4 sm:$0xff]  }
 0x146   :  { %v4375_v25 = vpop.f32.mrf.mxu0  ;;  %v4414_v26 = vpop.f32.mrf.mxu1  ;;  %4708 = vmatprep.subr.bf16.mxu1 %v6686_v17  ;;  %v6750_v34 = vld [vmem:[%s9551_s1 + $0xbb0] ss:$8 sps:$4 sm:$0xff]   ;;  %v6756_v17 = vld [vmem:[%s9551_s1 + $0xba0] ss:$8 sps:$4 sm:$0xff]   ;;  %v6767_v21 = vld [vmem:[%s9551_s1 + $0xa84] ss:$8 sps:$4 sm:$0xff]  }
 0x147   :  { %v8360_v29 = vadd.f32 %v4414_v26, %v4374_v23  ;;  %4668 = vmatpush1.bf16.msra.mxu0 %v6681_v14  ;;  %v8494_v14 = vld [vmem:[%s9550_s0 + $0x18] sm:$0xff]  ;;  %v6765_v25 = vld [vmem:[%s9551_s1 + $0xa80] ss:$8 sps:$4 sm:$0xff]   ;;  %v840_v26 = vrot.slane %v8295_v59, %v7421_v48 }
 0x148   :  { %v4376_v31 = vpop.f32.mrf.mxu0  ;;  %4669 = vmatprep.subr.bf16.mxu0 %v6689_v22  ;;  %v4416_v33 = vpop.f32.mrf.mxu1  ;;  %v8507_v18 = vrot.slane %v8494_v14, %v7421_v48  ;;  %v6759_v20 = vld [vmem:[%s9551_s1 + $0xa90] ss:$8 sps:$4 sm:$0xff]  }
 0x149   :  { %4709 = vmatpush1.bf16.msra.mxu1 %v6684_v19  ;;  %v6764_v19 = vld [vmem:[%s9551_s1 + $0xb94] ss:$8 sps:$4 sm:$0xff]   ;;  %v6762_v22 = vld [vmem:[%s9551_s1 + $0xb90] ss:$8 sps:$4 sm:$0xff]   ;;  %v856_v33 = vcombine.high %v840_v26, %v840_v26 }
 0x14a   :  { %4710 = vmatprep.subr.bf16.mxu1 %v6692_v27  ;;  %v4417_v28 = vpop.f32.mrf.mxu1  ;;  %v874_v23 = vcombine.high %v8507_v18, %v8507_v18  ;;  %v6774_v27 = vld [vmem:[%s9551_s1 + $0xc74] ss:$8 sps:$4 sm:$0xff]   ;;  %v6772_v59 = vld [vmem:[%s9551_s1 + $0xc70] ss:$8 sps:$4 sm:$0xff]  }
 0x14b   :  { %4670 = vmatpush1.bf16.msra.mxu0 %v6687_v0  ;;  %v6770_v0 = vld [vmem:[%s9551_s1 + $0xb84] ss:$8 sps:$4 sm:$0xff]  }
 0x14c   :  { %4671 = vmatprep.subr.bf16.mxu0 %v6695_v32  ;;  %v896_v31 = vrot.slane %v874_v23, %v7421_v48  ;;  %v6777_v32 = vld [vmem:[%s9551_s1 + $0xd74] ss:$8 sps:$4 sm:$0xff]  }
 0x14d   :  { %4711 = vmatpush1.bf16.msra.mxu1 %v6690_v6  ;;  %v6768_v6 = vld [vmem:[%s9551_s1 + $0xb80] ss:$8 sps:$4 sm:$0xff]  }
 0x14e   :  { %4712 = vmatprep.subr.bf16.mxu1 %v6698_v36  ;;  %v6775_v36 = vld [vmem:[%s9551_s1 + $0xd70] ss:$8 sps:$4 sm:$0xff]   ;;  %v906_v28 = vcombine.high %v896_v31, %v896_v31 }
 0x14f   :  { %4672 = vmatpush1.bf16.msra.mxu0 %v6693_v35  ;;  %v6780_v35 = vld [vmem:[%s9551_s1 + $0xc64] ss:$8 sps:$4 sm:$0xff]  }
 0x150   :  { %4673 = vmatprep.subr.bf16.mxu0 %v6701_v38  ;;  %v6783_v38 = vld [vmem:[%s9551_s1 + $0xd64] ss:$8 sps:$4 sm:$0xff]  }
 0x151   :  { %4713 = vmatpush1.bf16.msra.mxu1 %v6696_v37 }
 0x152   :  { %4714 = vmatprep.subr.bf16.mxu1 %v6704_v40  ;;  %v6778_v40 = vld [vmem:[%s9551_s1 + $0xc60] ss:$8 sps:$4 sm:$0xff]  }
 0x153   :  { %4674 = vmatpush1.bf16.msra.mxu0 %v6699_v39 }
 0x154   :  { %4675 = vmatprep.subr.bf16.mxu0 %v6707_v43 }
 0x155   :  { %4715 = vmatpush1.bf16.msra.mxu1 %v6702_v41 }
 0x156   :  { %4716 = vmatprep.subr.bf16.mxu1 %v6710_v45 }
 0x157   :  { %4676 = vmatpush1.bf16.msra.mxu0 %v6705_v44  ;;  %v6786_v44 = vld [vmem:[%s9551_s1 + $0xc54] ss:$8 sps:$4 sm:$0xff]  }
 0x158   :  { %4677 = vmatprep.subr.bf16.mxu0 %v6713_v47 }
 0x159   :  { %4717 = vmatpush1.bf16.msra.mxu1 %v6708_v46 }
 0x15a   :  { %4718 = vmatprep.subr.bf16.mxu1 %v6716_v50  ;;  %v6789_v50 = vld [vmem:[%s9551_s1 + $0xd54] ss:$8 sps:$4 sm:$0xff]  }
 0x15b   :  { %4678 = vmatpush1.bf16.msra.mxu0 %v6711_v49 }
 0x15c   :  { %4679 = vmatprep.subr.bf16.mxu0 %v6719_v51 }
 0x15d   :  { %4719 = vmatpush1.bf16.msra.mxu1 %v6714_v24 }
 0x15e   :  { %4720 = vmatprep.subr.bf16.mxu1 %v6722_v53 }
 0x15f   :  { %4680 = vmatpush1.bf16.msra.mxu0 %v6717_v52 }
 0x160   :  { %4681 = vmatprep.subr.bf16.mxu0 %v6725_v54 }
 0x161   :  { %4721 = vmatpush1.bf16.msra.mxu1 %v6720_v42 }
 0x162   :  { %4722 = vmatprep.subr.bf16.mxu1 %v6728_v56 }
 0x163   :  { %4682 = vmatpush2.bf16.msra.mxu0 %v6723_v55 }
 0x164   :  { %4683 = vmatprep.subr.bf16.mxu0 %v6731_v58 }
 0x165   :  { %4723 = vmatpush2.bf16.msra.mxu1 %v6726_v57 }
 0x166   :  { %4724 = vmatprep.subr.bf16.mxu1 %v6734_v60 }
 0x167   :  { %4684 = vmatpush2.bf16.msra.mxu0 %v6729_v30 }
 0x168   :  { %4685 = vmatprep.subr.bf16.mxu0 %v6737_v62 }
 0x169   :  { %4725 = vmatpush2.bf16.msra.mxu1 %v6732_v61 }
 0x16a   :  { %4726 = vmatprep.subr.bf16.mxu1 %v6740_v1 }
 0x16b   :  { %4686 = vmatpush2.bf16.msra.mxu0 %v6735_v63 }
 0x16c   :  { %4687 = vmatprep.subr.bf16.mxu0 %v6743_v3 }
 0x16d   :  { %4727 = vmatpush2.bf16.msra.mxu1 %v6738_v2 }
 0x16e   :  { %4728 = vmatprep.subr.bf16.mxu1 %v6746_v7 }
 0x16f   :  { %4688 = vmatpush2.bf16.msra.mxu0 %v6741_v4 }
 0x170   :  { %4689 = vmatprep.subr.bf16.mxu0 %v6749_v9 }
 0x171   :  { %4729 = vmatpush2.bf16.msra.mxu1 %v6744_v8 }
 0x172   :  { %4730 = vmatprep.subr.bf16.mxu1 %v6752_v11 }
 0x173   :  { %4690 = vmatpush2.bf16.msra.mxu0 %v6747_v10 }
 0x174   :  { %4691 = vmatprep.subr.bf16.mxu0 %v6755_v12 }
 0x175   :  { %4731 = vmatpush2.bf16.msra.mxu1 %v6750_v34 }
 0x176   :  { %4732 = vmatprep.subr.bf16.mxu1 %v6758_v13 }
 0x177   :  { %4692 = vmatpush2.bf16.msra.mxu0 %v6753_v15 }
 0x178   :  { %4693 = vmatprep.subr.bf16.mxu0 %v6761_v16 }
 0x179   :  { %4733 = vmatpush2.bf16.msra.mxu1 %v6756_v17 }
 0x17a   :  { %4734 = vmatprep.subr.bf16.mxu1 %v6764_v19 }
 0x17b   :  { %4694 = vmatpush2.bf16.msra.mxu0 %v6759_v20 }
 0x17c   :  { %4695 = vmatprep.subr.bf16.mxu0 %v6767_v21 }
 0x17d   :  { %4735 = vmatpush2.bf16.msra.mxu1 %v6762_v22 }
 0x17e   :  { %4736 = vmatprep.subr.bf16.mxu1 %v6770_v0 }
 0x17f   :  { %4696 = vmatpush2.bf16.msra.mxu0 %v6765_v25 }
 0x180   :  { %4747 = vmatprep.subr.bf16.mxu0 %v6774_v27 }
 0x181   :  { %4737 = vmatpush2.bf16.msra.mxu1 %v6768_v6 }
 0x182   :  { %v4453_v37 = vpop.f32.mrf.mxu0  ;;  %4698 = vmatmul.mubr.bf16.vlgmr.msra.gmra.mxu0 %v840_v26  ;;  %4788 = vmatprep.subr.bf16.mxu1 %v6777_v32 }
 0x183   :  { %v4454_v39 = vadd.f32 %v4453_v37, %v8352_v5  ;;  %4748 = vmatpush1.bf16.msra.mxu0 %v6772_v59  ;;  %4779 = vmatprep.mubr.bf16.mxu0 %v896_v31  ;;  %v6781_v5 = vld [vmem:[%s9551_s1 + $0xd60] ss:$8 sps:$4 sm:$0xff]  }
 0x184   :  { %v4455_v41 = vpop.f32.mrf.mxu0  ;;  %v4494_v43 = vpop.f32.mrf.mxu1  ;;  %4739 = vmatmul.mubr.bf16.vlgmr.msra.gmra.mxu1 %v856_v33  ;;  %4749 = vmatprep.subr.bf16.mxu0 %v6780_v35 }
 0x185   :  { %v4456_v45 = vadd.f32 %v4455_v41, %v8360_v29  ;;  %v8561_v46 = vadd.f32 %v4494_v43, %v4454_v39  ;;  %4789 = vmatpush1.bf16.msra.mxu1 %v6775_v36  ;;  %4820 = vmatprep.mubr.bf16.mxu1 %v906_v28 }
 0x186   :  { %v4457_v47 = vpop.f32.mrf.mxu0  ;;  %v4496_v49 = vpop.f32.mrf.mxu1  ;;  %4790 = vmatprep.subr.bf16.mxu1 %v6783_v38 }
 0x187   :  { %18 = vsyncpa [#allocation5], 0  ;;  %v8569_v24 = vadd.f32 %v4496_v49, %v4456_v45  ;;  %4750 = vmatpush1.bf16.msra.mxu0 %v6778_v40  ;;  %v6784_v29 = vld [vmem:[%s9551_s1 + $0xc50] ss:$8 sps:$4 sm:$0xff]   ;;  %v6792_v52 = vld [vmem:[%s9551_s1 + $0xc44] ss:$8 sps:$4 sm:$0xff]   ;;  %v859_v28 = vcombine.high %v8494_v14, %v8494_v14 }
 0x188   :  { %v4458_v51 = vpop.f32.mrf.mxu0  ;;  %4751 = vmatprep.subr.bf16.mxu0 %v6786_v44  ;;  %v4498_v53 = vpop.f32.mrf.mxu1  ;;  %v6787_v42 = vld [vmem:[%s9551_s1 + $0xd50] ss:$8 sps:$4 sm:$0xff]   ;;  %v6795_v54 = vld [vmem:[%s9551_s1 + $0xd44] ss:$8 sps:$4 sm:$0xff]   ;;  %v6790_v56 = vld [vmem:[%s9551_s1 + $0xc40] ss:$8 sps:$4 sm:$0xff]  }
 0x189   :  { %4791 = vmatpush1.bf16.msra.mxu1 %v6781_v5  ;;  %v6798_v57 = vld [vmem:[%s9551_s1 + $0xc34] ss:$8 sps:$4 sm:$0xff]   ;;  %v6793_v58 = vld [vmem:[%s9551_s1 + $0xd40] ss:$8 sps:$4 sm:$0xff]   ;;  %v6796_v60 = vld [vmem:[%s9551_s1 + $0xc30] ss:$8 sps:$4 sm:$0xff]   ;;  %v8715_v40 = vrot.slane %v859_v28, %v7421_v48 }
 0x18a   :  { %4792 = vmatprep.subr.bf16.mxu1 %v6789_v50  ;;  %v4499_v55 = vpop.f32.mrf.mxu1  ;;  %v6801_v30 = vld [vmem:[%s9551_s1 + $0xd34] ss:$8 sps:$4 sm:$0xff]   ;;  %v6804_v61 = vld [vmem:[%s9551_s1 + $0xc24] ss:$8 sps:$4 sm:$0xff]   ;;  %v6799_v62 = vld [vmem:[%s9551_s1 + $0xd30] ss:$8 sps:$4 sm:$0xff]   ;;  %v882_v50 = vrot.slane %v8507_v18, %v7421_v48 }
 0x18b   :  { %4752 = vmatpush1.bf16.msra.mxu0 %v6784_v29  ;;  %v6807_v63 = vld [vmem:[%s9551_s1 + $0xd24] ss:$8 sps:$4 sm:$0xff]   ;;  %v6802_v1 = vld [vmem:[%s9551_s1 + $0xc20] ss:$8 sps:$4 sm:$0xff]   ;;  %v6810_v2 = vld [vmem:[%s9551_s1 + $0xc14] ss:$8 sps:$4 sm:$0xff]   ;;  %v875_v5 = vcombine.high %v8715_v40, %v8715_v40 }
 0x18c   :  { %4753 = vmatprep.subr.bf16.mxu0 %v6792_v52  ;;  %v6805_v3 = vld [vmem:[%s9551_s1 + $0xd20] ss:$8 sps:$4 sm:$0xff]   ;;  %v6813_v4 = vld [vmem:[%s9551_s1 + $0xd14] ss:$8 sps:$4 sm:$0xff]   ;;  %v6808_v7 = vld [vmem:[%s9551_s1 + $0xc10] ss:$8 sps:$4 sm:$0xff]  }
 0x18d   :  { %4793 = vmatpush1.bf16.msra.mxu1 %v6787_v42  ;;  %v6816_v8 = vld [vmem:[%s9551_s1 + $0xc04] ss:$8 sps:$4 sm:$0xff]   ;;  %v6811_v9 = vld [vmem:[%s9551_s1 + $0xd10] ss:$8 sps:$4 sm:$0xff]   ;;  %v6814_v11 = vld [vmem:[%s9551_s1 + $0xc00] ss:$8 sps:$4 sm:$0xff]   ;;  %v903_v52 = vrot.slane %v875_v5, %v7421_v48  ;;  %v904_v42 = vcombine.high %v882_v50, %v882_v50 }
 0x18e   :  { %4794 = vmatprep.subr.bf16.mxu1 %v6795_v54  ;;  %v6819_v10 = vld [vmem:[%s9551_s1 + $0xd04] ss:$8 sps:$4 sm:$0xff]   ;;  %v6822_v34 = vld [vmem:[%s9551_s1 + $0xcf4] ss:$8 sps:$4 sm:$0xff]   ;;  %v6817_v12 = vld [vmem:[%s9551_s1 + $0xd00] ss:$8 sps:$4 sm:$0xff]  }
 0x18f   :  { %4754 = vmatpush1.bf16.msra.mxu0 %v6790_v56  ;;  %v6825_v13 = vld [vmem:[%s9551_s1 + $0xdf4] ss:$8 sps:$4 sm:$0xff]   ;;  %v6820_v15 = vld [vmem:[%s9551_s1 + $0xcf0] ss:$8 sps:$4 sm:$0xff]   ;;  %v6828_v16 = vld [vmem:[%s9551_s1 + $0xce4] ss:$8 sps:$4 sm:$0xff]   ;;  %v907_v56 = vcombine.high %v903_v52, %v903_v52 }
 0x190   :  { %4755 = vmatprep.subr.bf16.mxu0 %v6798_v57  ;;  %v6823_v17 = vld [vmem:[%s9551_s1 + $0xdf0] ss:$8 sps:$4 sm:$0xff]   ;;  %v6831_v19 = vld [vmem:[%s9551_s1 + $0xde4] ss:$8 sps:$4 sm:$0xff]   ;;  %v6826_v20 = vld [vmem:[%s9551_s1 + $0xce0] ss:$8 sps:$4 sm:$0xff]  }
 0x191   :  { %4795 = vmatpush1.bf16.msra.mxu1 %v6793_v58  ;;  %v6834_v21 = vld [vmem:[%s9551_s1 + $0xcd4] ss:$8 sps:$4 sm:$0xff]   ;;  %v6829_v22 = vld [vmem:[%s9551_s1 + $0xde0] ss:$8 sps:$4 sm:$0xff]   ;;  %v6832_v0 = vld [vmem:[%s9551_s1 + $0xcd0] ss:$8 sps:$4 sm:$0xff]  }
 0x192   :  { %4796 = vmatprep.subr.bf16.mxu1 %v6801_v30  ;;  %v6837_v23 = vld [vmem:[%s9551_s1 + $0xdd4] ss:$8 sps:$4 sm:$0xff]   ;;  %v6840_v25 = vld [vmem:[%s9551_s1 + $0xcc4] ss:$8 sps:$4 sm:$0xff]   ;;  %v6835_v26 = vld [vmem:[%s9551_s1 + $0xdd0] ss:$8 sps:$4 sm:$0xff]  }
 0x193   :  { %4756 = vmatpush1.bf16.msra.mxu0 %v6796_v60  ;;  %v6843_v27 = vld [vmem:[%s9551_s1 + $0xdc4] ss:$8 sps:$4 sm:$0xff]   ;;  %v6838_v6 = vld [vmem:[%s9551_s1 + $0xcc0] ss:$8 sps:$4 sm:$0xff]   ;;  %v6846_v31 = vld [vmem:[%s9551_s1 + $0xcb4] ss:$8 sps:$4 sm:$0xff]  }
 0x194   :  { %4757 = vmatprep.subr.bf16.mxu0 %v6804_v61  ;;  %v6841_v32 = vld [vmem:[%s9551_s1 + $0xdc0] ss:$8 sps:$4 sm:$0xff]   ;;  %v6849_v59 = vld [vmem:[%s9551_s1 + $0xdb4] ss:$8 sps:$4 sm:$0xff]   ;;  %v6844_v33 = vld [vmem:[%s9551_s1 + $0xcb0] ss:$8 sps:$4 sm:$0xff]  }
 0x195   :  { %4797 = vmatpush1.bf16.msra.mxu1 %v6799_v62  ;;  %v6852_v35 = vld [vmem:[%s9551_s1 + $0xca4] ss:$8 sps:$4 sm:$0xff]   ;;  %v6847_v36 = vld [vmem:[%s9551_s1 + $0xdb0] ss:$8 sps:$4 sm:$0xff]   ;;  %v6850_v38 = vld [vmem:[%s9551_s1 + $0xca0] ss:$8 sps:$4 sm:$0xff]  }
 0x196   :  { %4798 = vmatprep.subr.bf16.mxu1 %v6807_v63  ;;  %v6855_v37 = vld [vmem:[%s9551_s1 + $0xda4] ss:$8 sps:$4 sm:$0xff]   ;;  %v6858_v39 = vld [vmem:[%s9551_s1 + $0xc94] ss:$8 sps:$4 sm:$0xff]   ;;  %v6853_v14 = vld [vmem:[%s9551_s1 + $0xda0] ss:$8 sps:$4 sm:$0xff]  }
 0x197   :  { %4758 = vmatpush1.bf16.msra.mxu0 %v6802_v1  ;;  %v6861_v41 = vld [vmem:[%s9551_s1 + $0xd94] ss:$8 sps:$4 sm:$0xff]   ;;  %v6856_v43 = vld [vmem:[%s9551_s1 + $0xc90] ss:$8 sps:$4 sm:$0xff]   ;;  %v6864_v44 = vld [vmem:[%s9551_s1 + $0xc84] ss:$8 sps:$4 sm:$0xff]  }
 0x198   :  { %4759 = vmatprep.subr.bf16.mxu0 %v6810_v2  ;;  %v6859_v45 = vld [vmem:[%s9551_s1 + $0xd90] ss:$8 sps:$4 sm:$0xff]   ;;  %v6867_v47 = vld [vmem:[%s9551_s1 + $0xd84] ss:$8 sps:$4 sm:$0xff]   ;;  %v6862_v49 = vld [vmem:[%s9551_s1 + $0xc80] ss:$8 sps:$4 sm:$0xff]  }
 0x199   :  { %4799 = vmatpush1.bf16.msra.mxu1 %v6805_v3  ;;  %v6870_v29 = vld [vmem:[%s9551_s1 + $0xe74] ss:$8 sps:$4 sm:$0xff]   ;;  %v6865_v51 = vld [vmem:[%s9551_s1 + $0xd80] ss:$8 sps:$4 sm:$0xff]   ;;  %v6868_v18 = vld [vmem:[%s9551_s1 + $0xe70] ss:$8 sps:$4 sm:$0xff]  }
 0x19a   :  { %4800 = vmatprep.subr.bf16.mxu1 %v6813_v4  ;;  %v6873_v53 = vld [vmem:[%s9551_s1 + $0xf74] ss:$8 sps:$4 sm:$0xff]   ;;  %v6876_v54 = vld [vmem:[%s9551_s1 + $0xe64] ss:$8 sps:$4 sm:$0xff]   ;;  %v6871_v55 = vld [vmem:[%s9551_s1 + $0xf70] ss:$8 sps:$4 sm:$0xff]  }
 0x19b   :  { %4760 = vmatpush1.bf16.msra.mxu0 %v6808_v7  ;;  %v6879_v58 = vld [vmem:[%s9551_s1 + $0xf64] ss:$8 sps:$4 sm:$0xff]   ;;  %v6874_v60 = vld [vmem:[%s9551_s1 + $0xe60] ss:$8 sps:$4 sm:$0xff]   ;;  %v6882_v63 = vld [vmem:[%s9551_s1 + $0xe54] ss:$8 sps:$4 sm:$0xff]  }
 0x19c   :  { %4761 = vmatprep.subr.bf16.mxu0 %v6816_v8  ;;  %v6885_v7 = vld [vmem:[%s9551_s1 + $0xf54] ss:$8 sps:$4 sm:$0xff]   ;;  %v6928_v5 = vld [vmem:[%s9551_s1 + $0xed0] ss:$8 sps:$4 sm:$0xff]   ;;  %vm4251_vm0 = vcmask 523264   ;;  %vm7223_vm1 = vmmov 0  }
 0x19d   :  { %4801 = vmatpush1.bf16.msra.mxu1 %v6811_v9  ;;  %v6921_v28 = vld [vmem:[%s9551_s1 + $0xff4] ss:$8 sps:$4 sm:$0xff]   ;;  %vm5239_vm2 = vcmask 261120   ;;  %s7224_s19 = smov 64   ;;  %s7226_s25 = smov 32   ;;  %vm5429_vm3 = vcmask 254976  }
 0x19e   :  { %4802 = vmatprep.subr.bf16.mxu1 %v6819_v10  ;;  %v6888_v10 = vld [vmem:[%s9551_s1 + $0xe44] ss:$8 sps:$4 sm:$0xff]  }
 0x19f   :  { %4762 = vmatpush1.bf16.msra.mxu0 %v6814_v11 }
 0x1a0   :  { %4763 = vmatprep.subr.bf16.mxu0 %v6822_v34  ;;  %v6883_v34 = vld [vmem:[%s9551_s1 + $0xf50] ss:$8 sps:$4 sm:$0xff]  }
 0x1a1   :  { %4803 = vmatpush1.bf16.msra.mxu1 %v6817_v12  ;;  %v6891_v12 = vld [vmem:[%s9551_s1 + $0xf44] ss:$8 sps:$4 sm:$0xff]  }
 0x1a2   :  { %4804 = vmatprep.subr.bf16.mxu1 %v6825_v13 }
 0x1a3   :  { %4764 = vmatpush2.bf16.msra.mxu0 %v6820_v15  ;;  %v6886_v15 = vld [vmem:[%s9551_s1 + $0xe40] ss:$8 sps:$4 sm:$0xff]  }
 0x1a4   :  { %4765 = vmatprep.subr.bf16.mxu0 %v6828_v16  ;;  %v6894_v16 = vld [vmem:[%s9551_s1 + $0xe34] ss:$8 sps:$4 sm:$0xff]  }
 0x1a5   :  { %4805 = vmatpush2.bf16.msra.mxu1 %v6823_v17  ;;  %v6889_v17 = vld [vmem:[%s9551_s1 + $0xf40] ss:$8 sps:$4 sm:$0xff]  }
 0x1a6   :  { %4806 = vmatprep.subr.bf16.mxu1 %v6831_v19  ;;  %v6897_v19 = vld [vmem:[%s9551_s1 + $0xf34] ss:$8 sps:$4 sm:$0xff]  }
 0x1a7   :  { %4766 = vmatpush2.bf16.msra.mxu0 %v6826_v20  ;;  %v6892_v20 = vld [vmem:[%s9551_s1 + $0xe30] ss:$8 sps:$4 sm:$0xff]  }
 0x1a8   :  { %4767 = vmatprep.subr.bf16.mxu0 %v6834_v21  ;;  %v6900_v21 = vld [vmem:[%s9551_s1 + $0xe24] ss:$8 sps:$4 sm:$0xff]  }
 0x1a9   :  { %4807 = vmatpush2.bf16.msra.mxu1 %v6829_v22  ;;  %v6895_v22 = vld [vmem:[%s9551_s1 + $0xf30] ss:$8 sps:$4 sm:$0xff]  }
 0x1aa   :  { %4808 = vmatprep.subr.bf16.mxu1 %v6837_v23  ;;  %v6903_v23 = vld [vmem:[%s9551_s1 + $0xf24] ss:$8 sps:$4 sm:$0xff]  }
 0x1ab   :  { %4768 = vmatpush2.bf16.msra.mxu0 %v6832_v0  ;;  %v6898_v0 = vld [vmem:[%s9551_s1 + $0xe20] ss:$8 sps:$4 sm:$0xff]  }
 0x1ac   :  { %4769 = vmatprep.subr.bf16.mxu0 %v6840_v25  ;;  %v6906_v25 = vld [vmem:[%s9551_s1 + $0xe14] ss:$8 sps:$4 sm:$0xff]  }
 0x1ad   :  { %4809 = vmatpush2.bf16.msra.mxu1 %v6835_v26  ;;  %v6901_v26 = vld [vmem:[%s9551_s1 + $0xf20] ss:$8 sps:$4 sm:$0xff]  }
 0x1ae   :  { %4810 = vmatprep.subr.bf16.mxu1 %v6843_v27  ;;  %v6909_v27 = vld [vmem:[%s9551_s1 + $0xf14] ss:$8 sps:$4 sm:$0xff]  }
 0x1af   :  { %4770 = vmatpush2.bf16.msra.mxu0 %v6838_v6  ;;  %v6904_v6 = vld [vmem:[%s9551_s1 + $0xe10] ss:$8 sps:$4 sm:$0xff]  }
 0x1b0   :  { %4771 = vmatprep.subr.bf16.mxu0 %v6846_v31  ;;  %v6912_v31 = vld [vmem:[%s9551_s1 + $0xe04] ss:$8 sps:$4 sm:$0xff]  }
 0x1b1   :  { %4811 = vmatpush2.bf16.msra.mxu1 %v6841_v32  ;;  %v6907_v32 = vld [vmem:[%s9551_s1 + $0xf10] ss:$8 sps:$4 sm:$0xff]  }
 0x1b2   :  { %4812 = vmatprep.subr.bf16.mxu1 %v6849_v59  ;;  %v6915_v59 = vld [vmem:[%s9551_s1 + $0xf04] ss:$8 sps:$4 sm:$0xff]  }
 0x1b3   :  { %4772 = vmatpush2.bf16.msra.mxu0 %v6844_v33  ;;  %v6910_v33 = vld [vmem:[%s9551_s1 + $0xe00] ss:$8 sps:$4 sm:$0xff]  }
 0x1b4   :  { %4773 = vmatprep.subr.bf16.mxu0 %v6852_v35  ;;  %v6918_v35 = vld [vmem:[%s9551_s1 + $0xef4] ss:$8 sps:$4 sm:$0xff]  }
 0x1b5   :  { %4813 = vmatpush2.bf16.msra.mxu1 %v6847_v36  ;;  %v6913_v36 = vld [vmem:[%s9551_s1 + $0xf00] ss:$8 sps:$4 sm:$0xff]  }
 0x1b6   :  { %4814 = vmatprep.subr.bf16.mxu1 %v6855_v37  ;;  %v6916_v37 = vld [vmem:[%s9551_s1 + $0xef0] ss:$8 sps:$4 sm:$0xff]  }
 0x1b7   :  { %4774 = vmatpush2.bf16.msra.mxu0 %v6850_v38  ;;  %v6924_v38 = vld [vmem:[%s9551_s1 + $0xee4] ss:$8 sps:$4 sm:$0xff]  }
 0x1b8   :  { %4775 = vmatprep.subr.bf16.mxu0 %v6858_v39  ;;  %v6919_v39 = vld [vmem:[%s9551_s1 + $0xff0] ss:$8 sps:$4 sm:$0xff]  }
 0x1b9   :  { %4815 = vmatpush2.bf16.msra.mxu1 %v6853_v14  ;;  %v6927_v14 = vld [vmem:[%s9551_s1 + $0xfe4] ss:$8 sps:$4 sm:$0xff]  }
 0x1ba   :  { %4816 = vmatprep.subr.bf16.mxu1 %v6861_v41  ;;  %v6922_v41 = vld [vmem:[%s9551_s1 + $0xee0] ss:$8 sps:$4 sm:$0xff]  }
 0x1bb   :  { %4776 = vmatpush2.bf16.msra.mxu0 %v6856_v43  ;;  %v6930_v43 = vld [vmem:[%s9551_s1 + $0xed4] ss:$8 sps:$4 sm:$0xff]  }
 0x1bc   :  { %4777 = vmatprep.subr.bf16.mxu0 %v6864_v44  ;;  %v6925_v44 = vld [vmem:[%s9551_s1 + $0xfe0] ss:$8 sps:$4 sm:$0xff]  }
 0x1bd   :  { %4817 = vmatpush2.bf16.msra.mxu1 %v6859_v45  ;;  %v6933_v45 = vld [vmem:[%s9551_s1 + $0xfd4] ss:$8 sps:$4 sm:$0xff]  }
 0x1be   :  { %4818 = vmatprep.subr.bf16.mxu1 %v6867_v47  ;;  %v6936_v47 = vld [vmem:[%s9551_s1 + $0xec4] ss:$8 sps:$4 sm:$0xff]  }
 0x1bf   :  { %4778 = vmatpush2.bf16.msra.mxu0 %v6862_v49  ;;  %v6931_v49 = vld [vmem:[%s9551_s1 + $0xfd0] ss:$8 sps:$4 sm:$0xff]  }
 0x1c0   :  { %4829 = vmatprep.subr.bf16.mxu0 %v6870_v29  ;;  %v6934_v29 = vld [vmem:[%s9551_s1 + $0xec0] ss:$8 sps:$4 sm:$0xff]  }
 0x1c1   :  { %4819 = vmatpush2.bf16.msra.mxu1 %v6865_v51  ;;  %v6942_v51 = vld [vmem:[%s9551_s1 + $0xeb4] ss:$8 sps:$4 sm:$0xff]  }
 0x1c2   :  { %v4535_v57 = vpop.f32.mrf.mxu0  ;;  %4780 = vmatmul.mubr.bf16.vlgmr.msra.gmra.mxu0 %v882_v50  ;;  %4870 = vmatprep.subr.bf16.mxu1 %v6873_v53  ;;  %v6939_v50 = vld [vmem:[%s9551_s1 + $0xfc4] ss:$8 sps:$4 sm:$0xff]   ;;  %v6945_v53 = vld [vmem:[%s9551_s1 + $0xfb4] ss:$8 sps:$4 sm:$0xff]  }
 0x1c3   :  { %v4536_v30 = vadd.f32 %v4535_v57, %v8561_v46  ;;  %4830 = vmatpush1.bf16.msra.mxu0 %v6868_v18  ;;  %4861 = vmatprep.mubr.bf16.mxu0 %v903_v52  ;;  %v6877_v46 = vld [vmem:[%s9551_s1 + $0xf60] ss:$8 sps:$4 sm:$0xff]   ;;  %v6940_v18 = vld [vmem:[%s9551_s1 + $0xeb0] ss:$8 sps:$4 sm:$0xff]  }
 0x1c4   :  { %v4537_v61 = vpop.f32.mrf.mxu0  ;;  %v4576_v62 = vpop.f32.mrf.mxu1  ;;  %4821 = vmatmul.mubr.bf16.vlgmr.msra.gmra.mxu1 %v904_v42  ;;  %4831 = vmatprep.subr.bf16.mxu0 %v6876_v54  ;;  %v6937_v52 = vld [vmem:[%s9551_s1 + $0xfc0] ss:$8 sps:$4 sm:$0xff]   ;;  %v6948_v42 = vld [vmem:[%s9551_s1 + $0xea4] ss:$8 sps:$4 sm:$0xff]   ;;  %v6943_v54 = vld [vmem:[%s9551_s1 + $0xfb0] ss:$8 sps:$4 sm:$0xff]  }
 0x1c5   :  { %v4538_v1 = vadd.f32 %v4537_v61, %v8569_v24  ;;  %v8769_v2 = vadd.f32 %v4576_v62, %v4536_v30  ;;  %4871 = vmatpush1.bf16.msra.mxu1 %v6871_v55  ;;  %4902 = vmatprep.mubr.bf16.mxu1 %v907_v56  ;;  %v6880_v24 = vld [vmem:[%s9551_s1 + $0xe50] ss:$8 sps:$4 sm:$0xff]   ;;  %v6951_v55 = vld [vmem:[%s9551_s1 + $0xfa4] ss:$8 sps:$4 sm:$0xff]   ;;  %v6946_v57 = vld [vmem:[%s9551_s1 + $0xea0] ss:$8 sps:$4 sm:$0xff]  }
 0x1c6   :  { %v4539_v3 = vpop.f32.mrf.mxu0  ;;  %v4578_v4 = vpop.f32.mrf.mxu1  ;;  %4872 = vmatprep.subr.bf16.mxu1 %v6879_v58  ;;  %v8914_v56 = vld [vmem:[%s9550_s0 + $0x20] sm:$0xff]  ;;  %v6954_v58 = vld [vmem:[%s9551_s1 + $0xe94] ss:$8 sps:$4 sm:$0xff]   ;;  %v6952_v62 = vld [vmem:[%s9551_s1 + $0xe90] ss:$8 sps:$4 sm:$0xff]  }
 0x1c7   :  { %v8777_v8 = vadd.f32 %v4578_v4, %v4538_v1  ;;  %4832 = vmatpush1.bf16.msra.mxu0 %v6874_v60  ;;  %v6949_v30 = vld [vmem:[%s9551_s1 + $0xfa0] ss:$8 sps:$4 sm:$0xff]   ;;  %v8927_v60 = vrot.slane %v8914_v56, %v7421_v48  ;;  %v6957_v61 = vld [vmem:[%s9551_s1 + $0xf94] ss:$8 sps:$4 sm:$0xff]   ;;  %v6955_v1 = vld [vmem:[%s9551_s1 + $0xf90] ss:$8 sps:$4 sm:$0xff]  }
 0x1c8   :  { %v4540_v9 = vpop.f32.mrf.mxu0  ;;  %4833 = vmatprep.subr.bf16.mxu0 %v6882_v63  ;;  %v4580_v11 = vpop.f32.mrf.mxu1  ;;  %v6960_v63 = vld [vmem:[%s9551_s1 + $0xe84] ss:$8 sps:$4 sm:$0xff]   ;;  %v6958_v4 = vld [vmem:[%s9551_s1 + $0xe80] ss:$8 sps:$4 sm:$0xff]  }
 0x1c9   :  { %4873 = vmatpush1.bf16.msra.mxu1 %v6877_v46  ;;  %v923_v46 = vcombine.high %v8927_v60, %v8927_v60  ;;  %v6963_v3 = vld [vmem:[%s9551_s1 + $0xf84] ss:$8 sps:$4 sm:$0xff]   ;;  %v6961_v9 = vld [vmem:[%s9551_s1 + $0xf80] ss:$8 sps:$4 sm:$0xff]   ;;  %v6970_v11 = vld [vmem:[%s9551_s1 + $0x1174] ss:$8 sps:$4 sm:$0xff]  }
 0x1ca   :  { %4874 = vmatprep.subr.bf16.mxu1 %v6885_v7  ;;  %v4581_v13 = vpop.f32.mrf.mxu1  ;;  %v889_v7 = vrot.slane %v8715_v40, %v7421_v48  ;;  %v6965_v40 = vld [vmem:[%s9551_s1 + $0x1070] ss:$8 sps:$4 sm:$0xff]  }
 0x1cb   :  { %4834 = vmatpush1.bf16.msra.mxu0 %v6880_v24  ;;  %v6967_v24 = vld [vmem:[%s9551_s1 + $0x1074] ss:$8 sps:$4 sm:$0xff]   ;;  %v6968_v13 = vld [vmem:[%s9551_s1 + $0x1170] ss:$8 sps:$4 sm:$0xff]  }
 0x1cc   :  { %4835 = vmatprep.subr.bf16.mxu0 %v6888_v10  ;;  %v945_v10 = vrot.slane %v923_v46, %v7421_v48  ;;  %v7030_v46 = vld [vmem:[%s9551_s1 + $0x11d4] ss:$8 sps:$4 sm:$0xff]  }
 0x1cd   :  { %4875 = vmatpush1.bf16.msra.mxu1 %v6883_v34  ;;  %v905_v34 = vcombine.high %v889_v7, %v889_v7 }
 0x1ce   :  { %4876 = vmatprep.subr.bf16.mxu1 %v6891_v12  ;;  %v6973_v12 = vld [vmem:[%s9551_s1 + $0x1064] ss:$8 sps:$4 sm:$0xff]  }
 0x1cf   :  { %4836 = vmatpush1.bf16.msra.mxu0 %v6886_v15  ;;  %v955_v15 = vcombine.high %v945_v10, %v945_v10 }
 0x1d0   :  { %4837 = vmatprep.subr.bf16.mxu0 %v6894_v16 }
 0x1d1   :  { %4877 = vmatpush1.bf16.msra.mxu1 %v6889_v17  ;;  %v6976_v17 = vld [vmem:[%s9551_s1 + $0x1164] ss:$8 sps:$4 sm:$0xff]  }
 0x1d2   :  { %4878 = vmatprep.subr.bf16.mxu1 %v6897_v19 }
 0x1d3   :  { %4838 = vmatpush1.bf16.msra.mxu0 %v6892_v20  ;;  %v6971_v20 = vld [vmem:[%s9551_s1 + $0x1060] ss:$8 sps:$4 sm:$0xff]  }
 0x1d4   :  { %4839 = vmatprep.subr.bf16.mxu0 %v6900_v21 }
 0x1d5   :  { %4879 = vmatpush1.bf16.msra.mxu1 %v6895_v22 }
 0x1d6   :  { %4880 = vmatprep.subr.bf16.mxu1 %v6903_v23  ;;  %v6979_v23 = vld [vmem:[%s9551_s1 + $0x1054] ss:$8 sps:$4 sm:$0xff]  }
 0x1d7   :  { %4840 = vmatpush1.bf16.msra.mxu0 %v6898_v0 }
 0x1d8   :  { %4841 = vmatprep.subr.bf16.mxu0 %v6906_v25 }
 0x1d9   :  { %4881 = vmatpush1.bf16.msra.mxu1 %v6901_v26 }
 0x1da   :  { %4882 = vmatprep.subr.bf16.mxu1 %v6909_v27 }
 0x1db   :  { %4842 = vmatpush1.bf16.msra.mxu0 %v6904_v6  ;;  %v6982_v6 = vld [vmem:[%s9551_s1 + $0x1154] ss:$8 sps:$4 sm:$0xff]  }
 0x1dc   :  { %4843 = vmatprep.subr.bf16.mxu0 %v6912_v31 }
 0x1dd   :  { %4883 = vmatpush1.bf16.msra.mxu1 %v6907_v32 }
 0x1de   :  { %4884 = vmatprep.subr.bf16.mxu1 %v6915_v59  ;;  %v6985_v59 = vld [vmem:[%s9551_s1 + $0x1044] ss:$8 sps:$4 sm:$0xff]  }
 0x1df   :  { %4844 = vmatpush1.bf16.msra.mxu0 %v6910_v33 }
 0x1e0   :  { %4845 = vmatprep.subr.bf16.mxu0 %v6918_v35  ;;  %v6980_v35 = vld [vmem:[%s9551_s1 + $0x1150] ss:$8 sps:$4 sm:$0xff]  }
 0x1e1   :  { %4885 = vmatpush1.bf16.msra.mxu1 %v6913_v36  ;;  %v6988_v36 = vld [vmem:[%s9551_s1 + $0x1144] ss:$8 sps:$4 sm:$0xff]  }
 0x1e2   :  { %4886 = vmatprep.subr.bf16.mxu1 %v6921_v28 }
 0x1e3   :  { %4846 = vmatpush2.bf16.msra.mxu0 %v6916_v37  ;;  %v6983_v37 = vld [vmem:[%s9551_s1 + $0x1040] ss:$8 sps:$4 sm:$0xff]  }
 0x1e4   :  { %4847 = vmatprep.subr.bf16.mxu0 %v6924_v38  ;;  %v6991_v38 = vld [vmem:[%s9551_s1 + $0x1034] ss:$8 sps:$4 sm:$0xff]  }
 0x1e5   :  { %4887 = vmatpush2.bf16.msra.mxu1 %v6919_v39  ;;  %v6986_v39 = vld [vmem:[%s9551_s1 + $0x1140] ss:$8 sps:$4 sm:$0xff]  }
 0x1e6   :  { %4888 = vmatprep.subr.bf16.mxu1 %v6927_v14  ;;  %v6994_v14 = vld [vmem:[%s9551_s1 + $0x1134] ss:$8 sps:$4 sm:$0xff]  }
 0x1e7   :  { %4848 = vmatpush2.bf16.msra.mxu0 %v6922_v41  ;;  %v6989_v41 = vld [vmem:[%s9551_s1 + $0x1030] ss:$8 sps:$4 sm:$0xff]  }
 0x1e8   :  { %4849 = vmatprep.subr.bf16.mxu0 %v6930_v43  ;;  %v6997_v43 = vld [vmem:[%s9551_s1 + $0x1024] ss:$8 sps:$4 sm:$0xff]  }
 0x1e9   :  { %4889 = vmatpush2.bf16.msra.mxu1 %v6925_v44  ;;  %v6992_v44 = vld [vmem:[%s9551_s1 + $0x1130] ss:$8 sps:$4 sm:$0xff]  }
 0x1ea   :  { %4890 = vmatprep.subr.bf16.mxu1 %v6933_v45  ;;  %v7000_v45 = vld [vmem:[%s9551_s1 + $0x1124] ss:$8 sps:$4 sm:$0xff]  }
 0x1eb   :  { %4850 = vmatpush2.bf16.msra.mxu0 %v6928_v5  ;;  %v6995_v5 = vld [vmem:[%s9551_s1 + $0x1020] ss:$8 sps:$4 sm:$0xff]  }
 0x1ec   :  { %4851 = vmatprep.subr.bf16.mxu0 %v6936_v47  ;;  %v7003_v47 = vld [vmem:[%s9551_s1 + $0x1014] ss:$8 sps:$4 sm:$0xff]  }
 0x1ed   :  { %4891 = vmatpush2.bf16.msra.mxu1 %v6931_v49  ;;  %v6998_v49 = vld [vmem:[%s9551_s1 + $0x1120] ss:$8 sps:$4 sm:$0xff]  }
 0x1ee   :  { %4892 = vmatprep.subr.bf16.mxu1 %v6939_v50  ;;  %v7006_v50 = vld [vmem:[%s9551_s1 + $0x1114] ss:$8 sps:$4 sm:$0xff]  }
 0x1ef   :  { %4852 = vmatpush2.bf16.msra.mxu0 %v6934_v29  ;;  %v7001_v29 = vld [vmem:[%s9551_s1 + $0x1010] ss:$8 sps:$4 sm:$0xff]  }
 0x1f0   :  { %4853 = vmatprep.subr.bf16.mxu0 %v6942_v51  ;;  %v7009_v51 = vld [vmem:[%s9551_s1 + $0x1004] ss:$8 sps:$4 sm:$0xff]  }
 0x1f1   :  { %4893 = vmatpush2.bf16.msra.mxu1 %v6937_v52  ;;  %v7004_v52 = vld [vmem:[%s9551_s1 + $0x1110] ss:$8 sps:$4 sm:$0xff]  }
 0x1f2   :  { %4894 = vmatprep.subr.bf16.mxu1 %v6945_v53  ;;  %v7012_v53 = vld [vmem:[%s9551_s1 + $0x1104] ss:$8 sps:$4 sm:$0xff]  }
 0x1f3   :  { %4854 = vmatpush2.bf16.msra.mxu0 %v6940_v18  ;;  %v7007_v18 = vld [vmem:[%s9551_s1 + $0x1000] ss:$8 sps:$4 sm:$0xff]  }
 0x1f4   :  { %4855 = vmatprep.subr.bf16.mxu0 %v6948_v42  ;;  %v7015_v42 = vld [vmem:[%s9551_s1 + $0x10f4] ss:$8 sps:$4 sm:$0xff]  }
 0x1f5   :  { %4895 = vmatpush2.bf16.msra.mxu1 %v6943_v54  ;;  %v7010_v54 = vld [vmem:[%s9551_s1 + $0x1100] ss:$8 sps:$4 sm:$0xff]  }
 0x1f6   :  { %4896 = vmatprep.subr.bf16.mxu1 %v6951_v55  ;;  %v7018_v55 = vld [vmem:[%s9551_s1 + $0x11f4] ss:$8 sps:$4 sm:$0xff]  }
 0x1f7   :  { %4856 = vmatpush2.bf16.msra.mxu0 %v6946_v57  ;;  %v7013_v57 = vld [vmem:[%s9551_s1 + $0x10f0] ss:$8 sps:$4 sm:$0xff]  }
 0x1f8   :  { %4857 = vmatprep.subr.bf16.mxu0 %v6954_v58  ;;  %v7021_v58 = vld [vmem:[%s9551_s1 + $0x10e4] ss:$8 sps:$4 sm:$0xff]  }
 0x1f9   :  { %4897 = vmatpush2.bf16.msra.mxu1 %v6949_v30  ;;  %v7016_v30 = vld [vmem:[%s9551_s1 + $0x11f0] ss:$8 sps:$4 sm:$0xff]  }
 0x1fa   :  { %4898 = vmatprep.subr.bf16.mxu1 %v6957_v61  ;;  %v7024_v61 = vld [vmem:[%s9551_s1 + $0x11e4] ss:$8 sps:$4 sm:$0xff]  }
 0x1fb   :  { %4858 = vmatpush2.bf16.msra.mxu0 %v6952_v62  ;;  %v7019_v62 = vld [vmem:[%s9551_s1 + $0x10e0] ss:$8 sps:$4 sm:$0xff]  }
 0x1fc   :  { %4859 = vmatprep.subr.bf16.mxu0 %v6960_v63  ;;  %v7027_v63 = vld [vmem:[%s9551_s1 + $0x10d4] ss:$8 sps:$4 sm:$0xff]  }
 0x1fd   :  { %4899 = vmatpush2.bf16.msra.mxu1 %v6955_v1  ;;  %v7022_v1 = vld [vmem:[%s9551_s1 + $0x11e0] ss:$8 sps:$4 sm:$0xff]  }
 0x1fe   :  { %4900 = vmatprep.subr.bf16.mxu1 %v6963_v3  ;;  %v7025_v3 = vld [vmem:[%s9551_s1 + $0x10d0] ss:$8 sps:$4 sm:$0xff]  }
 0x1ff   :  { %4860 = vmatpush2.bf16.msra.mxu0 %v6958_v4  ;;  %v7033_v4 = vld [vmem:[%s9551_s1 + $0x10c4] ss:$8 sps:$4 sm:$0xff]  }
 0x200   :  { %4911 = vmatprep.subr.bf16.mxu0 %v6967_v24  ;;  %v7036_v24 = vld [vmem:[%s9551_s1 + $0x11c4] ss:$8 sps:$4 sm:$0xff]  }
 0x201   :  { %4901 = vmatpush2.bf16.msra.mxu1 %v6961_v9  ;;  %v7031_v9 = vld [vmem:[%s9551_s1 + $0x10c0] ss:$8 sps:$4 sm:$0xff]  }
 0x202   :  { %v4617_v16 = vpop.f32.mrf.mxu0  ;;  %4862 = vmatmul.mubr.bf16.vlgmr.msra.gmra.mxu0 %v889_v7  ;;  %4952 = vmatprep.subr.bf16.mxu1 %v6970_v11  ;;  %v7028_v7 = vld [vmem:[%s9551_s1 + $0x11d0] ss:$8 sps:$4 sm:$0xff]   ;;  %v7034_v11 = vld [vmem:[%s9551_s1 + $0x11c0] ss:$8 sps:$4 sm:$0xff]  }
 0x203   :  { %v4618_v19 = vadd.f32 %v4617_v16, %v8769_v2  ;;  %4912 = vmatpush1.bf16.msra.mxu0 %v6965_v40  ;;  %4943 = vmatprep.mubr.bf16.mxu0 %v945_v10  ;;  %v6974_v2 = vld [vmem:[%s9551_s1 + $0x1160] ss:$8 sps:$4 sm:$0xff]   ;;  %v7039_v10 = vld [vmem:[%s9551_s1 + $0x10b4] ss:$8 sps:$4 sm:$0xff]   ;;  %v7048_v16 = vld [vmem:[%s9551_s1 + $0x11a4] ss:$8 sps:$4 sm:$0xff]  }
 0x204   :  { %v4619_v21 = vpop.f32.mrf.mxu0  ;;  %v4658_v22 = vpop.f32.mrf.mxu1  ;;  %4903 = vmatmul.mubr.bf16.vlgmr.msra.gmra.mxu1 %v905_v34  ;;  %4913 = vmatprep.subr.bf16.mxu0 %v6973_v12  ;;  %v7042_v40 = vld [vmem:[%s9551_s1 + $0x11b4] ss:$8 sps:$4 sm:$0xff]   ;;  %v7037_v34 = vld [vmem:[%s9551_s1 + $0x10b0] ss:$8 sps:$4 sm:$0xff]   ;;  %v7045_v12 = vld [vmem:[%s9551_s1 + $0x10a4] ss:$8 sps:$4 sm:$0xff]  }
 0x205   :  { %v4620_v0 = vadd.f32 %v4619_v21, %v8777_v8  ;;  %v8981_v25 = vadd.f32 %v4658_v22, %v4618_v19  ;;  %4953 = vmatpush1.bf16.msra.mxu1 %v6968_v13  ;;  %4984 = vmatprep.mubr.bf16.mxu1 %v955_v15  ;;  %v6977_v8 = vld [vmem:[%s9551_s1 + $0x1050] ss:$8 sps:$4 sm:$0xff]   ;;  %v908_v15 = vcombine.high %v8914_v56, %v8914_v56  ;;  %v7051_v19 = vld [vmem:[%s9551_s1 + $0x1094] ss:$8 sps:$4 sm:$0xff]   ;;  %v7046_v56 = vld [vmem:[%s9551_s1 + $0x11a0] ss:$8 sps:$4 sm:$0xff]  }
 0x206   :  { %v4621_v26 = vpop.f32.mrf.mxu0  ;;  %v4660_v27 = vpop.f32.mrf.mxu1  ;;  %4954 = vmatprep.subr.bf16.mxu1 %v6976_v17  ;;  %v7040_v13 = vld [vmem:[%s9551_s1 + $0x11b0] ss:$8 sps:$4 sm:$0xff]   ;;  %v7043_v17 = vld [vmem:[%s9551_s1 + $0x10a0] ss:$8 sps:$4 sm:$0xff]   ;;  %v7054_v21 = vld [vmem:[%s9551_s1 + $0x1194] ss:$8 sps:$4 sm:$0xff]  }
 0x207   :  { %v8989_v31 = vadd.f32 %v4660_v27, %v4620_v0  ;;  %4914 = vmatpush1.bf16.msra.mxu0 %v6971_v20  ;;  %v9135_v20 = vrot.slane %v908_v15, %v7421_v48  ;;  %v7049_v22 = vld [vmem:[%s9551_s1 + $0x1090] ss:$8 sps:$4 sm:$0xff]   ;;  %v7060_v26 = vld [vmem:[%s9551_s1 + $0x1184] ss:$8 sps:$4 sm:$0xff]   ;;  %v7055_v27 = vld [vmem:[%s9551_s1 + $0x1080] ss:$8 sps:$4 sm:$0xff]  }
 0x208   :  { %v4622_v32 = vpop.f32.mrf.mxu0  ;;  %4915 = vmatprep.subr.bf16.mxu0 %v6979_v23  ;;  %v4662_v33 = vpop.f32.mrf.mxu1  ;;  %v7057_v23 = vld [vmem:[%s9551_s1 + $0x1084] ss:$8 sps:$4 sm:$0xff]   ;;  %v7052_v0 = vld [vmem:[%s9551_s1 + $0x1190] ss:$8 sps:$4 sm:$0xff]   ;;  %v7114_v15 = vld [vmem:[%s9551_s1 + $0x13f4] ss:$8 sps:$4 sm:$0xff]  }
 0x209   :  { %4955 = vmatpush1.bf16.msra.mxu1 %v6974_v2  ;;  %v924_v2 = vcombine.high %v9135_v20, %v9135_v20  ;;  %v7058_v32 = vld [vmem:[%s9551_s1 + $0x1180] ss:$8 sps:$4 sm:$0xff]   ;;  %v7066_v33 = vld [vmem:[%s9551_s1 + $0x1374] ss:$8 sps:$4 sm:$0xff]  }
 0x20a   :  { %4956 = vmatprep.subr.bf16.mxu1 %v6982_v6  ;;  %v4663_v28 = vpop.f32.mrf.mxu1  ;;  %v931_v6 = vrot.slane %v8927_v60, %v7421_v48  ;;  %v7061_v60 = vld [vmem:[%s9551_s1 + $0x1270] ss:$8 sps:$4 sm:$0xff]  }
 0x20b   :  { %4916 = vmatpush1.bf16.msra.mxu0 %v6977_v8  ;;  %v7063_v8 = vld [vmem:[%s9551_s1 + $0x1274] ss:$8 sps:$4 sm:$0xff]   ;;  %v7064_v28 = vld [vmem:[%s9551_s1 + $0x1370] ss:$8 sps:$4 sm:$0xff]  }
 0x20c   :  { %4917 = vmatprep.subr.bf16.mxu0 %v6985_v59  ;;  %v952_v59 = vrot.slane %v924_v2, %v7421_v48  ;;  %v7121_v2 = vld [vmem:[%s9551_s1 + $0x12d0] ss:$8 sps:$4 sm:$0xff]  }
 0x20d   :  { %4957 = vmatpush1.bf16.msra.mxu1 %v6980_v35  ;;  %v953_v35 = vcombine.high %v931_v6, %v931_v6 }
 0x20e   :  { %4958 = vmatprep.subr.bf16.mxu1 %v6988_v36  ;;  %v7069_v36 = vld [vmem:[%s9551_s1 + $0x1264] ss:$8 sps:$4 sm:$0xff]  }
 0x20f   :  { %4918 = vmatpush1.bf16.msra.mxu0 %v6983_v37  ;;  %v956_v37 = vcombine.high %v952_v59, %v952_v59 }
 0x210   :  { %4919 = vmatprep.subr.bf16.mxu0 %v6991_v38 }
 0x211   :  { %4959 = vmatpush1.bf16.msra.mxu1 %v6986_v39  ;;  %v7072_v39 = vld [vmem:[%s9551_s1 + $0x1364] ss:$8 sps:$4 sm:$0xff]  }
 0x212   :  { %4960 = vmatprep.subr.bf16.mxu1 %v6994_v14 }
 0x213   :  { %4920 = vmatpush1.bf16.msra.mxu0 %v6989_v41  ;;  %v7067_v41 = vld [vmem:[%s9551_s1 + $0x1260] ss:$8 sps:$4 sm:$0xff]  }
 0x214   :  { %4921 = vmatprep.subr.bf16.mxu0 %v6997_v43 }
 0x215   :  { %4961 = vmatpush1.bf16.msra.mxu1 %v6992_v44 }
 0x216   :  { %4962 = vmatprep.subr.bf16.mxu1 %v7000_v45  ;;  %v7075_v45 = vld [vmem:[%s9551_s1 + $0x1254] ss:$8 sps:$4 sm:$0xff]  }
 0x217   :  { %4922 = vmatpush1.bf16.msra.mxu0 %v6995_v5 }
 0x218   :  { %4923 = vmatprep.subr.bf16.mxu0 %v7003_v47 }
 0x219   :  { %4963 = vmatpush1.bf16.msra.mxu1 %v6998_v49 }
 0x21a   :  { %4964 = vmatprep.subr.bf16.mxu1 %v7006_v50 }
 0x21b   :  { %4924 = vmatpush1.bf16.msra.mxu0 %v7001_v29  ;;  %v7078_v29 = vld [vmem:[%s9551_s1 + $0x1354] ss:$8 sps:$4 sm:$0xff]  }
 0x21c   :  { %4925 = vmatprep.subr.bf16.mxu0 %v7009_v51 }
 0x21d   :  { %4965 = vmatpush1.bf16.msra.mxu1 %v7004_v52 }
 0x21e   :  { %4966 = vmatprep.subr.bf16.mxu1 %v7012_v53  ;;  %v7081_v53 = vld [vmem:[%s9551_s1 + $0x1244] ss:$8 sps:$4 sm:$0xff]  }
 0x21f   :  { %4926 = vmatpush1.bf16.msra.mxu0 %v7007_v18 }
 0x220   :  { %4927 = vmatprep.subr.bf16.mxu0 %v7015_v42  ;;  %v7076_v42 = vld [vmem:[%s9551_s1 + $0x1350] ss:$8 sps:$4 sm:$0xff]  }
 0x221   :  { %4967 = vmatpush1.bf16.msra.mxu1 %v7010_v54  ;;  %v7084_v54 = vld [vmem:[%s9551_s1 + $0x1344] ss:$8 sps:$4 sm:$0xff]  }
 0x222   :  { %4968 = vmatprep.subr.bf16.mxu1 %v7018_v55 }
 0x223   :  { %4928 = vmatpush2.bf16.msra.mxu0 %v7013_v57  ;;  %v7079_v57 = vld [vmem:[%s9551_s1 + $0x1240] ss:$8 sps:$4 sm:$0xff]  }
 0x224   :  { %4929 = vmatprep.subr.bf16.mxu0 %v7021_v58  ;;  %v7087_v58 = vld [vmem:[%s9551_s1 + $0x1234] ss:$8 sps:$4 sm:$0xff]  }
 0x225   :  { %4969 = vmatpush2.bf16.msra.mxu1 %v7016_v30  ;;  %v7082_v30 = vld [vmem:[%s9551_s1 + $0x1340] ss:$8 sps:$4 sm:$0xff]  }
 0x226   :  { %4970 = vmatprep.subr.bf16.mxu1 %v7024_v61  ;;  %v7090_v61 = vld [vmem:[%s9551_s1 + $0x1334] ss:$8 sps:$4 sm:$0xff]  }
 0x227   :  { %4930 = vmatpush2.bf16.msra.mxu0 %v7019_v62  ;;  %v7085_v62 = vld [vmem:[%s9551_s1 + $0x1230] ss:$8 sps:$4 sm:$0xff]  }
 0x228   :  { %4931 = vmatprep.subr.bf16.mxu0 %v7027_v63  ;;  %v7093_v63 = vld [vmem:[%s9551_s1 + $0x1224] ss:$8 sps:$4 sm:$0xff]  }
 0x229   :  { %4971 = vmatpush2.bf16.msra.mxu1 %v7022_v1  ;;  %v7088_v1 = vld [vmem:[%s9551_s1 + $0x1330] ss:$8 sps:$4 sm:$0xff]  }
 0x22a   :  { %4972 = vmatprep.subr.bf16.mxu1 %v7030_v46  ;;  %v7096_v46 = vld [vmem:[%s9551_s1 + $0x1324] ss:$8 sps:$4 sm:$0xff]  }
 0x22b   :  { %4932 = vmatpush2.bf16.msra.mxu0 %v7025_v3  ;;  %v7091_v3 = vld [vmem:[%s9551_s1 + $0x1220] ss:$8 sps:$4 sm:$0xff]  }
 0x22c   :  { %4933 = vmatprep.subr.bf16.mxu0 %v7033_v4  ;;  %v7099_v4 = vld [vmem:[%s9551_s1 + $0x1214] ss:$8 sps:$4 sm:$0xff]  }
 0x22d   :  { %4973 = vmatpush2.bf16.msra.mxu1 %v7028_v7  ;;  %v7094_v7 = vld [vmem:[%s9551_s1 + $0x1320] ss:$8 sps:$4 sm:$0xff]  }
 0x22e   :  { %4974 = vmatprep.subr.bf16.mxu1 %v7036_v24  ;;  %v7102_v24 = vld [vmem:[%s9551_s1 + $0x1314] ss:$8 sps:$4 sm:$0xff]  }
 0x22f   :  { %4934 = vmatpush2.bf16.msra.mxu0 %v7031_v9  ;;  %v7097_v9 = vld [vmem:[%s9551_s1 + $0x1210] ss:$8 sps:$4 sm:$0xff]  }
 0x230   :  { %4935 = vmatprep.subr.bf16.mxu0 %v7039_v10  ;;  %v7105_v10 = vld [vmem:[%s9551_s1 + $0x1204] ss:$8 sps:$4 sm:$0xff]  }
 0x231   :  { %4975 = vmatpush2.bf16.msra.mxu1 %v7034_v11  ;;  %v7100_v11 = vld [vmem:[%s9551_s1 + $0x1310] ss:$8 sps:$4 sm:$0xff]  }
 0x232   :  { %4976 = vmatprep.subr.bf16.mxu1 %v7042_v40  ;;  %v7108_v40 = vld [vmem:[%s9551_s1 + $0x1304] ss:$8 sps:$4 sm:$0xff]  }
 0x233   :  { %4936 = vmatpush2.bf16.msra.mxu0 %v7037_v34  ;;  %v7103_v34 = vld [vmem:[%s9551_s1 + $0x1200] ss:$8 sps:$4 sm:$0xff]  }
 0x234   :  { %4937 = vmatprep.subr.bf16.mxu0 %v7045_v12  ;;  %v7111_v12 = vld [vmem:[%s9551_s1 + $0x12f4] ss:$8 sps:$4 sm:$0xff]  }
 0x235   :  { %4977 = vmatpush2.bf16.msra.mxu1 %v7040_v13  ;;  %v7106_v13 = vld [vmem:[%s9551_s1 + $0x1300] ss:$8 sps:$4 sm:$0xff]  }
 0x236   :  { %4978 = vmatprep.subr.bf16.mxu1 %v7048_v16  ;;  %v7109_v16 = vld [vmem:[%s9551_s1 + $0x12f0] ss:$8 sps:$4 sm:$0xff]  }
 0x237   :  { %4938 = vmatpush2.bf16.msra.mxu0 %v7043_v17  ;;  %v7117_v17 = vld [vmem:[%s9551_s1 + $0x12e4] ss:$8 sps:$4 sm:$0xff]  }
 0x238   :  { %4939 = vmatprep.subr.bf16.mxu0 %v7051_v19  ;;  %v7112_v19 = vld [vmem:[%s9551_s1 + $0x13f0] ss:$8 sps:$4 sm:$0xff]  }
 0x239   :  { %4979 = vmatpush2.bf16.msra.mxu1 %v7046_v56  ;;  %v7120_v56 = vld [vmem:[%s9551_s1 + $0x13e4] ss:$8 sps:$4 sm:$0xff]  }
 0x23a   :  { %4980 = vmatprep.subr.bf16.mxu1 %v7054_v21  ;;  %v7115_v21 = vld [vmem:[%s9551_s1 + $0x12e0] ss:$8 sps:$4 sm:$0xff]  }
 0x23b   :  { %4940 = vmatpush2.bf16.msra.mxu0 %v7049_v22  ;;  %v7123_v22 = vld [vmem:[%s9551_s1 + $0x12d4] ss:$8 sps:$4 sm:$0xff]  }
 0x23c   :  { %4941 = vmatprep.subr.bf16.mxu0 %v7057_v23  ;;  %v7118_v23 = vld [vmem:[%s9551_s1 + $0x13e0] ss:$8 sps:$4 sm:$0xff]  }
 0x23d   :  { %4981 = vmatpush2.bf16.msra.mxu1 %v7052_v0  ;;  %v7126_v0 = vld [vmem:[%s9551_s1 + $0x13d4] ss:$8 sps:$4 sm:$0xff]  }
 0x23e   :  { %4982 = vmatprep.subr.bf16.mxu1 %v7060_v26  ;;  %v7129_v26 = vld [vmem:[%s9551_s1 + $0x12c4] ss:$8 sps:$4 sm:$0xff]  }
 0x23f   :  { %4942 = vmatpush2.bf16.msra.mxu0 %v7055_v27  ;;  %v7124_v27 = vld [vmem:[%s9551_s1 + $0x13d0] ss:$8 sps:$4 sm:$0xff]  }
 0x240   :  { %4993 = vmatprep.subr.bf16.mxu0 %v7063_v8  ;;  %v7127_v8 = vld [vmem:[%s9551_s1 + $0x12c0] ss:$8 sps:$4 sm:$0xff]  }
 0x241   :  { %4983 = vmatpush2.bf16.msra.mxu1 %v7058_v32  ;;  %v7135_v32 = vld [vmem:[%s9551_s1 + $0x12b4] ss:$8 sps:$4 sm:$0xff]  }
 0x242   :  { %v4699_v38 = vpop.f32.mrf.mxu0  ;;  %4944 = vmatmul.mubr.bf16.vlgmr.msra.gmra.mxu0 %v931_v6  ;;  %5034 = vmatprep.subr.bf16.mxu1 %v7066_v33  ;;  %v7132_v6 = vld [vmem:[%s9551_s1 + $0x13c4] ss:$8 sps:$4 sm:$0xff]   ;;  %v7138_v33 = vld [vmem:[%s9551_s1 + $0x13b4] ss:$8 sps:$4 sm:$0xff]  }
 0x243   :  { %v4700_v14 = vadd.f32 %v4699_v38, %v8981_v25  ;;  %4994 = vmatpush1.bf16.msra.mxu0 %v7061_v60  ;;  %5025 = vmatprep.mubr.bf16.mxu0 %v952_v59  ;;  %v7070_v25 = vld [vmem:[%s9551_s1 + $0x1360] ss:$8 sps:$4 sm:$0xff]   ;;  %v7133_v60 = vld [vmem:[%s9551_s1 + $0x12b0] ss:$8 sps:$4 sm:$0xff]   ;;  %v7147_v38 = vld [vmem:[%s9551_s1 + $0x1294] ss:$8 sps:$4 sm:$0xff]  }
 0x244   :  { %v4701_v43 = vpop.f32.mrf.mxu0  ;;  %v4740_v44 = vpop.f32.mrf.mxu1  ;;  %4985 = vmatmul.mubr.bf16.vlgmr.msra.gmra.mxu1 %v953_v35  ;;  %4995 = vmatprep.subr.bf16.mxu0 %v7069_v36  ;;  %v7130_v59 = vld [vmem:[%s9551_s1 + $0x13c0] ss:$8 sps:$4 sm:$0xff]   ;;  %v7141_v35 = vld [vmem:[%s9551_s1 + $0x12a4] ss:$8 sps:$4 sm:$0xff]   ;;  %v7136_v36 = vld [vmem:[%s9551_s1 + $0x13b0] ss:$8 sps:$4 sm:$0xff]  }
 0x245   :  { %v4702_v5 = vadd.f32 %v4701_v43, %v8989_v31  ;;  %v9189_v47 = vadd.f32 %v4740_v44, %v4700_v14  ;;  %5035 = vmatpush1.bf16.msra.mxu1 %v7064_v28  ;;  %5066 = vmatprep.mubr.bf16.mxu1 %v956_v37  ;;  %v7073_v31 = vld [vmem:[%s9551_s1 + $0x1250] ss:$8 sps:$4 sm:$0xff]   ;;  %v7144_v28 = vld [vmem:[%s9551_s1 + $0x13a4] ss:$8 sps:$4 sm:$0xff]   ;;  %v7139_v37 = vld [vmem:[%s9551_s1 + $0x12a0] ss:$8 sps:$4 sm:$0xff]  }
 0x246   :  { %v4703_v49 = vpop.f32.mrf.mxu0  ;;  %v4742_v50 = vpop.f32.mrf.mxu1  ;;  %5036 = vmatprep.subr.bf16.mxu1 %v7072_v39  ;;  %v7142_v39 = vld [vmem:[%s9551_s1 + $0x13a0] ss:$8 sps:$4 sm:$0xff]   ;;  %v7150_v14 = vld [vmem:[%s9551_s1 + $0x1394] ss:$8 sps:$4 sm:$0xff]   ;;  %v7153_v43 = vld [vmem:[%s9551_s1 + $0x1284] ss:$8 sps:$4 sm:$0xff]  }
 0x247   :  { %v9197_v51 = vadd.f32 %v4742_v50, %v4702_v5  ;;  %4996 = vmatpush1.bf16.msra.mxu0 %v7067_v41  ;;  %v7145_v41 = vld [vmem:[%s9551_s1 + $0x1290] ss:$8 sps:$4 sm:$0xff]   ;;  %v7151_v5 = vld [vmem:[%s9551_s1 + $0x1280] ss:$8 sps:$4 sm:$0xff]   ;;  %v7160_v49 = vld [vmem:[%s9551_s1 + $0x1434] ss:$8 sps:$4 sm:$0xff]  }
 0x248   :  { %v4704_v52 = vpop.f32.mrf.mxu0  ;;  %4997 = vmatprep.subr.bf16.mxu0 %v7075_v45  ;;  %v4744_v18 = vpop.f32.mrf.mxu1  ;;  %v7148_v44 = vld [vmem:[%s9551_s1 + $0x1390] ss:$8 sps:$4 sm:$0xff]   ;;  %v7156_v45 = vld [vmem:[%s9551_s1 + $0x1384] ss:$8 sps:$4 sm:$0xff]   ;;  %v7154_v50 = vld [vmem:[%s9551_s1 + $0x1380] ss:$8 sps:$4 sm:$0xff]  }
 0x249   :  { %5037 = vmatpush1.bf16.msra.mxu1 %v7070_v25  ;;  %v938_v25 = vrot.slane %v9135_v20, %v7421_v48  ;;  %v7163_v20 = vld [vmem:[%s9551_s1 + $0x1424] ss:$8 sps:$4 sm:$0xff]   ;;  %v7161_v18 = vld [vmem:[%s9551_s1 + $0x1420] ss:$8 sps:$4 sm:$0xff]  }
 0x24a   :  { %5038 = vmatprep.subr.bf16.mxu1 %v7078_v29  ;;  %v4745_v55 = vpop.f32.mrf.mxu1  ;;  %v7158_v29 = vld [vmem:[%s9551_s1 + $0x1430] ss:$8 sps:$4 sm:$0xff]  }
 0x24b   :  { %4998 = vmatpush1.bf16.msra.mxu0 %v7073_v31  ;;  %v954_v31 = vcombine.high %v938_v25, %v938_v25 }
 0x24c   :  { %4999 = vmatprep.subr.bf16.mxu0 %v7081_v53 }
 0x24d   :  { %5039 = vmatpush1.bf16.msra.mxu1 %v7076_v42  ;;  %v7221_v42 = vmov 0  }
 0x24e   :  { %5040 = vmatprep.subr.bf16.mxu1 %v7084_v54 }
 0x24f   :  { %5000 = vmatpush1.bf16.msra.mxu0 %v7079_v57  ;;  %v7166_v57 = vld [vmem:[%s9551_s1 + $0x1414] ss:$8 sps:$4 sm:$0xff]  }
 0x250   :  { %5001 = vmatprep.subr.bf16.mxu0 %v7087_v58 }
 0x251   :  { %5041 = vmatpush1.bf16.msra.mxu1 %v7082_v30 }
 0x252   :  { %5042 = vmatprep.subr.bf16.mxu1 %v7090_v61 }
 0x253   :  { %5002 = vmatpush1.bf16.msra.mxu0 %v7085_v62 }
 0x254   :  { %5003 = vmatprep.subr.bf16.mxu0 %v7093_v63  ;;  %v7164_v63 = vld [vmem:[%s9551_s1 + $0x1410] ss:$8 sps:$4 sm:$0xff]  }
 0x255   :  { %5043 = vmatpush1.bf16.msra.mxu1 %v7088_v1 }
 0x256   :  { %5044 = vmatprep.subr.bf16.mxu1 %v7096_v46  ;;  %v7169_v46 = vld [vmem:[%s9551_s1 + $0x1404] ss:$8 sps:$4 sm:$0xff]  }
 0x257   :  { %5004 = vmatpush1.bf16.msra.mxu0 %v7091_v3 }
 0x258   :  { %5005 = vmatprep.subr.bf16.mxu0 %v7099_v4 }
 0x259   :  { %5045 = vmatpush1.bf16.msra.mxu1 %v7094_v7  ;;  %v5150_v7 = vld [vmem:[%s9554_s4 + $0xf8] sm:$0xff] }
 0x25a   :  { %5046 = vmatprep.subr.bf16.mxu1 %v7102_v24  ;;  %v5134_v24 = vld [vmem:[%s9554_s4 + $0x78] sm:$0xff] }
 0x25b   :  { %5006 = vmatpush1.bf16.msra.mxu0 %v7097_v9  ;;  %v5149_v9 = vld [vmem:[%s9554_s4 + $0xf0] sm:$0xff] }
 0x25c   :  { %5007 = vmatprep.subr.bf16.mxu0 %v7105_v10  ;;  %v5461_v10 = vld.sshfl [vmem:[%s9550_s0 + $0x28] sm:$0x1 pattern:$0x75316420]  ;;  %s7225_s0 = smov 96  }
 0x25d   :  { %5047 = vmatpush1.bf16.msra.mxu1 %v7100_v11  ;;  %v5133_v11 = vld [vmem:[%s9554_s4 + $0x70] sm:$0xff] }
 0x25e   :  { %5048 = vmatprep.subr.bf16.mxu1 %v7108_v40  ;;  %v5148_v40 = vld [vmem:[%s9554_s4 + $0xe8] sm:$0xff] }
 0x25f   :  { %5008 = vmatpush1.bf16.msra.mxu0 %v7103_v34  ;;  %v5132_v34 = vld [vmem:[%s9554_s4 + $0x68] sm:$0xff] }
 0x260   :  { %5009 = vmatprep.subr.bf16.mxu0 %v7111_v12  ;;  %v970_v12 = vrot.slane %v5461_v10, %v7421_v48  ;;  %v5230_v48 = vld [vmem:[%s9555_s5 + $0x10] sm:$0xff] }
 0x261   :  { %5049 = vmatpush1.bf16.msra.mxu1 %v7106_v13  ;;  %v5147_v13 = vld [vmem:[%s9554_s4 + $0xe0] sm:$0xff] }
 0x262   :  { %5050 = vmatprep.subr.bf16.mxu1 %v7114_v15  ;;  %v5131_v15 = vld [vmem:[%s9554_s4 + $0x60] sm:$0xff] }
 0x263   :  { %5010 = vmatpush2.bf16.msra.mxu0 %v7109_v16  ;;  %v7222_v16 = vmov 0.0  }
 0x264   :  { %5011 = vmatprep.subr.bf16.mxu0 %v7117_v17  ;;  %v5231_v17 = vld [vmem:[%s9555_s5 + $0x18] sm:$0xff] }
 0x265   :  { %5051 = vmatpush2.bf16.msra.mxu1 %v7112_v19  ;;  %v5229_v19 = vld [vmem:[%s9555_s5 + $0x8] sm:$0xff] }
 0x266   :  { %5052 = vmatprep.subr.bf16.mxu1 %v7120_v56  ;;  %v5228_v56 = vld [vmem:[%s9555_s5] sm:$0xff] }
 0x267   :  { %5012 = vmatpush2.bf16.msra.mxu0 %v7115_v21  ;;  %v9438_v21 = vld [vmem:[%s9553_s3] sm:$0x3] }
 0x268   :  { %5013 = vmatprep.subr.bf16.mxu0 %v7123_v22  ;;  %v5146_v22 = vld [vmem:[%s9554_s4 + $0xd8] sm:$0xff] }
 0x269   :  { %5053 = vmatpush2.bf16.msra.mxu1 %v7118_v23 }
 0x26a   :  { %5054 = vmatprep.subr.bf16.mxu1 %v7126_v0  ;;  %v5130_v0 = vld [vmem:[%s9554_s4 + $0x58] sm:$0xff] }
 0x26b   :  { %5014 = vmatpush2.bf16.msra.mxu0 %v7121_v2 }
 0x26c   :  { %5015 = vmatprep.subr.bf16.mxu0 %v7129_v26  ;;  %v5145_v26 = vld [vmem:[%s9554_s4 + $0xd0] sm:$0xff] }
 0x26d   :  { %5055 = vmatpush2.bf16.msra.mxu1 %v7124_v27 }
 0x26e   :  { %5056 = vmatprep.subr.bf16.mxu1 %v7132_v6 }
 0x26f   :  { %5016 = vmatpush2.bf16.msra.mxu0 %v7127_v8  ;;  %v5129_v8 = vld [vmem:[%s9554_s4 + $0x50] sm:$0xff] }
 0x270   :  { %5017 = vmatprep.subr.bf16.mxu0 %v7135_v32 }
 0x271   :  { %5057 = vmatpush2.bf16.msra.mxu1 %v7130_v59 }
 0x272   :  { %5058 = vmatprep.subr.bf16.mxu1 %v7138_v33  ;;  %v5144_v33 = vld [vmem:[%s9554_s4 + $0xc8] sm:$0xff] }
 0x273   :  { %5018 = vmatpush2.bf16.msra.mxu0 %v7133_v60 }
 0x274   :  { %5019 = vmatprep.subr.bf16.mxu0 %v7141_v35 }
 0x275   :  { %5059 = vmatpush2.bf16.msra.mxu1 %v7136_v36  ;;  %v5128_v36 = vld [vmem:[%s9554_s4 + $0x48] sm:$0xff] }
 0x276   :  { %5060 = vmatprep.subr.bf16.mxu1 %v7144_v28 }
 0x277   :  { %5020 = vmatpush2.bf16.msra.mxu0 %v7139_v37  ;;  %v5143_v37 = vld [vmem:[%s9554_s4 + $0xc0] sm:$0xff] }
 0x278   :  { %5021 = vmatprep.subr.bf16.mxu0 %v7147_v38 }
 0x279   :  { %5061 = vmatpush2.bf16.msra.mxu1 %v7142_v39 }
 0x27a   :  { %5062 = vmatprep.subr.bf16.mxu1 %v7150_v14  ;;  %v5127_v14 = vld [vmem:[%s9554_s4 + $0x40] sm:$0xff] }
 0x27b   :  { %5022 = vmatpush2.bf16.msra.mxu0 %v7145_v41  ;;  %v5142_v41 = vld [vmem:[%s9554_s4 + $0xb8] sm:$0xff] }
 0x27c   :  { %5023 = vmatprep.subr.bf16.mxu0 %v7153_v43  ;;  %v5126_v43 = vld [vmem:[%s9554_s4 + $0x38] sm:$0xff] }
 0x27d   :  { %5063 = vmatpush2.bf16.msra.mxu1 %v7148_v44  ;;  %v5141_v44 = vld [vmem:[%s9554_s4 + $0xb0] sm:$0xff] }
 0x27e   :  { %5064 = vmatprep.subr.bf16.mxu1 %v7156_v45 }
 0x27f   :  { %5024 = vmatpush2.bf16.msra.mxu0 %v7151_v5  ;;  %v5125_v5 = vld [vmem:[%s9554_s4 + $0x30] sm:$0xff] }
 0x280   :  { %5083 = vmatprep.subr.bf16.mxu0 %v7160_v49  ;;  %v5124_v49 = vld [vmem:[%s9554_s4 + $0x28] sm:$0xff] }
 0x281   :  { %5065 = vmatpush2.bf16.msra.mxu1 %v7154_v50  ;;  %v5139_v50 = vld [vmem:[%s9554_s4 + $0xa0] sm:$0xff] }
 0x282   :  { %v4781_v52 = vpop.f32.mrf.mxu0  ;;  %5026 = vmatmul.mubr.bf16.vlgmr.msra.gmra.mxu0 %v938_v25  ;;  %6117 = vmatprep.subr.mxu1 %v5150_v7  ;;  %v5140_v25 = vld [vmem:[%s9554_s4 + $0xa8] sm:$0xff] }
 0x283   :  { %v4782_v53 = vadd.f32 %v4781_v52, %v9189_v47  ;;  %5084 = vmatpush1.bf16.msra.mxu0 %v7158_v29  ;;  %5107 = vmatprep.mubr.bf16.mxu0 %v7221_v42  ;;  %v5123_v29 = vld [vmem:[%s9554_s4 + $0x20] sm:$0xff]  ;;  %v5137_v52 = vld [vmem:[%s9554_s4 + $0x90] sm:$0xff]  ;;  %v5120_v42 = vld [vmem:[%s9554_s4 + $0x8] sm:$0xff] }
 0x284   :  { %v4783_v54 = vpop.f32.mrf.mxu0  ;;  %v4822_v55 = vpop.f32.mrf.mxu1  ;;  %5067 = vmatmul.mubr.bf16.vlgmr.msra.gmra.mxu1 %v954_v31  ;;  %5085 = vmatprep.subr.bf16.mxu0 %v7163_v20  ;;  %v5138_v31 = vld [vmem:[%s9554_s4 + $0x98] sm:$0xff] }
 0x285   :  { %v4784_v58 = vadd.f32 %v4783_v54, %v9197_v51  ;;  %v4823_v30 = vadd.f32 %v4822_v55, %v4782_v53  ;;  %v7167_v51 = vld [vmem:[%s9551_s1 + $0x1400] ss:$8 sps:$4 sm:$0xff]   ;;  %6118 = vmatpush3.msra.mxu1 %v5134_v24  ;;  %v5122_v20 = vld [vmem:[%s9554_s4 + $0x18] sm:$0xff]  ;;  %v5121_v53 = vld [vmem:[%s9554_s4 + $0x10] sm:$0xff] }
 0x286   :  { %v4785_v61 = vpop.f32.mrf.mxu0  ;;  %v4824_v47 = vpop.f32.mrf.mxu1  ;;  %6119 = vmatprep.subr.mxu1 %v5149_v9  ;;  %v5135_v54 = vld [vmem:[%s9554_s4 + $0x80] sm:$0xff] }
 0x287   :  { %v9380_v62 = vadd.f32 %v4824_v47, %v4784_v58  ;;  %5086 = vmatpush1.bf16.msra.mxu0 %v7161_v18  ;;  %6120 = vmatpush3.msra.mxu1 %v5133_v11  ;;  %v5136_v18 = vld [vmem:[%s9554_s4 + $0x88] sm:$0xff]  ;;  %v5119_v55 = vld [vmem:[%s9554_s4] sm:$0xff] }
 0x288   :  { %v4786_v1 = vpop.f32.mrf.mxu0  ;;  %5087 = vmatprep.subr.bf16.mxu0 %v7166_v57  ;;  %v4826_v3 = vpop.f32.mrf.mxu1  ;;  %6121 = vmatprep.subr.mxu1 %v5148_v40 }
 0x289   :  { %6122 = vmatpush3.msra.mxu1 %v5132_v34 }
 0x28a   :  { %v4827_v4 = vpop.f32.mrf.mxu1  ;;  %6123 = vmatprep.subr.mxu1 %v5147_v13 }
 0x28b   :  { %5088 = vmatpush1.bf16.msra.mxu0 %v7164_v63  ;;  %6124 = vmatpush3.msra.mxu1 %v5131_v15 }
 0x28c   :  { %5089 = vmatprep.subr.bf16.mxu0 %v7169_v46  ;;  %6125 = vmatprep.subr.mxu1 %v5146_v22 }
 0x28d   :  { %6126 = vmatpush3.msra.mxu1 %v5130_v0 }
 0x28e   :  { %6127 = vmatprep.subr.mxu1 %v5145_v26 }
 0x28f   :  { %5090 = vmatpush1.bf16.msra.mxu0 %v7167_v51  ;;  %6128 = vmatpush3.msra.mxu1 %v5129_v8 }
 0x290   :  { %6162 = vmatprep.subr.mxu0 %v7222_v16  ;;  %6129 = vmatprep.subr.mxu1 %v5144_v33 }
 0x291   :  { %6130 = vmatpush3.msra.mxu1 %v5128_v36 }
 0x292   :  { %6110 = vmatmul.mubr.msk.bf16.vlgmr.msra.gmra.mxu0 %vm4251_vm0, %v970_v12  ;;  %6131 = vmatprep.subr.mxu1 %v5143_v37 }
 0x293   :  { %6163 = vmatpush3.msra.mxu0 %v5231_v17  ;;  %6170 = vmatprep.mubr.msk.f32.mxu0 %vm7223_vm1, %v7222_v16 }
 0x294   :  { %6164 = vmatprep.subr.mxu0 %v7222_v16  ;;  %6132 = vmatpush3.msra.mxu1 %v5127_v14 }
 0x295   :  { %6165 = vmatpush3.msra.mxu0 %v5230_v48  ;;  %6133 = vmatprep.subr.mxu1 %v5142_v41 }
 0x296   :  { %6166 = vmatprep.subr.mxu0 %v7222_v16  ;;  %6134 = vmatpush3.msra.mxu1 %v5126_v43 }
 0x297   :  { %6167 = vmatpush3.msra.mxu0 %v5229_v19  ;;  %6135 = vmatprep.subr.mxu1 %v5141_v44 }
 0x298   :  { %6168 = vmatprep.subr.mxu0 %v7222_v16  ;;  %6136 = vmatpush3.msra.mxu1 %v5125_v5 }
 0x299   :  { %6169 = vmatpush3.msra.mxu0 %v5228_v56  ;;  %6137 = vmatprep.subr.mxu1 %v5140_v25  ;;  %v5345_v25 = vld [vmem:[%s9558_s8 + $0x18] sm:$0xff] }
 0x29a   :  { %6171 = vmatmul.mubr.msk.f32.vlgmr.msra.gmra.mxu0 %vm5239_vm2, %v9438_v21  ;;  %6173 = vmatprep.subr.mxu0 %v7222_v16 }
 0x29b   :  { %6181 = vmatprep.mubr.msk.f32.mxu0 %vm7223_vm1, %v7222_v16  ;;  %6138 = vmatpush3.msra.mxu1 %v5124_v49  ;;  %v5344_v49 = vld [vmem:[%s9558_s8 + $0x10] sm:$0xff] }
 0x29c   :  { %6139 = vmatprep.subr.mxu1 %v5139_v50  ;;  %6174 = vmatpush3.msra.mxu0 %v5345_v25  ;;  %v5343_v50 = vld [vmem:[%s9558_s8 + $0x8] sm:$0xff] }
 0x29d   :  { %6140 = vmatpush3.msra.mxu1 %v5123_v29  ;;  %6175 = vmatprep.subr.mxu0 %v7222_v16 }
 0x29e   :  { %6141 = vmatprep.subr.mxu1 %v5138_v31  ;;  %6176 = vmatpush3.msra.mxu0 %v5344_v49  ;;  %v5342_v31 = vld [vmem:[%s9558_s8] sm:$0xff]  ;;  %s7227_s8 = smov [#allocation4]  }
 0x29f   :  { %6142 = vmatpush3.msra.mxu1 %v5122_v20  ;;  %6177 = vmatprep.subr.mxu0 %v7222_v16  ;;  %s5449_s2 = sshll.u32 %s7227_s8, 4  ;;  %s5450_s2 = int_to_ptr.vmem [resolvable:$true] %s5449_s2 }
 0x2a0   :  { %6143 = vmatprep.subr.mxu1 %v5137_v52  ;;  %6178 = vmatpush3.msra.mxu0 %v5343_v50  ;;  %s7176_s26 = scalar_lea.vmem %s5450_s2, 32  ;;  %p7181_p1 = scmp.lt.s32.totalorder %s5450_s2, %s5450_s2 }
 0x2a1   :  { %6144 = vmatpush3.msra.mxu1 %v5121_v53  ;;  %6179 = vmatprep.subr.mxu0 %v7222_v16  ;;  %p7177_p0 = scmp.ne.s32.totalorder %s5450_s2, %s7176_s26  ;;  %p7182_p2 = scmp.lt.s32.totalorder %s7176_s26, %s7176_s26 }
 0x2a2   :  { %6145 = vmatprep.subr.mxu1 %v5136_v18  ;;  %6180 = vmatpush3.msra.mxu0 %v5342_v31 }
 0x2a3   :  { %6146 = vmatpush3.msra.mxu1 %v5120_v42  ;;  %p7183_p3 = por %p7182_p2, %p7181_p1 }
 0x2a4   :  { %6147 = vmatprep.subr.mxu1 %v5135_v54 }
 0x2a5   :  { %6148 = vmatpush3.msra.mxu1 %v5119_v55  ;;  %p7184_p4 = pnand %p7183_p3, %p7177_p0 }
 0x2c2   :  { %v4863_v23 = vpop.f32.mrf.mxu0 }
 0x2c3   :  { %v4864_v2 = vadd.f32 %v4863_v23, %v4823_v30 }
 0x2c4   :  { %v4865_v27 = vpop.f32.mrf.mxu0  ;;  %v4904_v6 = vpop.f32.mrf.mxu1 }
 0x2c5   :  { %v4866_v32 = vadd.f32 %v4865_v27, %v9380_v62  ;;  %v4905_v59 = vadd.f32 %v4904_v6, %v4864_v2  ;;  %v6112_v6 = vld [vmem:[%s9557_s7] ss:$0 sm:$0xff] }
 0x2c6   :  { %v4867_v60 = vpop.f32.mrf.mxu0  ;;  %v4906_v35 = vpop.f32.mrf.mxu1 }
 0x2c7   :  { %v4907_v28 = vadd.f32 %v4906_v35, %v4866_v32  ;;  %v6111_v60 = vld [vmem:[%s9556_s6] ss:$0 sm:$0xff] }
 0x2c8   :  { %v4868_v38 = vpop.f32.mrf.mxu0  ;;  %v4908_v39 = vpop.f32.mrf.mxu1 }
 0x2ca   :  { %v4909_v45 = vpop.f32.mrf.mxu1 }
 0x302   :  { %v4945_v57 = vpop.f32.mrf.mxu0 }
 0x303   :  { %v4946_v58 = vadd.f32 %v4945_v57, %v4905_v59 }
 0x304   :  { %v4947_v30 = vpop.f32.mrf.mxu0  ;;  %v4986_v61 = vpop.f32.mrf.mxu1 }
 0x305   :  { %v4948_v47 = vadd.f32 %v4947_v30, %v4907_v28  ;;  %v4987_v62 = vadd.f32 %v4986_v61, %v4946_v58 }
 0x306   :  { %v4949_v63 = vpop.f32.mrf.mxu0  ;;  %v4988_v1 = vpop.f32.mrf.mxu1 }
 0x307   :  { %v4989_v46 = vadd.f32 %v4988_v1, %v4948_v47 }
 0x308   :  { %v4950_v3 = vpop.f32.mrf.mxu0  ;;  %v4990_v51 = vpop.f32.mrf.mxu1 }
 0x30a   :  { %v4991_v4 = vpop.f32.mrf.mxu1 }
 0x342   :  { %v5027_v7 = vpop.f32.mrf.mxu0 }
 0x343   :  { %v5028_v13 = vadd.f32 %v5027_v7, %v4987_v62 }
 0x344   :  { %v5029_v24 = vpop.f32.mrf.mxu0  ;;  %v5068_v9 = vpop.f32.mrf.mxu1 }
 0x345   :  { %v5030_v15 = vadd.f32 %v5029_v24, %v4989_v46  ;;  %v5069_v17 = vadd.f32 %v5068_v9, %v5028_v13 }
 0x346   :  { %v5031_v10 = vpop.f32.mrf.mxu0  ;;  %v5070_v11 = vpop.f32.mrf.mxu1 }
 0x347   :  { %v5071_v19 = vadd.f32 %v5070_v11, %v5030_v15 }
 0x348   :  { %v5032_v40 = vpop.f32.mrf.mxu0  ;;  %v5072_v34 = vpop.f32.mrf.mxu1 }
 0x34a   :  { %v5073_v12 = vpop.f32.mrf.mxu1 }
 0x352   :  { %v5109_v48 = vpop.f32.mrf.mxu0 }
 0x353   :  { %v5110_v56 = vadd.f32 %v5109_v48, %v5069_v17 }
 0x354   :  { %v5111_v22 = vpop.f32.mrf.mxu0 }
 0x355   :  { %v5112_v23 = vadd.f32 %v5111_v22, %v5071_v19  ;;  %v5116_v26 = vmax.f32 %v5110_v56, 0.0 }
 0x356   :  { %v5113_v0 = vpop.f32.mrf.mxu0 }
 0x357   :  { %v5117_v2 = vmax.f32 %v5112_v23, 0.0 }
 0x358   :  { %v5114_v27 = vpop.f32.mrf.mxu0 }
 0x359   :  { %5222 = vmatprep.mubr.f32.mxu1 %v5117_v2 }
 0x35a   :  { %5223 = vmatmul.mubr.f32.vlgmr.msra.gmra.mxu1 %v5116_v26  ;;  %v5309_v8 = vpop.f32.mrf.mxu0 }
 0x35b   :  { %v5310_v32 = vadd.f32 %v6112_v6, %v5309_v8 }
 0x35c   :  { %v6172_v59 = vpop.f32.mrf.mxu0 }
 0x35d   :  { %5321 = vrot.lane.b32.xlu0 %v5310_v32, %s7224_s19 }
 0x3cf   :  { %v5322_v41 = vpop.permute.xlu0 %5321 }
 0x41a   :  { %v6149_v33 = vpop.f32.mrf.mxu1 }
 0x41c   :  { %v6150_v35 = vpop.f32.mrf.mxu1 }
 0x41d   :  { %v6151_v36 = vadd.f32 %v6150_v35, %v6149_v33 }
 0x41f   :  { %v5225_v28 = vadd.f32 %v6151_v36, %v6111_v60 }
 0x421   :  { %v5313_v37 = vadd.f32 %v5310_v32, %v5225_v28 }
 0x423   :  { %v6114_v38 = vmul.f32 -1.442695, %v5313_v37 }
 0x425   :  { %7170 = vpow2.f32 %v6114_v38 }
 0x432   :  { %v7171_v39 = vpop.eup %7170 }
 0x433   :  { %v5317_v14 = vadd.f32 1.0, %v7171_v39 }
 0x435   :  { %7172 = vrcp.f32 %v5317_v14 }
 0x442   :  { %v7173_v43 = vpop.eup %7172 }
 0x443   :  { %v5324_v44 = vmul.f32 %v7173_v43, %v5322_v41  ;;  %v5331_v52 = vsub.f32 1.0, %v7173_v43 }
 0x445   :  { %5326 = vrot.lane.b32.xlu0 %v5324_v44, %s7224_s19 }
 0x4b7   :  { %v5327_v45 = vpop.permute.xlu0 %5326 }
 0x4b8   :  { %v5329_v5 = vadd.f32 %v5327_v45, %v5225_v28 }
 0x4ba   :  { %7174 = vtanh.f32 %v5329_v5 }
 0x4c7   :  { %v7175_v29 = vpop.eup %7174 }
 0x4c8   :  { %5333 = vrot.lane.b32.xlu1 %v7175_v29, %s7225_s0 }
 0x4cc   :  { %5337 = vrot.lane.b32.xlu1 %v9438_v21, %s7226_s25 }
 0x53a   :  { %v5334_v20 = vpop.permute.xlu1 %5333 }
 0x53b   :  { %v5336_v18 = vmul.f32 %v5334_v20, %v5331_v52 }
 0x53e   :  { %v5338_v53 = vpop.permute.xlu1 %5337 }
 0x53f   :  { %v5340_v42 = vmul.f32 %v7173_v43, %v5338_v53 }
 0x541   :  { %v5341_v54 = vadd.f32 %v5340_v42, %v5336_v18 }
 0x543   :  { %5354 = vrot.lane.b32.xlu0 %v5341_v54, %s7225_s0 }
 0x5b5   :  { %v5355_v55 = vpop.permute.xlu0 %5354 }
 0x5b6   :  { %5430 = vst.msk [vmem:[#allocation4] sm:$0x3] %vm5429_vm3, %v5355_v55  ;;  %6182 = vmatmul.mubr.msk.f32.vlgmr.msra.gmra.mxu0 %vm5239_vm2, %v5355_v55 }
 0x5b7   :  { %7187 = shalt.err (!%p7184_p4)
}
 0x5b8   :  { %5452 = dma.vmem_to_hbm [thread:$0]  %s5450_s2, 32, %s9561_s11, [#allocation5]   ;;  %v6115_v16 = vld [vmem:[%s9559_s9] ss:$0 sm:$0xff]  ;;  %vm5431_vm4 = vcmask 41984  }
 0x5b9   :  { %s7228_s12 = smov [#allocation2]  }
 0x5ba   :  { %s5439_s13 = sshll.u32 %s7228_s12, 4  ;;  %s5440_s13 = int_to_ptr.vmem [resolvable:$true] %s5439_s13 }
 0x5bb   :  { %s7196_s14 = scalar_lea.vmem %s5440_s13, 32  ;;  %p7201_p6 = scmp.lt.s32.totalorder %s5440_s13, %s5440_s13 }
 0x5bc   :  { %p7197_p5 = scmp.ne.s32.totalorder %s5440_s13, %s7196_s14  ;;  %p7202_p7 = scmp.lt.s32.totalorder %s7196_s14, %s7196_s14 }
 0x5be   :  { %p7203_p8 = por %p7202_p7, %p7201_p6 }
 0x5c0   :  { %p7204_p9 = pnand %p7203_p8, %p7197_p5 }
 0x676   :  { %v5424_v21 = vpop.f32.mrf.mxu0 }
 0x677   :  { %v5425_v57 = vadd.f32 %v6115_v16, %v5424_v21 }
 0x678   :  { %v6183_v58 = vpop.f32.mrf.mxu0 }
 0x679   :  { %5432 = vst.msk [vmem:[#allocation2] sm:$0x3] %vm5431_vm4, %v5425_v57 }
 0x67a   :  { %7207 = shalt.err (!%p7204_p9)
}
 0x67b   :  { %5442 = dma.vmem_to_hbm [thread:$0]  %s5440_s13, 32, %s9560_s10, [#allocation3]  }
 0x67c   :  { %7216 = dma.done.wait [#allocation3], 32  }
 0x67d   :  { %7217 = vsyncadd [#allocation3], 4294967264 }
 0x67e   :  { %7218 = dma.done.wait [#allocation5], 32  }
 0x67f   :  { %7219 = vsyncadd [#allocation5], 4294967264 }
 0x680   :  { %5459 = vsyncpa [#allocation3], 1 }
 0x681   :  { %5460 = vsyncpa [#allocation5], 1 }

</bundles_post_ra>
